<compile_context>
chip_gen: v5e
topology: v5e:2x2
jax: 0.10.0
libtpu: 0.0.40
codegen_flags: <defaults>
</compile_context>

<pallas_src>
import functools

import jax
import jax.numpy as jnp
from jax.experimental import pallas as pl
from jax.experimental.pallas import tpu as pltpu

_VMEM_LIMIT = 64 * 1024 * 1024  # sized for v7x (64 MiB physical VMEM)

# Whole-array-in-VMEM spec for the (tiny) fc head.
_VMEM = functools.partial(pl.BlockSpec, memory_space=pltpu.MemorySpace.VMEM)


def _lane_tile(m, target=2048):
    """Largest multiple of 128 <= target that evenly divides m, else m (1 block)."""
    if m <= target:
        return m
    t = (target // 128) * 128
    while t >= 128:
        if m % t == 0:
            return t
        t -= 128
    return m


# ----------------------------- Pallas kernels ------------------------------ #

def _conv1_pool_kernel(w_ref, b_ref, p_ref, o_ref):
    """Fused conv1 GEMM + bias + ReLU + 2x2 max-pool.

    p_ref: (4, CKK, TM) im2col patches grouped by position inside the 2x2 pool
           window (parity); columns ordered (b, pooled_h, pooled_w).
    w_ref: (OC, CKK); b_ref: (OC, 1); o_ref: (OC, TM) pooled activations.
    relu(max_p(acc_p) + b) == maxpool(relu(acc + b)) since ReLU is monotone.
    """
    w = w_ref[...]
    acc = jnp.dot(w, p_ref[0], preferred_element_type=jnp.float32)
    for p in range(1, 4):
        acc = jnp.maximum(
            acc, jnp.dot(w, p_ref[p], preferred_element_type=jnp.float32))
    o_ref[...] = jnp.maximum(acc + b_ref[...], 0.0).astype(o_ref.dtype)


def _conv_relu_kernel(w_ref, b_ref, p_ref, o_ref):
    """Fused conv GEMM + bias + ReLU: o(OC, TM) = relu(W @ patches + b)."""
    acc = jnp.dot(w_ref[...], p_ref[...], preferred_element_type=jnp.float32)
    o_ref[...] = jnp.maximum(acc + b_ref[...], 0.0).astype(o_ref.dtype)


def _mlp_head_kernel(x_ref, w1_ref, b1_ref, w2_ref, b2_ref, o_ref):
    """Fused fc1 + ReLU + fc2 + log_softmax; (B, 500) stays in VMEM/vregs."""
    h = jnp.dot(x_ref[...], w1_ref[...], preferred_element_type=jnp.float32)
    h = jnp.maximum(h + b1_ref[...], 0.0)
    logits = jnp.dot(h, w2_ref[...], preferred_element_type=jnp.float32)
    logits = logits + b2_ref[...]
    m = jnp.max(logits, axis=-1, keepdims=True)
    s = logits - m
    lse = jnp.log(jnp.sum(jnp.exp(s), axis=-1, keepdims=True))
    o_ref[...] = (s - lse).astype(o_ref.dtype)


# ------------------------------ Pallas wrappers ----------------------------- #

def conv1_relu_pool(patches, w2d, b):
    """patches: (4, CKK, M), w2d: (OC, CKK), b: (OC, 1) -> pooled (OC, M)."""
    _, ckk, m = patches.shape
    oc = w2d.shape[0]
    tm = _lane_tile(m)
    cost = pl.CostEstimate(
        flops=2 * 4 * oc * ckk * m,
        transcendentals=0,
        bytes_accessed=4 * (patches.size + w2d.size + b.size + oc * m),
    )
    return pl.pallas_call(
        _conv1_pool_kernel,
        out_shape=jax.ShapeDtypeStruct((oc, m), patches.dtype),
        grid=(m // tm,),
        in_specs=[
            pl.BlockSpec((oc, ckk), lambda j: (0, 0)),
            pl.BlockSpec((oc, 1), lambda j: (0, 0)),
            pl.BlockSpec((4, ckk, tm), lambda j: (0, 0, j)),
        ],
        out_specs=pl.BlockSpec((oc, tm), lambda j: (0, j)),
        compiler_params=pltpu.CompilerParams(
            dimension_semantics=("parallel",),
            vmem_limit_bytes=_VMEM_LIMIT,
        ),
        cost_estimate=cost,
    )(w2d, b, patches)


def conv_relu(patches, w2d, b):
    """patches: (CKK, M), w2d: (OC, CKK), b: (OC, 1) -> (OC, M)."""
    ckk, m = patches.shape
    oc = w2d.shape[0]
    tm = _lane_tile(m)
    cost = pl.CostEstimate(
        flops=2 * oc * ckk * m,
        transcendentals=0,
        bytes_accessed=4 * (patches.size + w2d.size + b.size + oc * m),
    )
    return pl.pallas_call(
        _conv_relu_kernel,
        out_shape=jax.ShapeDtypeStruct((oc, m), patches.dtype),
        grid=(m // tm,),
        in_specs=[
            pl.BlockSpec((oc, ckk), lambda j: (0, 0)),
            pl.BlockSpec((oc, 1), lambda j: (0, 0)),
            pl.BlockSpec((ckk, tm), lambda j: (0, j)),
        ],
        out_specs=pl.BlockSpec((oc, tm), lambda j: (0, j)),
        compiler_params=pltpu.CompilerParams(
            dimension_semantics=("parallel",),
            vmem_limit_bytes=_VMEM_LIMIT,
        ),
        cost_estimate=cost,
    )(w2d, b, patches)


def mlp_head(x, w1t, b1, w2t, b2):
    """x: (B, K1); w1t: (K1, N1); w2t: (N1, N2) -> log_softmax(fc2(relu(fc1(x))))."""
    batch, k1 = x.shape
    n1 = w1t.shape[1]
    n2 = w2t.shape[1]
    cost = pl.CostEstimate(
        flops=2 * batch * (k1 * n1 + n1 * n2),
        transcendentals=batch * (n2 + 1),
        bytes_accessed=4 * (x.size + w1t.size + b1.size + w2t.size + b2.size
                            + batch * n2),
    )
    return pl.pallas_call(
        _mlp_head_kernel,
        out_shape=jax.ShapeDtypeStruct((batch, n2), x.dtype),
        in_specs=[_VMEM()] * 5,
        out_specs=_VMEM(),
        compiler_params=pltpu.CompilerParams(vmem_limit_bytes=_VMEM_LIMIT),
        cost_estimate=cost,
    )(x, w1t, b1, w2t, b2)


# --------------------------- JAX glue (im2col etc.) ------------------------- #

def _conv1_patches_pool_order(x):
    """x: (B, 1, 28, 28) -> (4, 25, B*144) parity-grouped conv1 im2col patches.

    Leading axis = position inside the 2x2 pool window; columns ordered
    (b, pooled_h, pooled_w); rows ordered (kh, kw) to match w1.reshape(10, 25).
    """
    batch = x.shape[0]
    k, ho = 5, 24
    x2 = x[:, 0]                                   # (B, 28, 28)
    rows = []
    for kh in range(k):
        for kw in range(k):
            s = x2[:, kh:kh + ho, kw:kw + ho]      # (B, 24, 24)
            s = s.reshape(batch, 12, 2, 12, 2)     # (b, po, ph, pw, pwp)
            s = s.transpose(2, 4, 0, 1, 3)         # (ph, pwp, b, po, pw)
            rows.append(s.reshape(4, batch * 144))
    return jnp.stack(rows, axis=1)                 # (4, 25, B*144)


def _conv2_patches(pooled1, batch):
    """pooled1: (10, B*144) with cols (b, h, w) -> (90, B*100) conv2 im2col."""
    c, k, hi, ho = 10, 3, 12, 10
    p4 = pooled1.reshape(c, batch, hi, hi)
    rows = []
    for kh in range(k):
        for kw in range(k):
            s = p4[:, :, kh:kh + ho, kw:kw + ho]   # (10, B, 10, 10)
            rows.append(s.reshape(c, batch * ho * ho))
    p = jnp.stack(rows, axis=1)                    # (10, 9, B*100); rows (c,kh,kw)
    return p.reshape(c * k * k, batch * ho * ho)


def init_params(key):
    """PyTorch-layout params, PyTorch-style uniform(-1/sqrt(fan_in), +) init."""
    ks = jax.random.split(key, 8)

    def u(k, shape, fan_in):
        bound = 1.0 / jnp.sqrt(jnp.float32(fan_in))
        return jax.random.uniform(k, shape, jnp.float32, -bound, bound)

    return {
        "w1": u(ks[0], (10, 1, 5, 5), 1 * 5 * 5),
        "b1": u(ks[1], (10,), 1 * 5 * 5),
        "w2": u(ks[2], (20, 10, 3, 3), 10 * 3 * 3),
        "b2": u(ks[3], (20,), 10 * 3 * 3),
        "wf1": u(ks[4], (500, 20 * 10 * 10), 20 * 10 * 10),
        "bf1": u(ks[5], (500,), 20 * 10 * 10),
        "wf2": u(ks[6], (10, 500), 500),
        "bf2": u(ks[7], (10,), 500),
    }


def prepare_params(params):
    """Pre-reshape / pre-transpose weights ONCE, outside the jitted forward."""
    return {
        "w1": params["w1"].reshape(10, 25),        # (OC, C*k*k)
        "b1": params["b1"].reshape(10, 1),
        "w2": params["w2"].reshape(20, 90),
        "b2": params["b2"].reshape(20, 1),
        "wf1t": params["wf1"].T,                   # (2000, 500)
        "bf1": params["bf1"].reshape(1, 500),
        "wf2t": params["wf2"].T,                   # (500, 10)
        "bf2": params["bf2"].reshape(1, 10),
    }


@jax.jit
def convnet_forward(prep, x):
    batch = x.shape[0]
    # conv1 + ReLU + 2x2 max-pool, fused; lane-dense output (10, B*144).
    p1 = _conv1_patches_pool_order(x)
    pooled1 = conv1_relu_pool(p1, prep["w1"], prep["b1"])
    # conv2 + ReLU, fused; lane-dense output (20, B*100).
    p2 = _conv2_patches(pooled1, batch)
    out2 = conv_relu(p2, prep["w2"], prep["b2"])
    # Tiny re-pack (B*2000 floats) into PyTorch's NCHW flatten order for fc1.
    x_fc = out2.reshape(20, batch, 100).transpose(1, 0, 2).reshape(batch, 2000)
    # fc1 + ReLU + fc2 + log_softmax, fused.
    return mlp_head(x_fc, prep["wf1t"], prep["bf1"], prep["wf2t"], prep["bf2"])


# --------------------------- pure-JAX reference ----------------------------- #

def reference_forward(params, x):
    dn = ("NCHW", "OIHW", "NCHW")
    out = jax.lax.conv_general_dilated(x, params["w1"], (1, 1), "VALID",
                                       dimension_numbers=dn)
    out = jax.nn.relu(out + params["b1"][None, :, None, None])
    out = jax.lax.reduce_window(out, -jnp.inf, jax.lax.max,
                                (1, 1, 2, 2), (1, 1, 2, 2), "VALID")
    out = jax.lax.conv_general_dilated(out, params["w2"], (1, 1), "VALID",
                                       dimension_numbers=dn)
    out = jax.nn.relu(out + params["b2"][None, :, None, None])
    out = out.reshape(x.shape[0], -1)
    out = jax.nn.relu(out @ params["wf1"].T + params["bf1"])
    out = out @ params["wf2"].T + params["bf2"]
    return jax.nn.log_softmax(out, axis=1)


# --------------------------------- main ------------------------------------ #

if __name__ == "__main__":
    key = jax.random.PRNGKey(0)
    pkey, xkey = jax.random.split(key)
    params = init_params(pkey)
    prep = prepare_params(params)   # one-time weight prep, outside jit
    # MNIST-shaped input implied by fc1 = Linear(20*10*10, 500): (B, 1, 28, 28)
    x = jax.random.normal(xkey, (2, 1, 28, 28), dtype=jnp.float32)

    out = convnet_forward(prep, x)
    out = jax.block_until_ready(out)

    ref = reference_forward(params, x)
    assert out.shape == (2, 10)
    assert jnp.allclose(out, ref, atol=2e-4, rtol=2e-4), "mismatch vs reference"

    print("KERNEL_OK")
</pallas_src>

<mosaic_0001>
module attributes {stable_mosaic.version = 11 : i64} {
  func.func @_conv1_pool_kernel(%arg0: i32, %arg1: memref<10x25xf32, #tpu.memory_space<vmem>>, %arg2: memref<10x1xf32, #tpu.memory_space<vmem>>, %arg3: memref<4x25x288xf32, #tpu.memory_space<vmem>>, %arg4: memref<10x288xf32, #tpu.memory_space<vmem>>) attributes {dimension_semantics = [#tpu.dimension_semantics<parallel>], iteration_bounds = array<i64: 1>, scalar_prefetch = 0 : i64, scratch_operands = 0 : i64, tpu.core_type = #tpu.core_type<tc>, window_params = [{pipeline_mode = #tpu.pipeline_mode<synchronous>, transform_indices = @transform_0, window_bounds = array<i64: 10, 25>}, {pipeline_mode = #tpu.pipeline_mode<synchronous>, transform_indices = @transform_1, window_bounds = array<i64: 10, 1>}, {transform_indices = @transform_2, window_bounds = array<i64: 4, 25, 288>}, {transform_indices = @transform_3, window_bounds = array<i64: 10, 288>}]} {
    %c0 = arith.constant 0 : index
    %c0_0 = arith.constant 0 : index
    %0 = vector.load %arg1[%c0, %c0_0] : memref<10x25xf32, #tpu.memory_space<vmem>>, vector<10x25xf32>
    %c0_1 = arith.constant 0 : index
    %c0_2 = arith.constant 0 : index
    %c0_3 = arith.constant 0 : index
    %1 = vector.load %arg3[%c0_1, %c0_2, %c0_3] : memref<4x25x288xf32, #tpu.memory_space<vmem>>, vector<1x25x288xf32>
    %2 = vector.shape_cast %1 : vector<1x25x288xf32> to vector<25x288xf32>
    %cst = arith.constant dense<0.000000e+00> : vector<10x288xf32>
    %3 = tpu.matmul %0, %2, %cst {dimension_numbers = #tpu.dot_dimension_numbers<[1], [0], [0], [1], [0, 0, 1, 1], [], []>} : vector<10x25xf32>, vector<25x288xf32>, vector<10x288xf32> -> vector<10x288xf32>
    %c1 = arith.constant 1 : index
    %c0_4 = arith.constant 0 : index
    %c0_5 = arith.constant 0 : index
    %4 = vector.load %arg3[%c1, %c0_4, %c0_5] : memref<4x25x288xf32, #tpu.memory_space<vmem>>, vector<1x25x288xf32>
    %5 = vector.shape_cast %4 : vector<1x25x288xf32> to vector<25x288xf32>
    %cst_6 = arith.constant dense<0.000000e+00> : vector<10x288xf32>
    %6 = tpu.matmul %0, %5, %cst_6 {dimension_numbers = #tpu.dot_dimension_numbers<[1], [0], [0], [1], [0, 0, 1, 1], [], []>} : vector<10x25xf32>, vector<25x288xf32>, vector<10x288xf32> -> vector<10x288xf32>
    %7 = arith.maximumf %3, %6 : vector<10x288xf32>
    %c2 = arith.constant 2 : index
    %c0_7 = arith.constant 0 : index
    %c0_8 = arith.constant 0 : index
    %8 = vector.load %arg3[%c2, %c0_7, %c0_8] : memref<4x25x288xf32, #tpu.memory_space<vmem>>, vector<1x25x288xf32>
    %9 = vector.shape_cast %8 : vector<1x25x288xf32> to vector<25x288xf32>
    %cst_9 = arith.constant dense<0.000000e+00> : vector<10x288xf32>
    %10 = tpu.matmul %0, %9, %cst_9 {dimension_numbers = #tpu.dot_dimension_numbers<[1], [0], [0], [1], [0, 0, 1, 1], [], []>} : vector<10x25xf32>, vector<25x288xf32>, vector<10x288xf32> -> vector<10x288xf32>
    %11 = arith.maximumf %7, %10 : vector<10x288xf32>
    %c3 = arith.constant 3 : index
    %c0_10 = arith.constant 0 : index
    %c0_11 = arith.constant 0 : index
    %12 = vector.load %arg3[%c3, %c0_10, %c0_11] : memref<4x25x288xf32, #tpu.memory_space<vmem>>, vector<1x25x288xf32>
    %13 = vector.shape_cast %12 : vector<1x25x288xf32> to vector<25x288xf32>
    %cst_12 = arith.constant dense<0.000000e+00> : vector<10x288xf32>
    %14 = tpu.matmul %0, %13, %cst_12 {dimension_numbers = #tpu.dot_dimension_numbers<[1], [0], [0], [1], [0, 0, 1, 1], [], []>} : vector<10x25xf32>, vector<25x288xf32>, vector<10x288xf32> -> vector<10x288xf32>
    %15 = arith.maximumf %11, %14 : vector<10x288xf32>
    %c0_13 = arith.constant 0 : index
    %c0_14 = arith.constant 0 : index
    %16 = vector.load %arg2[%c0_13, %c0_14] : memref<10x1xf32, #tpu.memory_space<vmem>>, vector<10x1xf32>
    %17 = vector.broadcast %16 : vector<10x1xf32> to vector<10x288xf32>
    %18 = arith.addf %15, %17 : vector<10x288xf32>
    %cst_15 = arith.constant 0.000000e+00 : f32
    %19 = vector.broadcast %cst_15 : f32 to vector<10x288xf32>
    %20 = arith.maximumf %18, %19 : vector<10x288xf32>
    %c0_16 = arith.constant 0 : index
    %c0_17 = arith.constant 0 : index
    %21 = vector.load %arg4[%c0_16, %c0_17] : memref<10x288xf32, #tpu.memory_space<vmem>>, vector<10x288xf32>
    tpu.vector_store %arg4[%c0_16, %c0_17], %20 {strides = array<i32>} : memref<10x288xf32, #tpu.memory_space<vmem>>, vector<10x288xf32>,
    return
  }
  func.func @transform_0(%arg0: i32) -> (i32, i32) {
    %c0_i32 = arith.constant 0 : i32
    %c0_i32_0 = arith.constant 0 : i32
    %c0_i32_1 = arith.constant 0 : i32
    return %c0_i32, %c0_i32_0 : i32, i32
  }
  func.func @transform_1(%arg0: i32) -> (i32, i32) {
    %c0_i32 = arith.constant 0 : i32
    %c0_i32_0 = arith.constant 0 : i32
    %c0_i32_1 = arith.constant 0 : i32
    return %c0_i32, %c0_i32_0 : i32, i32
  }
  func.func @transform_2(%arg0: i32) -> (i32, i32, i32) {
    %c0_i32 = arith.constant 0 : i32
    %c0_i32_0 = arith.constant 0 : i32
    %c0_i32_1 = arith.constant 0 : i32
    return %c0_i32, %c0_i32_0, %arg0 : i32, i32, i32
  }
  func.func @transform_3(%arg0: i32) -> (i32, i32) {
    %c0_i32 = arith.constant 0 : i32
    %c0_i32_0 = arith.constant 0 : i32
    return %c0_i32, %arg0 : i32, i32
  }
}

module attributes {stable_mosaic.version = 11 : i64} {
  func.func @_conv_relu_kernel(%arg0: i32, %arg1: memref<20x90xf32, #tpu.memory_space<vmem>>, %arg2: memref<20x1xf32, #tpu.memory_space<vmem>>, %arg3: memref<90x200xf32, #tpu.memory_space<vmem>>, %arg4: memref<20x200xf32, #tpu.memory_space<vmem>>) attributes {dimension_semantics = [#tpu.dimension_semantics<parallel>], iteration_bounds = array<i64: 1>, scalar_prefetch = 0 : i64, scratch_operands = 0 : i64, tpu.core_type = #tpu.core_type<tc>, window_params = [{pipeline_mode = #tpu.pipeline_mode<synchronous>, transform_indices = @transform_0, window_bounds = array<i64: 20, 90>}, {pipeline_mode = #tpu.pipeline_mode<synchronous>, transform_indices = @transform_1, window_bounds = array<i64: 20, 1>}, {transform_indices = @transform_2, window_bounds = array<i64: 90, 200>}, {transform_indices = @transform_3, window_bounds = array<i64: 20, 200>}]} {
    %c0 = arith.constant 0 : index
    %c0_0 = arith.constant 0 : index
    %0 = vector.load %arg1[%c0, %c0_0] : memref<20x90xf32, #tpu.memory_space<vmem>>, vector<20x90xf32>
    %c0_1 = arith.constant 0 : index
    %c0_2 = arith.constant 0 : index
    %1 = vector.load %arg3[%c0_1, %c0_2] : memref<90x200xf32, #tpu.memory_space<vmem>>, vector<90x200xf32>
    %cst = arith.constant dense<0.000000e+00> : vector<20x200xf32>
    %2 = tpu.matmul %0, %1, %cst {dimension_numbers = #tpu.dot_dimension_numbers<[1], [0], [0], [1], [0, 0, 1, 1], [], []>} : vector<20x90xf32>, vector<90x200xf32>, vector<20x200xf32> -> vector<20x200xf32>
    %c0_3 = arith.constant 0 : index
    %c0_4 = arith.constant 0 : index
    %3 = vector.load %arg2[%c0_3, %c0_4] : memref<20x1xf32, #tpu.memory_space<vmem>>, vector<20x1xf32>
    %4 = vector.broadcast %3 : vector<20x1xf32> to vector<20x200xf32>
    %5 = arith.addf %2, %4 : vector<20x200xf32>
    %cst_5 = arith.constant 0.000000e+00 : f32
    %6 = vector.broadcast %cst_5 : f32 to vector<20x200xf32>
    %7 = arith.maximumf %5, %6 : vector<20x200xf32>
    %c0_6 = arith.constant 0 : index
    %c0_7 = arith.constant 0 : index
    %8 = vector.load %arg4[%c0_6, %c0_7] : memref<20x200xf32, #tpu.memory_space<vmem>>, vector<20x200xf32>
    tpu.vector_store %arg4[%c0_6, %c0_7], %7 {strides = array<i32>} : memref<20x200xf32, #tpu.memory_space<vmem>>, vector<20x200xf32>,
    return
  }
  func.func @transform_0(%arg0: i32) -> (i32, i32) {
    %c0_i32 = arith.constant 0 : i32
    %c0_i32_0 = arith.constant 0 : i32
    %c0_i32_1 = arith.constant 0 : i32
    return %c0_i32, %c0_i32_0 : i32, i32
  }
  func.func @transform_1(%arg0: i32) -> (i32, i32) {
    %c0_i32 = arith.constant 0 : i32
    %c0_i32_0 = arith.constant 0 : i32
    %c0_i32_1 = arith.constant 0 : i32
    return %c0_i32, %c0_i32_0 : i32, i32
  }
  func.func @transform_2(%arg0: i32) -> (i32, i32) {
    %c0_i32 = arith.constant 0 : i32
    %c0_i32_0 = arith.constant 0 : i32
    return %c0_i32, %arg0 : i32, i32
  }
  func.func @transform_3(%arg0: i32) -> (i32, i32) {
    %c0_i32 = arith.constant 0 : i32
    %c0_i32_0 = arith.constant 0 : i32
    return %c0_i32, %arg0 : i32, i32
  }
}

module attributes {stable_mosaic.version = 11 : i64} {
  func.func @_mlp_head_kernel(%arg0: memref<2x2000xf32, #tpu.memory_space<vmem>>, %arg1: memref<2000x500xf32, #tpu.memory_space<vmem>>, %arg2: memref<1x500xf32, #tpu.memory_space<vmem>>, %arg3: memref<500x10xf32, #tpu.memory_space<vmem>>, %arg4: memref<1x10xf32, #tpu.memory_space<vmem>>, %arg5: memref<2x10xf32, #tpu.memory_space<vmem>>) attributes {dimension_semantics = [], scalar_prefetch = 0 : i64, scratch_operands = 0 : i64, tpu.core_type = #tpu.core_type<tc>} {
    %c0 = arith.constant 0 : index
    %c0_0 = arith.constant 0 : index
    %0 = vector.load %arg0[%c0, %c0_0] : memref<2x2000xf32, #tpu.memory_space<vmem>>, vector<2x2000xf32>
    %c0_1 = arith.constant 0 : index
    %c0_2 = arith.constant 0 : index
    %1 = vector.load %arg1[%c0_1, %c0_2] : memref<2000x500xf32, #tpu.memory_space<vmem>>, vector<2000x500xf32>
    %cst = arith.constant dense<0.000000e+00> : vector<2x500xf32>
    %2 = tpu.matmul %0, %1, %cst {dimension_numbers = #tpu.dot_dimension_numbers<[1], [0], [0], [1], [0, 0, 1, 1], [], []>} : vector<2x2000xf32>, vector<2000x500xf32>, vector<2x500xf32> -> vector<2x500xf32>
    %c0_3 = arith.constant 0 : index
    %c0_4 = arith.constant 0 : index
    %3 = vector.load %arg2[%c0_3, %c0_4] : memref<1x500xf32, #tpu.memory_space<vmem>>, vector<1x500xf32>
    %4 = vector.broadcast %3 : vector<1x500xf32> to vector<2x500xf32>
    %5 = arith.addf %2, %4 : vector<2x500xf32>
    %cst_5 = arith.constant 0.000000e+00 : f32
    %6 = vector.broadcast %cst_5 : f32 to vector<2x500xf32>
    %7 = arith.maximumf %5, %6 : vector<2x500xf32>
    %c0_6 = arith.constant 0 : index
    %c0_7 = arith.constant 0 : index
    %8 = vector.load %arg3[%c0_6, %c0_7] : memref<500x10xf32, #tpu.memory_space<vmem>>, vector<500x10xf32>
    %cst_8 = arith.constant dense<0.000000e+00> : vector<2x10xf32>
    %9 = tpu.matmul %7, %8, %cst_8 {dimension_numbers = #tpu.dot_dimension_numbers<[1], [0], [0], [1], [0, 0, 1, 1], [], []>} : vector<2x500xf32>, vector<500x10xf32>, vector<2x10xf32> -> vector<2x10xf32>
    %c0_9 = arith.constant 0 : index
    %c0_10 = arith.constant 0 : index
    %10 = vector.load %arg4[%c0_9, %c0_10] : memref<1x10xf32, #tpu.memory_space<vmem>>, vector<1x10xf32>
    %11 = vector.broadcast %10 : vector<1x10xf32> to vector<2x10xf32>
    %12 = arith.addf %9, %11 : vector<2x10xf32>
    %cst_11 = arith.constant dense<0xFF800000> : vector<2xf32>
    %13 = vector.multi_reduction <maximumf>, %12, %cst_11 [1] : vector<2x10xf32> to vector<2xf32>
    %14 = vector.shape_cast %13 : vector<2xf32> to vector<2x1xf32>
    %15 = vector.broadcast %14 : vector<2x1xf32> to vector<2x10xf32>
    %16 = arith.subf %12, %15 : vector<2x10xf32>
    %17 = math.exp %16 : vector<2x10xf32>
    %cst_12 = arith.constant dense<0.000000e+00> : vector<2xf32>
    %18 = vector.multi_reduction <add>, %17, %cst_12 [1] : vector<2x10xf32> to vector<2xf32>
    %19 = vector.shape_cast %18 : vector<2xf32> to vector<2x1xf32>
    %20 = math.log %19 : vector<2x1xf32>
    %21 = vector.broadcast %20 : vector<2x1xf32> to vector<2x10xf32>
    %22 = arith.subf %16, %21 : vector<2x10xf32>
    %c0_13 = arith.constant 0 : index
    %c0_14 = arith.constant 0 : index
    %23 = vector.load %arg5[%c0_13, %c0_14] : memref<2x10xf32, #tpu.memory_space<vmem>>, vector<2x10xf32>
    tpu.vector_store %arg5[%c0_13, %c0_14], %22 {strides = array<i32>} : memref<2x10xf32, #tpu.memory_space<vmem>>, vector<2x10xf32>,
    return
  }
}

</mosaic_0001>

<bundles_post_ra>
// kernel: convnet_forward.3
= control target key start
LH: loop header
LB: loop body
LE: loop exit
PB: predicated region body
PF: predicated region fallthrough
CT: control target
= control target key end

     0   :  { %vm35_vm0 = vcmask 1040384   ;;  %vm28_vm1 = vcmask 203776   ;;  %v515_v51 = vmov 0   ;;  %vm431_vm2 = vcmask 261120   ;;  %s774_s2 = inlined_call_operand.vmem [shape: f32[4,25,288], index: 2, kind: input, shape index: {}]   ;;  %s775_s0 = inlined_call_operand.vmem [shape: f32[10,25], index: 0, kind: input, shape index: {}]   ;;  %s776_s1 = inlined_call_operand.vmem [shape: f32[10,1], index: 1, kind: input, shape index: {}]   ;;  %s777_s3 = inlined_call_operand.vmem [shape: f32[10,288], index: 3, kind: output, shape index: {}]  }
   0x1   :  { %v25_v0 = vld [vmem:[%s774_s2 + $0x48] sm:$0x1]  ;;  %v26_v1 = vld [vmem:[%s774_s2 + $0x50] sm:$0x1]  ;;  %v27_v2 = vld [vmem:[%s774_s2 + $0x58] sm:$0x1]  ;;  %514 = vset.pattern.permute.xlu0 %v515_v51 }
   0x2   :  { %441 = vmatpush.msk.msra.mxu0 %vm35_vm0, %v25_v0  ;;  %444 = vmatpush.msk.msra.mxu1 %vm35_vm0, %v26_v1  ;;  %v459_v3 = vld [vmem:[%s774_s2 + $0xa8] sm:$0x1]  ;;  %v22_v4 = vld [vmem:[%s774_s2 + $0x30] sm:$0xff]  ;;  %v23_v5 = vld [vmem:[%s774_s2 + $0x38] sm:$0xff]  ;;  %vm435_vm3 = vcmask 254976  }
   0x3   :  { %447 = vmatpush.msk.msra.mxu2 %vm35_vm0, %v27_v2  ;;  %462 = vmatpush.msk.msra.mxu3 %vm35_vm0, %v459_v3  ;;  %v24_v6 = vld [vmem:[%s774_s2 + $0x40] sm:$0xff]  ;;  %v456_v7 = vld [vmem:[%s774_s2 + $0x90] sm:$0xff]  ;;  %v19_v8 = vld [vmem:[%s774_s2 + $0x18] sm:$0xff] }
   0x4   :  { %58 = vmatpush.msra.mxu0 %v22_v4  ;;  %81 = vmatpush.msra.mxu1 %v23_v5  ;;  %v20_v9 = vld [vmem:[%s774_s2 + $0x20] sm:$0xff]  ;;  %v21_v10 = vld [vmem:[%s774_s2 + $0x28] sm:$0xff]  ;;  %v453_v11 = vld [vmem:[%s774_s2 + $0x78] sm:$0xff] }
   0x5   :  { %104 = vmatpush.msra.mxu2 %v24_v6  ;;  %149 = vmatpush.msra.mxu3 %v456_v7  ;;  %v16_v12 = vld [vmem:[%s774_s2] sm:$0xff]  ;;  %v17_v13 = vld [vmem:[%s774_s2 + $0x8] sm:$0xff]  ;;  %v18_v14 = vld [vmem:[%s774_s2 + $0x10] sm:$0xff] }
   0x6   :  { %59 = vmatpush.msra.mxu0 %v19_v8  ;;  %82 = vmatpush.msra.mxu1 %v20_v9  ;;  %v450_v15 = vld [vmem:[%s774_s2 + $0x60] sm:$0xff]  ;;  %v480_v17 = vld [vmem:[%s774_s2 + $0x108] sm:$0x1]  ;;  %v481_v18 = vld [vmem:[%s774_s2 + $0x110] sm:$0x1] }
   0x7   :  { %105 = vmatpush.msra.mxu2 %v21_v10  ;;  %150 = vmatpush.msra.mxu3 %v453_v11  ;;  %v591_v16 = vld [vmem:[%s775_s0] sm:$0xff]  ;;  %v460_v19 = vld [vmem:[%s774_s2 + $0xb0] sm:$0x1]  ;;  %v461_v20 = vld [vmem:[%s774_s2 + $0xb8] sm:$0x1] }
   0x8   :  { %60 = vmatpush.msra.mxu0 %v16_v12  ;;  %83 = vmatpush.msra.mxu1 %v17_v13  ;;  %v477_v21 = vld [vmem:[%s774_s2 + $0xf0] sm:$0xff]  ;;  %v478_v22 = vld [vmem:[%s774_s2 + $0xf8] sm:$0xff]  ;;  %v458_v24 = vld [vmem:[%s774_s2 + $0xa0] sm:$0xff] }
   0x9   :  { %106 = vmatpush.msra.mxu2 %v18_v14  ;;  %151 = vmatpush.msra.mxu3 %v450_v15  ;;  %v457_v23 = vld [vmem:[%s774_s2 + $0x98] sm:$0xff]  ;;  %v475_v26 = vld [vmem:[%s774_s2 + $0xe0] sm:$0xff]  ;;  %v455_v28 = vld [vmem:[%s774_s2 + $0x88] sm:$0xff] }
   0xa   :  { %442 = vmatmul.msk.f32.vlgmr.msra.gmra.mxu0 %vm28_vm1, %v591_v16  ;;  %445 = vmatmul.msk.f32.vlgmr.msra.gmra.mxu1 %vm28_vm1, %v591_v16  ;;  %v474_v25 = vld [vmem:[%s774_s2 + $0xd8] sm:$0xff]  ;;  %v454_v27 = vld [vmem:[%s774_s2 + $0x80] sm:$0xff]  ;;  %v644_v29 = vld [vmem:[%s775_s0 + $0x8] sm:$0x3] }
   0xb   :  { %448 = vmatmul.msk.f32.vlgmr.msra.gmra.mxu2 %vm28_vm1, %v591_v16  ;;  %463 = vmatmul.msk.f32.vlgmr.msra.gmra.mxu3 %vm28_vm1, %v591_v16  ;;  %v471_v30 = vld [vmem:[%s774_s2 + $0xc0] sm:$0xff]  ;;  %v472_v31 = vld [vmem:[%s774_s2 + $0xc8] sm:$0xff]  ;;  %v452_v33 = vld [vmem:[%s774_s2 + $0x70] sm:$0xff] }
   0xc   :  { %483 = vmatpush.msk.msrb.mxu2 %vm35_vm0, %v480_v17  ;;  %486 = vmatpush.msk.msrb.mxu3 %vm35_vm0, %v481_v18  ;;  %v451_v32 = vld [vmem:[%s774_s2 + $0x68] sm:$0xff]  ;;  %v502_v34 = vld [vmem:[%s774_s2 + $0x170] sm:$0x1]  ;;  %v503_v35 = vld [vmem:[%s774_s2 + $0x178] sm:$0x1] }
   0xd   :  { %465 = vmatpush.msk.msrb.mxu0 %vm35_vm0, %v460_v19  ;;  %468 = vmatpush.msk.msrb.mxu1 %vm35_vm0, %v461_v20  ;;  %v482_v36 = vld [vmem:[%s774_s2 + $0x118] sm:$0x1]  ;;  %v501_v37 = vld [vmem:[%s774_s2 + $0x168] sm:$0x1]  ;;  %v500_v39 = vld [vmem:[%s774_s2 + $0x160] sm:$0xff] }
   0xe   :  { %246 = vmatpush.msrb.mxu2 %v477_v21  ;;  %269 = vmatpush.msrb.mxu3 %v478_v22  ;;  %v499_v38 = vld [vmem:[%s774_s2 + $0x158] sm:$0xff]  ;;  %v479_v40 = vld [vmem:[%s774_s2 + $0x100] sm:$0xff]  ;;  %v498_v41 = vld [vmem:[%s774_s2 + $0x150] sm:$0xff] }
   0xf   :  { %172 = vmatpush.msrb.mxu0 %v457_v23  ;;  %195 = vmatpush.msrb.mxu1 %v458_v24  ;;  %v496_v42 = vld [vmem:[%s774_s2 + $0x140] sm:$0xff]  ;;  %v497_v43 = vld [vmem:[%s774_s2 + $0x148] sm:$0xff]  ;;  %v495_v45 = vld [vmem:[%s774_s2 + $0x138] sm:$0xff] }
  0x10   :  { %247 = vmatpush.msrb.mxu2 %v474_v25  ;;  %270 = vmatpush.msrb.mxu3 %v475_v26  ;;  %v476_v44 = vld [vmem:[%s774_s2 + $0xe8] sm:$0xff]  ;;  %v494_v47 = vld [vmem:[%s774_s2 + $0x130] sm:$0xff]  ;;  %v492_v49 = vld [vmem:[%s774_s2 + $0x120] sm:$0xff] }
  0x11   :  { %173 = vmatpush.msrb.mxu0 %v454_v27  ;;  %196 = vmatpush.msrb.mxu1 %v455_v28  ;;  %v493_v46 = vld [vmem:[%s774_s2 + $0x128] sm:$0xff]  ;;  %v473_v48 = vld [vmem:[%s774_s2 + $0xd0] sm:$0xff]  ;;  %v405_v50 = vld [vmem:[%s776_s1] sm:$0xff] }
  0x12   :  { %443 = vmatmul.msk.f32.gmra.mxu0 %vm28_vm1, %v644_v29  ;;  %446 = vmatmul.msk.f32.gmra.mxu1 %vm28_vm1, %v644_v29  ;;  %v406_v52 = vld [vmem:[%s776_s1 + $0x8] sm:$0x3] }
  0x13   :  { %449 = vmatmul.msk.f32.gmra.mxu2 %vm28_vm1, %v644_v29  ;;  %464 = vmatmul.msk.f32.gmra.mxu3 %vm28_vm1, %v644_v29 }
  0x14   :  { %248 = vmatpush.msrb.mxu2 %v471_v30  ;;  %271 = vmatpush.msrb.mxu3 %v472_v31 }
  0x15   :  { %174 = vmatpush.msrb.mxu0 %v451_v32  ;;  %197 = vmatpush.msrb.mxu1 %v452_v33 }
  0x16   :  { %507 = vmatpush.msk.msra.mxu2 %vm35_vm0, %v502_v34  ;;  %510 = vmatpush.msk.msra.mxu3 %vm35_vm0, %v503_v35 }
  0x17   :  { %489 = vmatpush.msk.msra.mxu0 %vm35_vm0, %v482_v36  ;;  %504 = vmatpush.msk.msra.mxu1 %vm35_vm0, %v501_v37 }
  0x18   :  { %366 = vmatpush.msra.mxu2 %v499_v38  ;;  %389 = vmatpush.msra.mxu3 %v500_v39 }
  0x19   :  { %292 = vmatpush.msra.mxu0 %v479_v40  ;;  %343 = vmatpush.msra.mxu1 %v498_v41 }
  0x1a   :  { %466 = vmatmul.msk.f32.vlgmr.msrb.gmra.mxu0 %vm28_vm1, %v591_v16  ;;  %469 = vmatmul.msk.f32.vlgmr.msrb.gmra.mxu1 %vm28_vm1, %v591_v16 }
  0x1b   :  { %484 = vmatmul.msk.f32.vlgmr.msrb.gmra.mxu2 %vm28_vm1, %v591_v16  ;;  %487 = vmatmul.msk.f32.vlgmr.msrb.gmra.mxu3 %vm28_vm1, %v591_v16 }
  0x1c   :  { %367 = vmatpush.msra.mxu2 %v496_v42  ;;  %390 = vmatpush.msra.mxu3 %v497_v43 }
  0x1d   :  { %293 = vmatpush.msra.mxu0 %v476_v44  ;;  %344 = vmatpush.msra.mxu1 %v495_v45 }
  0x1e   :  { %368 = vmatpush.msra.mxu2 %v493_v46  ;;  %391 = vmatpush.msra.mxu3 %v494_v47 }
  0x1f   :  { %294 = vmatpush.msra.mxu0 %v473_v48  ;;  %345 = vmatpush.msra.mxu1 %v492_v49 }
  0x20   :  { %409 = vperm.xlu0 %514, %v405_v50  }
  0x22   :  { %467 = vmatmul.msk.f32.gmra.mxu0 %vm28_vm1, %v644_v29  ;;  %470 = vmatmul.msk.f32.gmra.mxu1 %vm28_vm1, %v644_v29 }
  0x23   :  { %485 = vmatmul.msk.f32.gmra.mxu2 %vm28_vm1, %v644_v29  ;;  %488 = vmatmul.msk.f32.gmra.mxu3 %vm28_vm1, %v644_v29 }
  0x28   :  { %414 = vperm.xlu0 %514, %v406_v52  }
  0x2a   :  { %490 = vmatmul.msk.f32.vlgmr.msra.gmra.mxu0 %vm28_vm1, %v591_v16  ;;  %505 = vmatmul.msk.f32.vlgmr.msra.gmra.mxu1 %vm28_vm1, %v591_v16 }
  0x2b   :  { %508 = vmatmul.msk.f32.vlgmr.msra.gmra.mxu2 %vm28_vm1, %v591_v16  ;;  %511 = vmatmul.msk.f32.vlgmr.msra.gmra.mxu3 %vm28_vm1, %v591_v16 }
  0x32   :  { %491 = vmatmul.msk.f32.gmra.mxu0 %vm28_vm1, %v644_v29  ;;  %506 = vmatmul.msk.f32.gmra.mxu1 %vm28_vm1, %v644_v29 }
  0x33   :  { %509 = vmatmul.msk.f32.gmra.mxu2 %vm28_vm1, %v644_v29  ;;  %512 = vmatmul.msk.f32.gmra.mxu3 %vm28_vm1, %v644_v29 }
  0x87   :  { %v62_v53 = vpop.f32.mrf.mxu0  ;;  %v85_v54 = vpop.f32.mrf.mxu1 }
  0x8e   :  { %v108_v55 = vpop.f32.mrf.mxu2  ;;  %v153_v56 = vpop.f32.mrf.mxu3 }
  0x8f   :  { %v65_v57 = vpop.f32.mrf.mxu0  ;;  %v88_v58 = vpop.f32.mrf.mxu1  ;;  %v205_v3 = vmax.f32 %v62_v53, %v153_v56 }
  0x92   :  { %v410_v7 = vpop.permute.xlu0 %409 }
  0x96   :  { %v111_v59 = vpop.f32.mrf.mxu2  ;;  %v156_v60 = vpop.f32.mrf.mxu3 }
  0x97   :  { %v176_v61 = vpop.f32.mrf.mxu0  ;;  %v199_v62 = vpop.f32.mrf.mxu1  ;;  %v208_v14 = vmax.f32 %v65_v57, %v156_v60 }
  0x98   :  { %v206_v12 = vmax.f32 %v85_v54, %v176_v61  ;;  %v207_v13 = vmax.f32 %v108_v55, %v199_v62 }
  0x9a   :  { %v415_v27 = vpop.permute.xlu0 %414 }
  0x9e   :  { %v250_v63 = vpop.f32.mrf.mxu2  ;;  %v273_v0 = vpop.f32.mrf.mxu3 }
  0x9f   :  { %v179_v1 = vpop.f32.mrf.mxu0  ;;  %v202_v2 = vpop.f32.mrf.mxu1  ;;  %v302_v4 = vmax.f32 %v205_v3, %v250_v63  ;;  %v303_v16 = vmax.f32 %v206_v12, %v273_v0 }
  0xa0   :  { %v209_v30 = vmax.f32 %v88_v58, %v179_v1  ;;  %v210_v31 = vmax.f32 %v111_v59, %v202_v2 }
  0xa6   :  { %v253_v5 = vpop.f32.mrf.mxu2  ;;  %v276_v6 = vpop.f32.mrf.mxu3 }
  0xa7   :  { %v347_v8 = vpop.f32.mrf.mxu1  ;;  %v296_v9 = vpop.f32.mrf.mxu0  ;;  %v305_v18 = vmax.f32 %v208_v14, %v253_v5  ;;  %v306_v35 = vmax.f32 %v209_v30, %v276_v6 }
  0xa8   :  { %v399_v10 = vmax.f32 %v302_v4, %v347_v8  ;;  %v304_v17 = vmax.f32 %v207_v13, %v296_v9 }
  0xaa   :  { %v417_v11 = vadd.f32 %v410_v7, %v399_v10 }
  0xac   :  { %v423_v15 = vmax.f32 %v417_v11, 0.0 }
  0xae   :  { %429 = vst [vmem:[%s777_s3] sm:$0xff] %v423_v15  ;;  %v370_v19 = vpop.f32.mrf.mxu2  ;;  %v393_v20 = vpop.f32.mrf.mxu3 }
  0xaf   :  { %v400_v21 = vmax.f32 %v303_v16, %v370_v19  ;;  %v401_v22 = vmax.f32 %v304_v17, %v393_v20  ;;  %v350_v23 = vpop.f32.mrf.mxu1  ;;  %v299_v28 = vpop.f32.mrf.mxu0 }
  0xb0   :  { %v402_v24 = vmax.f32 %v305_v18, %v350_v23  ;;  %v307_v36 = vmax.f32 %v210_v31, %v299_v28 }
  0xb1   :  { %v418_v25 = vadd.f32 %v410_v7, %v400_v21  ;;  %v419_v26 = vadd.f32 %v410_v7, %v401_v22 }
  0xb2   :  { %v420_v29 = vadd.f32 %v415_v27, %v402_v24 }
  0xb3   :  { %v424_v32 = vmax.f32 %v418_v25, 0.0  ;;  %v425_v33 = vmax.f32 %v419_v26, 0.0 }
  0xb4   :  { %v426_v34 = vmax.f32 %v420_v29, 0.0 }
  0xb5   :  { %430 = vst [vmem:[%s777_s3 + $0x8] sm:$0xff] %v424_v32 }
  0xb6   :  { %432 = vst.msk [vmem:[%s777_s3 + $0x10] sm:$0xff] %vm431_vm2, %v425_v33  ;;  %v373_v37 = vpop.f32.mrf.mxu2  ;;  %v396_v38 = vpop.f32.mrf.mxu3 }
  0xb7   :  { %433 = vst [vmem:[%s777_s3 + $0x18] sm:$0x3] %v426_v34  ;;  %v403_v39 = vmax.f32 %v306_v35, %v373_v37  ;;  %v404_v40 = vmax.f32 %v307_v36, %v396_v38 }
  0xb9   :  { %v421_v41 = vadd.f32 %v415_v27, %v403_v39  ;;  %v422_v42 = vadd.f32 %v415_v27, %v404_v40 }
  0xbb   :  { %v427_v43 = vmax.f32 %v421_v41, 0.0  ;;  %v428_v44 = vmax.f32 %v422_v42, 0.0 }
  0xbd   :  { %434 = vst [vmem:[%s777_s3 + $0x20] sm:$0x3] %v427_v43 }
  0xbe   :  { %436 = vst.msk [vmem:[%s777_s3 + $0x28] sm:$0x3] %vm435_vm3, %v428_v44 }

// kernel: convnet_forward.4
= control target key start
LH: loop header
LB: loop body
LE: loop exit
PB: predicated region body
PF: predicated region fallthrough
CT: control target
= control target key end

     0   :  { %vm69_vm0 = vcmask 1041408   ;;  %v181_v3 = vmov 0   ;;  %vm59_vm1 = vcmask 736256   ;;  %vm135_vm2 = vcmask 588800   ;;  %s316_s2 = inlined_call_operand.vmem [shape: f32[90,200], index: 2, kind: input, shape index: {}]   ;;  %s317_s0 = inlined_call_operand.vmem [shape: f32[20,90], index: 0, kind: input, shape index: {}]   ;;  %s318_s1 = inlined_call_operand.vmem [shape: f32[20,1], index: 1, kind: input, shape index: {}]   ;;  %s319_s3 = inlined_call_operand.vmem [shape: f32[20,200], index: 3, kind: output, shape index: {}]  }
   0x1   :  { %v39_v0 = vld [vmem:[%s316_s2 + $0xb0] sm:$0x3]  ;;  %v40_v1 = vld [vmem:[%s316_s2 + $0xb8] sm:$0x3]  ;;  %v37_v2 = vld [vmem:[%s316_s2 + $0xa0] sm:$0xff]  ;;  %179 = vset.pattern.permute.xlu0 %v181_v3  ;;  %180 = vset.pattern.permute.xlu1 %v181_v3  ;;  %vm140_vm3 = vcmask 584704  }
   0x2   :  { %154 = vmatpush.msk.msra.mxu2 %vm69_vm0, %v39_v0  ;;  %166 = vmatpush.msk.msra.mxu3 %vm69_vm0, %v40_v1  ;;  %v38_v4 = vld [vmem:[%s316_s2 + $0xa8] sm:$0xff]  ;;  %v35_v5 = vld [vmem:[%s316_s2 + $0x90] sm:$0xff]  ;;  %v36_v6 = vld [vmem:[%s316_s2 + $0x98] sm:$0xff] }
   0x3   :  { %146 = vmatpush.msk.msra.mxu0 %vm69_vm0, %v39_v0  ;;  %150 = vmatpush.msk.msra.mxu1 %vm69_vm0, %v40_v1  ;;  %v33_v7 = vld [vmem:[%s316_s2 + $0x80] sm:$0xff]  ;;  %v34_v8 = vld [vmem:[%s316_s2 + $0x88] sm:$0xff]  ;;  %v31_v9 = vld [vmem:[%s316_s2 + $0x70] sm:$0xff] }
   0x4   :  { %155 = vmatpush.msra.mxu2 %v37_v2  ;;  %167 = vmatpush.msra.mxu3 %v38_v4  ;;  %v32_v10 = vld [vmem:[%s316_s2 + $0x78] sm:$0xff]  ;;  %v29_v11 = vld [vmem:[%s316_s2 + $0x60] sm:$0xff]  ;;  %v30_v12 = vld [vmem:[%s316_s2 + $0x68] sm:$0xff] }
   0x5   :  { %81 = vmatpush.msra.mxu0 %v37_v2  ;;  %107 = vmatpush.msra.mxu1 %v38_v4  ;;  %v27_v13 = vld [vmem:[%s316_s2 + $0x50] sm:$0xff]  ;;  %v28_v14 = vld [vmem:[%s316_s2 + $0x58] sm:$0xff]  ;;  %v25_v15 = vld [vmem:[%s316_s2 + $0x40] sm:$0xff] }
   0x6   :  { %156 = vmatpush.msra.mxu2 %v35_v5  ;;  %168 = vmatpush.msra.mxu3 %v36_v6  ;;  %v26_v16 = vld [vmem:[%s316_s2 + $0x48] sm:$0xff]  ;;  %v23_v17 = vld [vmem:[%s316_s2 + $0x30] sm:$0xff]  ;;  %v24_v18 = vld [vmem:[%s316_s2 + $0x38] sm:$0xff] }
   0x7   :  { %82 = vmatpush.msra.mxu0 %v35_v5  ;;  %108 = vmatpush.msra.mxu1 %v36_v6  ;;  %v21_v19 = vld [vmem:[%s316_s2 + $0x20] sm:$0xff]  ;;  %v22_v20 = vld [vmem:[%s316_s2 + $0x28] sm:$0xff]  ;;  %v19_v21 = vld [vmem:[%s316_s2 + $0x10] sm:$0xff] }
   0x8   :  { %157 = vmatpush.msra.mxu2 %v33_v7  ;;  %169 = vmatpush.msra.mxu3 %v34_v8  ;;  %v20_v22 = vld [vmem:[%s316_s2 + $0x18] sm:$0xff]  ;;  %v17_v23 = vld [vmem:[%s316_s2] sm:$0xff]  ;;  %v18_v24 = vld [vmem:[%s316_s2 + $0x8] sm:$0xff] }
   0x9   :  { %83 = vmatpush.msra.mxu0 %v33_v7  ;;  %109 = vmatpush.msra.mxu1 %v34_v8  ;;  %v15_v25 = vld [vmem:[%s317_s0 + $0x8] sm:$0xff]  ;;  %v14_v26 = vld [vmem:[%s317_s0] sm:$0xff]  ;;  %v43_v28 = vld [vmem:[%s318_s1 + $0x10] sm:$0xf] }
   0xa   :  { %158 = vmatpush.msra.mxu2 %v31_v9  ;;  %170 = vmatpush.msra.mxu3 %v32_v10  ;;  %v41_v27 = vld [vmem:[%s318_s1] sm:$0xff]  ;;  %v16_v29 = vld [vmem:[%s317_s0 + $0x10] sm:$0xf]  ;;  %v42_v30 = vld [vmem:[%s318_s1 + $0x8] sm:$0xff] }
   0xb   :  { %84 = vmatpush.msra.mxu0 %v31_v9  ;;  %110 = vmatpush.msra.mxu1 %v32_v10 }
   0xc   :  { %159 = vmatpush.msra.mxu2 %v29_v11  ;;  %171 = vmatpush.msra.mxu3 %v30_v12 }
   0xd   :  { %85 = vmatpush.msra.mxu0 %v29_v11  ;;  %111 = vmatpush.msra.mxu1 %v30_v12 }
   0xe   :  { %160 = vmatpush.msra.mxu2 %v27_v13  ;;  %172 = vmatpush.msra.mxu3 %v28_v14 }
   0xf   :  { %86 = vmatpush.msra.mxu0 %v27_v13  ;;  %112 = vmatpush.msra.mxu1 %v28_v14 }
  0x10   :  { %161 = vmatpush.msra.mxu2 %v25_v15  ;;  %173 = vmatpush.msra.mxu3 %v26_v16 }
  0x11   :  { %87 = vmatpush.msra.mxu0 %v25_v15  ;;  %113 = vmatpush.msra.mxu1 %v26_v16 }
  0x12   :  { %162 = vmatpush.msra.mxu2 %v23_v17  ;;  %174 = vmatpush.msra.mxu3 %v24_v18 }
  0x13   :  { %88 = vmatpush.msra.mxu0 %v23_v17  ;;  %114 = vmatpush.msra.mxu1 %v24_v18 }
  0x14   :  { %163 = vmatpush.msra.mxu2 %v21_v19  ;;  %175 = vmatpush.msra.mxu3 %v22_v20 }
  0x15   :  { %89 = vmatpush.msra.mxu0 %v21_v19  ;;  %115 = vmatpush.msra.mxu1 %v22_v20 }
  0x16   :  { %164 = vmatpush.msra.mxu2 %v19_v21  ;;  %176 = vmatpush.msra.mxu3 %v20_v22 }
  0x17   :  { %90 = vmatpush.msra.mxu0 %v19_v21  ;;  %116 = vmatpush.msra.mxu1 %v20_v22 }
  0x18   :  { %165 = vmatpush.msra.mxu2 %v17_v23  ;;  %177 = vmatpush.msra.mxu3 %v18_v24 }
  0x19   :  { %148 = vmatmul.msk.f32.vlgmr.msra.gmra.mxu2 %vm59_vm1, %v15_v25  ;;  %152 = vmatmul.msk.f32.vlgmr.msra.gmra.mxu3 %vm59_vm1, %v15_v25 }
  0x1a   :  { %91 = vmatpush.msra.mxu0 %v17_v23  ;;  %117 = vmatpush.msra.mxu1 %v18_v24 }
  0x1b   :  { %147 = vmatmul.msk.f32.vlgmr.msra.gmra.mxu0 %vm59_vm1, %v14_v26  ;;  %151 = vmatmul.msk.f32.vlgmr.msra.gmra.mxu1 %vm59_vm1, %v14_v26 }
  0x1c   :  { %46 = vperm.xlu0 %179, %v41_v27   ;;  %56 = vperm.xlu1 %180, %v43_v28  }
  0x21   :  { %149 = vmatmul.msk.f32.gmra.mxu2 %vm59_vm1, %v16_v29  ;;  %153 = vmatmul.msk.f32.gmra.mxu3 %vm59_vm1, %v16_v29 }
  0x24   :  { %51 = vperm.xlu0 %179, %v42_v30  }
  0x8e   :  { %v47_v31 = vpop.permute.xlu0 %46  ;;  %v57_v45 = vpop.permute.xlu1 %56 }
  0x96   :  { %v52_v36 = vpop.permute.xlu0 %51 }
  0x98   :  { %v93_v32 = vpop.f32.mrf.mxu0  ;;  %v119_v33 = vpop.f32.mrf.mxu1 }
  0x99   :  { %v94_v34 = vadd.f32 %v93_v32, %v47_v31  ;;  %v120_v35 = vadd.f32 %v119_v33, %v47_v31 }
  0x9b   :  { %v128_v37 = vmax.f32 %v94_v34, 0.0  ;;  %v129_v38 = vmax.f32 %v120_v35, 0.0 }
  0x9c   :  { %v96_v39 = vpop.f32.mrf.mxu2  ;;  %v122_v40 = vpop.f32.mrf.mxu3 }
  0x9d   :  { %134 = vst [vmem:[%s319_s3] sm:$0xff] %v128_v37  ;;  %v97_v41 = vadd.f32 %v96_v39, %v52_v36  ;;  %v123_v42 = vadd.f32 %v122_v40, %v52_v36 }
  0x9e   :  { %136 = vst.msk [vmem:[%s319_s3 + $0x8] sm:$0xff] %vm135_vm2, %v129_v38 }
  0x9f   :  { %v130_v43 = vmax.f32 %v97_v41, 0.0  ;;  %v131_v44 = vmax.f32 %v123_v42, 0.0 }
  0xa1   :  { %137 = vst [vmem:[%s319_s3 + $0x10] sm:$0xff] %v130_v43 }
  0xa2   :  { %138 = vst.msk [vmem:[%s319_s3 + $0x18] sm:$0xff] %vm135_vm2, %v131_v44 }
  0xa4   :  { %v99_v46 = vpop.f32.mrf.mxu2  ;;  %v125_v47 = vpop.f32.mrf.mxu3 }
  0xa5   :  { %v100_v48 = vadd.f32 %v99_v46, %v57_v45  ;;  %v126_v49 = vadd.f32 %v125_v47, %v57_v45 }
  0xa7   :  { %v132_v50 = vmax.f32 %v100_v48, 0.0  ;;  %v133_v51 = vmax.f32 %v126_v49, 0.0 }
  0xa9   :  { %139 = vst [vmem:[%s319_s3 + $0x20] sm:$0xf] %v132_v50 }
  0xaa   :  { %141 = vst.msk [vmem:[%s319_s3 + $0x28] sm:$0xf] %vm140_vm3, %v133_v51 }

// kernel: convnet_forward.5
= control target key start
LH: loop header
LB: loop body
LE: loop exit
PB: predicated region body
PF: predicated region fallthrough
CT: control target
= control target key end

     0   :  { %s5980_s0 = inlined_call_operand.vmem [shape: f32[2,2000], index: 0, kind: input, shape index: {}]   ;;  %s5981_s1 = inlined_call_operand.vmem [shape: f32[2000,500], index: 1, kind: input, shape index: {}]   ;;  %s5982_s2 = inlined_call_operand.vmem [shape: f32[1,500], index: 2, kind: input, shape index: {}]   ;;  %s5983_s3 = inlined_call_operand.vmem [shape: f32[500,10], index: 3, kind: input, shape index: {}]   ;;  %s5984_s4 = inlined_call_operand.vmem [shape: f32[1,10], index: 4, kind: input, shape index: {}]   ;;  %s5985_s5 = inlined_call_operand.hbm [shape: f32[2,10], index: 5, kind: output, shape index: {}]  }
   0x1   :  { %v85_v0 = vld [vmem:[%s5981_s1 + $0x1e0] sm:$0xff] }
   0x2   :  { %v149_v1 = vld [vmem:[%s5981_s1 + $0x3e0] sm:$0xff]  ;;  %1078 = vmatpush.msra.mxu0 %v85_v0 }
   0x3   :  { %v213_v2 = vld [vmem:[%s5981_s1 + $0x5e0] sm:$0xff]  ;;  %1098 = vmatpush.msra.mxu1 %v149_v1 }
   0x4   :  { %v277_v3 = vld [vmem:[%s5981_s1 + $0x7e0] sm:$0xff]  ;;  %1118 = vmatpush.msra.mxu2 %v213_v2 }
   0x5   :  { %v81_v4 = vld [vmem:[%s5981_s1 + $0x1c0] sm:$0xff]  ;;  %1138 = vmatpush.msra.mxu3 %v277_v3 }
   0x6   :  { %v145_v5 = vld [vmem:[%s5981_s1 + $0x3c0] sm:$0xff]  ;;  %1079 = vmatpush.msra.mxu0 %v81_v4 }
   0x7   :  { %v209_v6 = vld [vmem:[%s5981_s1 + $0x5c0] sm:$0xff]  ;;  %1099 = vmatpush.msra.mxu1 %v145_v5 }
   0x8   :  { %v273_v7 = vld [vmem:[%s5981_s1 + $0x7c0] sm:$0xff]  ;;  %1119 = vmatpush.msra.mxu2 %v209_v6 }
   0x9   :  { %v77_v8 = vld [vmem:[%s5981_s1 + $0x1a0] sm:$0xff]  ;;  %1139 = vmatpush.msra.mxu3 %v273_v7 }
   0xa   :  { %v141_v9 = vld [vmem:[%s5981_s1 + $0x3a0] sm:$0xff]  ;;  %1080 = vmatpush.msra.mxu0 %v77_v8 }
   0xb   :  { %v205_v10 = vld [vmem:[%s5981_s1 + $0x5a0] sm:$0xff]  ;;  %1100 = vmatpush.msra.mxu1 %v141_v9 }
   0xc   :  { %v269_v11 = vld [vmem:[%s5981_s1 + $0x7a0] sm:$0xff]  ;;  %1120 = vmatpush.msra.mxu2 %v205_v10 }
   0xd   :  { %v73_v12 = vld [vmem:[%s5981_s1 + $0x180] sm:$0xff]  ;;  %1140 = vmatpush.msra.mxu3 %v269_v11 }
   0xe   :  { %v137_v13 = vld [vmem:[%s5981_s1 + $0x380] sm:$0xff]  ;;  %1081 = vmatpush.msra.mxu0 %v73_v12 }
   0xf   :  { %v201_v14 = vld [vmem:[%s5981_s1 + $0x580] sm:$0xff]  ;;  %1101 = vmatpush.msra.mxu1 %v137_v13 }
  0x10   :  { %v265_v15 = vld [vmem:[%s5981_s1 + $0x780] sm:$0xff]  ;;  %1121 = vmatpush.msra.mxu2 %v201_v14 }
  0x11   :  { %v69_v16 = vld [vmem:[%s5981_s1 + $0x160] sm:$0xff]  ;;  %1141 = vmatpush.msra.mxu3 %v265_v15 }
  0x12   :  { %v133_v17 = vld [vmem:[%s5981_s1 + $0x360] sm:$0xff]  ;;  %1082 = vmatpush.msra.mxu0 %v69_v16 }
  0x13   :  { %v197_v18 = vld [vmem:[%s5981_s1 + $0x560] sm:$0xff]  ;;  %1102 = vmatpush.msra.mxu1 %v133_v17 }
  0x14   :  { %v261_v19 = vld [vmem:[%s5981_s1 + $0x760] sm:$0xff]  ;;  %1122 = vmatpush.msra.mxu2 %v197_v18 }
  0x15   :  { %v65_v20 = vld [vmem:[%s5981_s1 + $0x140] sm:$0xff]  ;;  %1142 = vmatpush.msra.mxu3 %v261_v19 }
  0x16   :  { %v129_v21 = vld [vmem:[%s5981_s1 + $0x340] sm:$0xff]  ;;  %1083 = vmatpush.msra.mxu0 %v65_v20 }
  0x17   :  { %v193_v22 = vld [vmem:[%s5981_s1 + $0x540] sm:$0xff]  ;;  %1103 = vmatpush.msra.mxu1 %v129_v21 }
  0x18   :  { %v257_v23 = vld [vmem:[%s5981_s1 + $0x740] sm:$0xff]  ;;  %1123 = vmatpush.msra.mxu2 %v193_v22 }
  0x19   :  { %v61_v24 = vld [vmem:[%s5981_s1 + $0x120] sm:$0xff]  ;;  %1143 = vmatpush.msra.mxu3 %v257_v23 }
  0x1a   :  { %v125_v25 = vld [vmem:[%s5981_s1 + $0x320] sm:$0xff]  ;;  %1084 = vmatpush.msra.mxu0 %v61_v24 }
  0x1b   :  { %v189_v26 = vld [vmem:[%s5981_s1 + $0x520] sm:$0xff]  ;;  %1104 = vmatpush.msra.mxu1 %v125_v25 }
  0x1c   :  { %v253_v27 = vld [vmem:[%s5981_s1 + $0x720] sm:$0xff]  ;;  %1124 = vmatpush.msra.mxu2 %v189_v26 }
  0x1d   :  { %v57_v28 = vld [vmem:[%s5981_s1 + $0x100] sm:$0xff]  ;;  %1144 = vmatpush.msra.mxu3 %v253_v27 }
  0x1e   :  { %v121_v29 = vld [vmem:[%s5981_s1 + $0x300] sm:$0xff]  ;;  %1085 = vmatpush.msra.mxu0 %v57_v28 }
  0x1f   :  { %v185_v30 = vld [vmem:[%s5981_s1 + $0x500] sm:$0xff]  ;;  %1105 = vmatpush.msra.mxu1 %v121_v29 }
  0x20   :  { %v249_v31 = vld [vmem:[%s5981_s1 + $0x700] sm:$0xff]  ;;  %1125 = vmatpush.msra.mxu2 %v185_v30 }
  0x21   :  { %v53_v32 = vld [vmem:[%s5981_s1 + $0xe0] sm:$0xff]  ;;  %1145 = vmatpush.msra.mxu3 %v249_v31 }
  0x22   :  { %v117_v33 = vld [vmem:[%s5981_s1 + $0x2e0] sm:$0xff]  ;;  %1086 = vmatpush.msra.mxu0 %v53_v32 }
  0x23   :  { %v181_v34 = vld [vmem:[%s5981_s1 + $0x4e0] sm:$0xff]  ;;  %1106 = vmatpush.msra.mxu1 %v117_v33 }
  0x24   :  { %v245_v35 = vld [vmem:[%s5981_s1 + $0x6e0] sm:$0xff]  ;;  %1126 = vmatpush.msra.mxu2 %v181_v34 }
  0x25   :  { %v49_v36 = vld [vmem:[%s5981_s1 + $0xc0] sm:$0xff]  ;;  %1146 = vmatpush.msra.mxu3 %v245_v35 }
  0x26   :  { %v113_v37 = vld [vmem:[%s5981_s1 + $0x2c0] sm:$0xff]  ;;  %1087 = vmatpush.msra.mxu0 %v49_v36 }
  0x27   :  { %v177_v38 = vld [vmem:[%s5981_s1 + $0x4c0] sm:$0xff]  ;;  %1107 = vmatpush.msra.mxu1 %v113_v37 }
  0x28   :  { %v241_v39 = vld [vmem:[%s5981_s1 + $0x6c0] sm:$0xff]  ;;  %1127 = vmatpush.msra.mxu2 %v177_v38 }
  0x29   :  { %v45_v40 = vld [vmem:[%s5981_s1 + $0xa0] sm:$0xff]  ;;  %1147 = vmatpush.msra.mxu3 %v241_v39 }
  0x2a   :  { %v109_v41 = vld [vmem:[%s5981_s1 + $0x2a0] sm:$0xff]  ;;  %1088 = vmatpush.msra.mxu0 %v45_v40 }
  0x2b   :  { %v173_v42 = vld [vmem:[%s5981_s1 + $0x4a0] sm:$0xff]  ;;  %1108 = vmatpush.msra.mxu1 %v109_v41 }
  0x2c   :  { %v237_v43 = vld [vmem:[%s5981_s1 + $0x6a0] sm:$0xff]  ;;  %1128 = vmatpush.msra.mxu2 %v173_v42 }
  0x2d   :  { %v41_v44 = vld [vmem:[%s5981_s1 + $0x80] sm:$0xff]  ;;  %1148 = vmatpush.msra.mxu3 %v237_v43  ;;  %v22_v43 = vld [vmem:[%s5980_s0 + $0x8] sm:$0xff] }
  0x2e   :  { %v105_v45 = vld [vmem:[%s5981_s1 + $0x280] sm:$0xff]  ;;  %1089 = vmatpush.msra.mxu0 %v41_v44  ;;  %1041 = vst [vmem:[#allocation1 + $0x20] ss:$4 sm:$0xff] %v22_v43 }
  0x2f   :  { %v169_v46 = vld [vmem:[%s5981_s1 + $0x480] sm:$0xff]  ;;  %1109 = vmatpush.msra.mxu1 %v105_v45 }
  0x30   :  { %v233_v47 = vld [vmem:[%s5981_s1 + $0x680] sm:$0xff]  ;;  %1129 = vmatpush.msra.mxu2 %v169_v46  ;;  %v23_v46 = vld [vmem:[%s5980_s0 + $0x10] sm:$0xff] }
  0x31   :  { %v37_v48 = vld [vmem:[%s5981_s1 + $0x60] sm:$0xff]  ;;  %1149 = vmatpush.msra.mxu3 %v233_v47 }
  0x32   :  { %v101_v49 = vld [vmem:[%s5981_s1 + $0x260] sm:$0xff]  ;;  %1090 = vmatpush.msra.mxu0 %v37_v48 }
  0x33   :  { %v165_v50 = vld [vmem:[%s5981_s1 + $0x460] sm:$0xff]  ;;  %1110 = vmatpush.msra.mxu1 %v101_v49 }
  0x34   :  { %v229_v51 = vld [vmem:[%s5981_s1 + $0x660] sm:$0xff]  ;;  %1130 = vmatpush.msra.mxu2 %v165_v50 }
  0x35   :  { %v33_v52 = vld [vmem:[%s5981_s1 + $0x40] sm:$0xff]  ;;  %1150 = vmatpush.msra.mxu3 %v229_v51 }
  0x36   :  { %v97_v53 = vld [vmem:[%s5981_s1 + $0x240] sm:$0xff]  ;;  %1091 = vmatpush.msra.mxu0 %v33_v52 }
  0x37   :  { %v161_v54 = vld [vmem:[%s5981_s1 + $0x440] sm:$0xff]  ;;  %1111 = vmatpush.msra.mxu1 %v97_v53 }
  0x38   :  { %v225_v55 = vld [vmem:[%s5981_s1 + $0x640] sm:$0xff]  ;;  %1131 = vmatpush.msra.mxu2 %v161_v54 }
  0x39   :  { %v29_v56 = vld [vmem:[%s5981_s1 + $0x20] sm:$0xff]  ;;  %1151 = vmatpush.msra.mxu3 %v225_v55 }
  0x3a   :  { %v93_v57 = vld [vmem:[%s5981_s1 + $0x220] sm:$0xff]  ;;  %1092 = vmatpush.msra.mxu0 %v29_v56 }
  0x3b   :  { %v157_v58 = vld [vmem:[%s5981_s1 + $0x420] sm:$0xff]  ;;  %1112 = vmatpush.msra.mxu1 %v93_v57 }
  0x3c   :  { %v221_v59 = vld [vmem:[%s5981_s1 + $0x620] sm:$0xff]  ;;  %1132 = vmatpush.msra.mxu2 %v157_v58 }
  0x3d   :  { %v25_v60 = vld [vmem:[%s5981_s1] sm:$0xff]  ;;  %1152 = vmatpush.msra.mxu3 %v221_v59 }
  0x3e   :  { %v89_v61 = vld [vmem:[%s5981_s1 + $0x200] sm:$0xff]  ;;  %1093 = vmatpush.msra.mxu0 %v25_v60 }
  0x3f   :  { %v153_v62 = vld [vmem:[%s5981_s1 + $0x400] sm:$0xff]  ;;  %1113 = vmatpush.msra.mxu1 %v89_v61 }
  0x40   :  { %v217_v63 = vld [vmem:[%s5981_s1 + $0x600] sm:$0xff]  ;;  %1133 = vmatpush.msra.mxu2 %v153_v62 }
  0x41   :  { %v341_v0 = vld [vmem:[%s5981_s1 + $0x9e0] sm:$0xff]  ;;  %1153 = vmatpush.msra.mxu3 %v217_v63  ;;  %v24_v63 = vld [vmem:[%s5980_s0 + $0x18] sm:$0xff] }
  0x42   :  { %v405_v1 = vld [vmem:[%s5981_s1 + $0xbe0] sm:$0xff]  ;;  %1158 = vmatpush.msrb.mxu0 %v341_v0  ;;  %v3018_v0 = vld.sshfl [vmem:[#allocation1 + $0x30] sm:$0xff pattern:$0x73625140] }
  0x43   :  { %v469_v2 = vld [vmem:[%s5981_s1 + $0xde0] sm:$0xff]  ;;  %1178 = vmatpush.msrb.mxu1 %v405_v1 }
  0x44   :  { %v533_v3 = vld [vmem:[%s5981_s1 + $0xfe0] sm:$0xff]  ;;  %1198 = vmatpush.msrb.mxu2 %v469_v2  ;;  %v3022_v2 = vld.sshfl [vmem:[#allocation1 + $0x38] sm:$0xff pattern:$0x73625140] }
  0x45   :  { %v337_v4 = vld [vmem:[%s5981_s1 + $0x9c0] sm:$0xff]  ;;  %1218 = vmatpush.msrb.mxu3 %v533_v3  ;;  %v3024_v3 = vld.sshfl [vmem:[#allocation1 + $0x28] sm:$0xff pattern:$0x73625140] }
  0x46   :  { %v401_v5 = vld [vmem:[%s5981_s1 + $0xbc0] sm:$0xff]  ;;  %1159 = vmatpush.msrb.mxu0 %v337_v4 }
  0x47   :  { %v465_v6 = vld [vmem:[%s5981_s1 + $0xdc0] sm:$0xff]  ;;  %1179 = vmatpush.msrb.mxu1 %v401_v5 }
  0x48   :  { %v529_v7 = vld [vmem:[%s5981_s1 + $0xfc0] sm:$0xff]  ;;  %1199 = vmatpush.msrb.mxu2 %v465_v6 }
  0x49   :  { %v333_v8 = vld [vmem:[%s5981_s1 + $0x9a0] sm:$0xff]  ;;  %1219 = vmatpush.msrb.mxu3 %v529_v7 }
  0x4a   :  { %v397_v9 = vld [vmem:[%s5981_s1 + $0xba0] sm:$0xff]  ;;  %1160 = vmatpush.msrb.mxu0 %v333_v8 }
  0x4b   :  { %v461_v10 = vld [vmem:[%s5981_s1 + $0xda0] sm:$0xff]  ;;  %1180 = vmatpush.msrb.mxu1 %v397_v9 }
  0x4c   :  { %v525_v11 = vld [vmem:[%s5981_s1 + $0xfa0] sm:$0xff]  ;;  %1200 = vmatpush.msrb.mxu2 %v461_v10 }
  0x4d   :  { %v329_v12 = vld [vmem:[%s5981_s1 + $0x980] sm:$0xff]  ;;  %1220 = vmatpush.msrb.mxu3 %v525_v11 }
  0x4e   :  { %v393_v13 = vld [vmem:[%s5981_s1 + $0xb80] sm:$0xff]  ;;  %1161 = vmatpush.msrb.mxu0 %v329_v12 }
  0x4f   :  { %v457_v14 = vld [vmem:[%s5981_s1 + $0xd80] sm:$0xff]  ;;  %1181 = vmatpush.msrb.mxu1 %v393_v13 }
  0x50   :  { %v521_v15 = vld [vmem:[%s5981_s1 + $0xf80] sm:$0xff]  ;;  %1201 = vmatpush.msrb.mxu2 %v457_v14 }
  0x51   :  { %v325_v16 = vld [vmem:[%s5981_s1 + $0x960] sm:$0xff]  ;;  %1221 = vmatpush.msrb.mxu3 %v521_v15 }
  0x52   :  { %v389_v17 = vld [vmem:[%s5981_s1 + $0xb60] sm:$0xff]  ;;  %1162 = vmatpush.msrb.mxu0 %v325_v16 }
  0x53   :  { %v453_v18 = vld [vmem:[%s5981_s1 + $0xd60] sm:$0xff]  ;;  %1182 = vmatpush.msrb.mxu1 %v389_v17 }
  0x54   :  { %v517_v19 = vld [vmem:[%s5981_s1 + $0xf60] sm:$0xff]  ;;  %1202 = vmatpush.msrb.mxu2 %v453_v18 }
  0x55   :  { %v321_v20 = vld [vmem:[%s5981_s1 + $0x940] sm:$0xff]  ;;  %1222 = vmatpush.msrb.mxu3 %v517_v19 }
  0x56   :  { %v385_v21 = vld [vmem:[%s5981_s1 + $0xb40] sm:$0xff]  ;;  %1163 = vmatpush.msrb.mxu0 %v321_v20 }
  0x57   :  { %v449_v22 = vld [vmem:[%s5981_s1 + $0xd40] sm:$0xff]  ;;  %1183 = vmatpush.msrb.mxu1 %v385_v21 }
  0x58   :  { %v513_v23 = vld [vmem:[%s5981_s1 + $0xf40] sm:$0xff]  ;;  %1203 = vmatpush.msrb.mxu2 %v449_v22 }
  0x59   :  { %v317_v24 = vld [vmem:[%s5981_s1 + $0x920] sm:$0xff]  ;;  %1223 = vmatpush.msrb.mxu3 %v513_v23 }
  0x5a   :  { %v381_v25 = vld [vmem:[%s5981_s1 + $0xb20] sm:$0xff]  ;;  %1164 = vmatpush.msrb.mxu0 %v317_v24 }
  0x5b   :  { %v21_v26 = vld [vmem:[%s5980_s0] sm:$0xff]  ;;  %1184 = vmatpush.msrb.mxu1 %v381_v25 }
  0x5c   :  { %v445_v27 = vld [vmem:[%s5981_s1 + $0xd20] sm:$0xff]  ;;  %1039 = vst [vmem:[#allocation1] ss:$4 sm:$0xff] %v21_v26 }
  0x5d   :  { %v509_v28 = vld [vmem:[%s5981_s1 + $0xf20] sm:$0xff]  ;;  %1204 = vmatpush.msrb.mxu2 %v445_v27 }
  0x5e   :  { %v313_v29 = vld [vmem:[%s5981_s1 + $0x900] sm:$0xff]  ;;  %1224 = vmatpush.msrb.mxu3 %v509_v28 }
  0x5f   :  { %v377_v30 = vld [vmem:[%s5981_s1 + $0xb00] sm:$0xff]  ;;  %1165 = vmatpush.msrb.mxu0 %v313_v29 }
  0x60   :  { %v441_v31 = vld [vmem:[%s5981_s1 + $0xd00] sm:$0xff]  ;;  %1185 = vmatpush.msrb.mxu1 %v377_v30 }
  0x61   :  { %v505_v32 = vld [vmem:[%s5981_s1 + $0xf00] sm:$0xff]  ;;  %1205 = vmatpush.msrb.mxu2 %v441_v31 }
  0x62   :  { %v309_v33 = vld [vmem:[%s5981_s1 + $0x8e0] sm:$0xff]  ;;  %1225 = vmatpush.msrb.mxu3 %v505_v32 }
  0x63   :  { %v373_v34 = vld [vmem:[%s5981_s1 + $0xae0] sm:$0xff]  ;;  %1166 = vmatpush.msrb.mxu0 %v309_v33  ;;  %v2976_v49 = vld.sshfl [vmem:[#allocation1 + $0x8] sm:$0xff pattern:$0x73625140] }
  0x64   :  { %v437_v35 = vld [vmem:[%s5981_s1 + $0xce0] sm:$0xff]  ;;  %1186 = vmatpush.msrb.mxu1 %v373_v34  ;;  %v2978_v50 = vld.sshfl [vmem:[#allocation1 + $0x10] sm:$0xff pattern:$0x73625140] }
  0x65   :  { %v501_v36 = vld [vmem:[%s5981_s1 + $0xee0] sm:$0xff]  ;;  %1206 = vmatpush.msrb.mxu2 %v437_v35  ;;  %v2980_v51 = vld.sshfl [vmem:[#allocation1 + $0x18] sm:$0xff pattern:$0x73625140]  ;;  %1114 = vmatmul.f32.vlgmr.msra.gmra.mxu1 %v2976_v49 }
  0x66   :  { %v305_v37 = vld [vmem:[%s5981_s1 + $0x8c0] sm:$0xff]  ;;  %1226 = vmatpush.msrb.mxu3 %v501_v36  ;;  %1134 = vmatmul.f32.vlgmr.msra.gmra.mxu2 %v2978_v50 }
  0x67   :  { %v369_v38 = vld [vmem:[%s5981_s1 + $0xac0] sm:$0xff]  ;;  %1167 = vmatpush.msrb.mxu0 %v305_v37  ;;  %1154 = vmatmul.f32.vlgmr.msra.gmra.mxu3 %v2980_v51 }
  0x68   :  { %v433_v39 = vld [vmem:[%s5981_s1 + $0xcc0] sm:$0xff]  ;;  %1187 = vmatpush.msrb.mxu1 %v369_v38 }
  0x69   :  { %v497_v40 = vld [vmem:[%s5981_s1 + $0xec0] sm:$0xff]  ;;  %1207 = vmatpush.msrb.mxu2 %v433_v39 }
  0x6a   :  { %v301_v41 = vld [vmem:[%s5981_s1 + $0x8a0] sm:$0xff]  ;;  %1227 = vmatpush.msrb.mxu3 %v497_v40 }
  0x6b   :  { %v365_v42 = vld [vmem:[%s5981_s1 + $0xaa0] sm:$0xff]  ;;  %1168 = vmatpush.msrb.mxu0 %v301_v41 }
  0x6c   :  { %v429_v44 = vld [vmem:[%s5981_s1 + $0xca0] sm:$0xff]  ;;  %1188 = vmatpush.msrb.mxu1 %v365_v42 }
  0x6d   :  { %v493_v45 = vld [vmem:[%s5981_s1 + $0xea0] sm:$0xff]  ;;  %1208 = vmatpush.msrb.mxu2 %v429_v44 }
  0x6e   :  { %v297_v47 = vld [vmem:[%s5981_s1 + $0x880] sm:$0xff]  ;;  %1228 = vmatpush.msrb.mxu3 %v493_v45 }
  0x6f   :  { %v2974_v48 = vld.sshfl [vmem:[#allocation1] sm:$0xff pattern:$0x73625140]  ;;  %1169 = vmatpush.msrb.mxu0 %v297_v47 }
  0x70   :  { %v361_v52 = vld [vmem:[%s5981_s1 + $0xa80] sm:$0xff]  ;;  %1050 = vst [vmem:[#allocation1] ss:$4 sm:$0xff] %v23_v46  ;;  %1094 = vmatmul.f32.vlgmr.msra.gmra.mxu0 %v2974_v48 }
  0x71   :  { %v425_v53 = vld [vmem:[%s5981_s1 + $0xc80] sm:$0xff]  ;;  %1189 = vmatpush.msrb.mxu1 %v361_v52 }
  0x72   :  { %v489_v54 = vld [vmem:[%s5981_s1 + $0xe80] sm:$0xff]  ;;  %1209 = vmatpush.msrb.mxu2 %v425_v53 }
  0x73   :  { %v293_v55 = vld [vmem:[%s5981_s1 + $0x860] sm:$0xff]  ;;  %1229 = vmatpush.msrb.mxu3 %v489_v54 }
  0x74   :  { %v357_v56 = vld [vmem:[%s5981_s1 + $0xa60] sm:$0xff]  ;;  %1170 = vmatpush.msrb.mxu0 %v293_v55 }
  0x75   :  { %v421_v57 = vld [vmem:[%s5981_s1 + $0xc60] sm:$0xff]  ;;  %1190 = vmatpush.msrb.mxu1 %v357_v56 }
  0x76   :  { %v485_v58 = vld [vmem:[%s5981_s1 + $0xe60] sm:$0xff]  ;;  %1210 = vmatpush.msrb.mxu2 %v421_v57 }
  0x77   :  { %v289_v59 = vld [vmem:[%s5981_s1 + $0x840] sm:$0xff]  ;;  %1230 = vmatpush.msrb.mxu3 %v485_v58 }
  0x78   :  { %v353_v60 = vld [vmem:[%s5981_s1 + $0xa40] sm:$0xff]  ;;  %1171 = vmatpush.msrb.mxu0 %v289_v59 }
  0x79   :  { %v417_v61 = vld [vmem:[%s5981_s1 + $0xc40] sm:$0xff]  ;;  %1191 = vmatpush.msrb.mxu1 %v353_v60 }
  0x7a   :  { %v481_v62 = vld [vmem:[%s5981_s1 + $0xe40] sm:$0xff]  ;;  %1211 = vmatpush.msrb.mxu2 %v417_v61 }
  0x7b   :  { %v3020_v1 = vld.sshfl [vmem:[#allocation1 + $0x20] sm:$0xff pattern:$0x73625140]  ;;  %1231 = vmatpush.msrb.mxu3 %v481_v62 }
  0x7c   :  { %v285_v4 = vld [vmem:[%s5981_s1 + $0x820] sm:$0xff]  ;;  %1051 = vst [vmem:[#allocation1 + $0x20] ss:$4 sm:$0xff] %v24_v63 }
  0x7d   :  { %v349_v5 = vld [vmem:[%s5981_s1 + $0xa20] sm:$0xff]  ;;  %1172 = vmatpush.msrb.mxu0 %v285_v4 }
  0x7e   :  { %v413_v6 = vld [vmem:[%s5981_s1 + $0xc20] sm:$0xff]  ;;  %1192 = vmatpush.msrb.mxu1 %v349_v5 }
  0x7f   :  { %v477_v7 = vld [vmem:[%s5981_s1 + $0xe20] sm:$0xff]  ;;  %1212 = vmatpush.msrb.mxu2 %v413_v6 }
  0x80   :  { %v281_v8 = vld [vmem:[%s5981_s1 + $0x800] sm:$0xff]  ;;  %1232 = vmatpush.msrb.mxu3 %v477_v7 }
  0x81   :  { %v345_v9 = vld [vmem:[%s5981_s1 + $0xa00] sm:$0xff]  ;;  %1173 = vmatpush.msrb.mxu0 %v281_v8 }
  0x82   :  { %v409_v10 = vld [vmem:[%s5981_s1 + $0xc00] sm:$0xff]  ;;  %1193 = vmatpush.msrb.mxu1 %v345_v9 }
  0x83   :  { %v473_v11 = vld [vmem:[%s5981_s1 + $0xe00] sm:$0xff]  ;;  %1213 = vmatpush.msrb.mxu2 %v409_v10 }
  0x84   :  { %1233 = vmatpush.msrb.mxu3 %v473_v11  ;;  %v597_v12 = vld [vmem:[%s5981_s1 + $0x11e0] sm:$0xff] }
  0x85   :  { %v661_v13 = vld [vmem:[%s5981_s1 + $0x13e0] sm:$0xff]  ;;  %1238 = vmatpush.msra.mxu0 %v597_v12 }
  0x86   :  { %v725_v14 = vld [vmem:[%s5981_s1 + $0x15e0] sm:$0xff]  ;;  %1258 = vmatpush.msra.mxu1 %v661_v13 }
  0x87   :  { %v789_v15 = vld [vmem:[%s5981_s1 + $0x17e0] sm:$0xff]  ;;  %1278 = vmatpush.msra.mxu2 %v725_v14 }
  0x88   :  { %v593_v16 = vld [vmem:[%s5981_s1 + $0x11c0] sm:$0xff]  ;;  %1298 = vmatpush.msra.mxu3 %v789_v15 }
  0x89   :  { %v657_v17 = vld [vmem:[%s5981_s1 + $0x13c0] sm:$0xff]  ;;  %1239 = vmatpush.msra.mxu0 %v593_v16 }
  0x8a   :  { %v721_v18 = vld [vmem:[%s5981_s1 + $0x15c0] sm:$0xff]  ;;  %1259 = vmatpush.msra.mxu1 %v657_v17 }
  0x8b   :  { %v785_v19 = vld [vmem:[%s5981_s1 + $0x17c0] sm:$0xff]  ;;  %1279 = vmatpush.msra.mxu2 %v721_v18 }
  0x8c   :  { %v589_v20 = vld [vmem:[%s5981_s1 + $0x11a0] sm:$0xff]  ;;  %1299 = vmatpush.msra.mxu3 %v785_v19 }
  0x8d   :  { %v653_v21 = vld [vmem:[%s5981_s1 + $0x13a0] sm:$0xff]  ;;  %1240 = vmatpush.msra.mxu0 %v589_v20 }
  0x8e   :  { %v717_v22 = vld [vmem:[%s5981_s1 + $0x15a0] sm:$0xff]  ;;  %1260 = vmatpush.msra.mxu1 %v653_v21 }
  0x8f   :  { %v781_v23 = vld [vmem:[%s5981_s1 + $0x17a0] sm:$0xff]  ;;  %1280 = vmatpush.msra.mxu2 %v717_v22 }
  0x90   :  { %v585_v24 = vld [vmem:[%s5981_s1 + $0x1180] sm:$0xff]  ;;  %1300 = vmatpush.msra.mxu3 %v781_v23 }
  0x91   :  { %v649_v25 = vld [vmem:[%s5981_s1 + $0x1380] sm:$0xff]  ;;  %1241 = vmatpush.msra.mxu0 %v585_v24 }
  0x92   :  { %v713_v26 = vld [vmem:[%s5981_s1 + $0x1580] sm:$0xff]  ;;  %1261 = vmatpush.msra.mxu1 %v649_v25 }
  0x93   :  { %v777_v27 = vld [vmem:[%s5981_s1 + $0x1780] sm:$0xff] }
  0x94   :  { %v581_v28 = vld [vmem:[%s5981_s1 + $0x1160] sm:$0xff] }
  0x95   :  { %v645_v29 = vld [vmem:[%s5981_s1 + $0x1360] sm:$0xff] }
  0x96   :  { %v709_v30 = vld [vmem:[%s5981_s1 + $0x1560] sm:$0xff] }
  0x97   :  { %10 = vsyncpa [#allocation3], 0  ;;  %1281 = vmatpush.msra.mxu2 %v713_v26  ;;  %1301 = vmatpush.msra.mxu3 %v777_v27  ;;  %v773_v31 = vld [vmem:[%s5981_s1 + $0x1760] sm:$0xff]  ;;  %v1054_v21 = vld.sshfl [vmem:[#allocation1 + $0x10] sm:$0xff pattern:$0x73625140] }
  0x98   :  { %1214 = vmatmul.f32.vlgmr.msrb.gmra.mxu2 %v3018_v0  ;;  %1242 = vmatpush.msra.mxu0 %v581_v28  ;;  %v577_v32 = vld [vmem:[%s5981_s1 + $0x1140] sm:$0xff]  ;;  %v1053_v26 = vld.sshfl [vmem:[#allocation1 + $0x8] sm:$0xff pattern:$0x73625140]  ;;  %vm1075_vm0 = vcmask 654336   ;;  %vm2433_vm1 = vcmask 1043456  }
  0x99   :  { %1262 = vmatpush.msra.mxu1 %v645_v29  ;;  %1282 = vmatpush.msra.mxu2 %v709_v30  ;;  %v641_v33 = vld [vmem:[%s5981_s1 + $0x1340] sm:$0xff]  ;;  %v1055_v27 = vld.sshfl [vmem:[#allocation1 + $0x18] sm:$0xff pattern:$0x73625140]  ;;  %vm2429_vm2 = vcmask 949248   ;;  %vm2517_vm3 = vcmask 74752  }
  0x9a   :  { %v705_v34 = vld [vmem:[%s5981_s1 + $0x1540] sm:$0xff]  ;;  %1302 = vmatpush.msra.mxu3 %v773_v31  ;;  %1174 = vmatmul.f32.vlgmr.msrb.gmra.mxu0 %v3020_v1  ;;  %s2538_s23 = sshll.u32 %s5985_s5, 4  ;;  %s2539_s23 = int_to_ptr.hbm [resolvable:$true] %s2538_s23 }
  0x9b   :  { %v769_v35 = vld [vmem:[%s5981_s1 + $0x1740] sm:$0xff]  ;;  %1234 = vmatmul.f32.vlgmr.msrb.gmra.mxu3 %v3022_v2  ;;  %1243 = vmatpush.msra.mxu0 %v577_v32 }
  0x9c   :  { %v573_v36 = vld [vmem:[%s5981_s1 + $0x1120] sm:$0xff]  ;;  %1263 = vmatpush.msra.mxu1 %v641_v33  ;;  %1283 = vmatpush.msra.mxu2 %v705_v34 }
  0x9d   :  { %v637_v37 = vld [vmem:[%s5981_s1 + $0x1320] sm:$0xff]  ;;  %1303 = vmatpush.msra.mxu3 %v769_v35  ;;  %1194 = vmatmul.f32.vlgmr.msrb.gmra.mxu1 %v3024_v3 }
  0x9e   :  { %v701_v38 = vld [vmem:[%s5981_s1 + $0x1520] sm:$0xff]  ;;  %1244 = vmatpush.msra.mxu0 %v573_v36  ;;  %1264 = vmatpush.msra.mxu1 %v637_v37 }
  0x9f   :  { %v765_v39 = vld [vmem:[%s5981_s1 + $0x1720] sm:$0xff]  ;;  %1284 = vmatpush.msra.mxu2 %v701_v38 }
  0xa0   :  { %v569_v40 = vld [vmem:[%s5981_s1 + $0x1100] sm:$0xff]  ;;  %1304 = vmatpush.msra.mxu3 %v765_v39 }
  0xa1   :  { %v633_v41 = vld [vmem:[%s5981_s1 + $0x1300] sm:$0xff]  ;;  %1245 = vmatpush.msra.mxu0 %v569_v40 }
  0xa2   :  { %v697_v42 = vld [vmem:[%s5981_s1 + $0x1500] sm:$0xff]  ;;  %1265 = vmatpush.msra.mxu1 %v633_v41 }
  0xa3   :  { %v761_v43 = vld [vmem:[%s5981_s1 + $0x1700] sm:$0xff]  ;;  %1285 = vmatpush.msra.mxu2 %v697_v42 }
  0xa4   :  { %v565_v44 = vld [vmem:[%s5981_s1 + $0x10e0] sm:$0xff]  ;;  %1305 = vmatpush.msra.mxu3 %v761_v43 }
  0xa5   :  { %v629_v45 = vld [vmem:[%s5981_s1 + $0x12e0] sm:$0xff]  ;;  %1246 = vmatpush.msra.mxu0 %v565_v44 }
  0xa6   :  { %v693_v46 = vld [vmem:[%s5981_s1 + $0x14e0] sm:$0xff]  ;;  %1266 = vmatpush.msra.mxu1 %v629_v45 }
  0xa7   :  { %v757_v47 = vld [vmem:[%s5981_s1 + $0x16e0] sm:$0xff]  ;;  %1286 = vmatpush.msra.mxu2 %v693_v46 }
  0xa8   :  { %v561_v52 = vld [vmem:[%s5981_s1 + $0x10c0] sm:$0xff]  ;;  %1306 = vmatpush.msra.mxu3 %v757_v47 }
  0xa9   :  { %v625_v53 = vld [vmem:[%s5981_s1 + $0x12c0] sm:$0xff]  ;;  %1247 = vmatpush.msra.mxu0 %v561_v52 }
  0xaa   :  { %v689_v54 = vld [vmem:[%s5981_s1 + $0x14c0] sm:$0xff]  ;;  %1267 = vmatpush.msra.mxu1 %v625_v53 }
  0xab   :  { %v753_v55 = vld [vmem:[%s5981_s1 + $0x16c0] sm:$0xff]  ;;  %1287 = vmatpush.msra.mxu2 %v689_v54 }
  0xac   :  { %v557_v56 = vld [vmem:[%s5981_s1 + $0x10a0] sm:$0xff]  ;;  %1307 = vmatpush.msra.mxu3 %v753_v55 }
  0xad   :  { %v621_v57 = vld [vmem:[%s5981_s1 + $0x12a0] sm:$0xff]  ;;  %1248 = vmatpush.msra.mxu0 %v557_v56 }
  0xae   :  { %v685_v58 = vld [vmem:[%s5981_s1 + $0x14a0] sm:$0xff]  ;;  %1268 = vmatpush.msra.mxu1 %v621_v57 }
  0xaf   :  { %v749_v59 = vld [vmem:[%s5981_s1 + $0x16a0] sm:$0xff]  ;;  %1288 = vmatpush.msra.mxu2 %v685_v58 }
  0xb0   :  { %v553_v60 = vld [vmem:[%s5981_s1 + $0x1080] sm:$0xff]  ;;  %1308 = vmatpush.msra.mxu3 %v749_v59 }
  0xb1   :  { %v617_v61 = vld [vmem:[%s5981_s1 + $0x1280] sm:$0xff]  ;;  %1249 = vmatpush.msra.mxu0 %v553_v60 }
  0xb2   :  { %v681_v62 = vld [vmem:[%s5981_s1 + $0x1480] sm:$0xff]  ;;  %1269 = vmatpush.msra.mxu1 %v617_v61 }
  0xb3   :  { %v745_v63 = vld [vmem:[%s5981_s1 + $0x1680] sm:$0xff]  ;;  %1289 = vmatpush.msra.mxu2 %v681_v62 }
  0xb4   :  { %v549_v4 = vld [vmem:[%s5981_s1 + $0x1060] sm:$0xff]  ;;  %1309 = vmatpush.msra.mxu3 %v745_v63 }
  0xb5   :  { %v613_v5 = vld [vmem:[%s5981_s1 + $0x1260] sm:$0xff]  ;;  %1250 = vmatpush.msra.mxu0 %v549_v4 }
  0xb6   :  { %v677_v6 = vld [vmem:[%s5981_s1 + $0x1460] sm:$0xff]  ;;  %1270 = vmatpush.msra.mxu1 %v613_v5 }
  0xb7   :  { %v741_v7 = vld [vmem:[%s5981_s1 + $0x1660] sm:$0xff]  ;;  %1290 = vmatpush.msra.mxu2 %v677_v6 }
  0xb8   :  { %v545_v8 = vld [vmem:[%s5981_s1 + $0x1040] sm:$0xff]  ;;  %1310 = vmatpush.msra.mxu3 %v741_v7 }
  0xb9   :  { %v609_v9 = vld [vmem:[%s5981_s1 + $0x1240] sm:$0xff]  ;;  %1251 = vmatpush.msra.mxu0 %v545_v8  ;;  %v86_v8 = vld [vmem:[%s5981_s1 + $0x1e8] sm:$0xff] }
  0xba   :  { %v673_v10 = vld [vmem:[%s5981_s1 + $0x1440] sm:$0xff]  ;;  %1271 = vmatpush.msra.mxu1 %v609_v9 }
  0xbb   :  { %v737_v11 = vld [vmem:[%s5981_s1 + $0x1640] sm:$0xff]  ;;  %1291 = vmatpush.msra.mxu2 %v673_v10 }
  0xbc   :  { %v541_v12 = vld [vmem:[%s5981_s1 + $0x1020] sm:$0xff]  ;;  %1311 = vmatpush.msra.mxu3 %v737_v11 }
  0xbd   :  { %v605_v13 = vld [vmem:[%s5981_s1 + $0x1220] sm:$0xff]  ;;  %1252 = vmatpush.msra.mxu0 %v541_v12  ;;  %v82_v12 = vld [vmem:[%s5981_s1 + $0x1c8] sm:$0xff] }
  0xbe   :  { %v669_v14 = vld [vmem:[%s5981_s1 + $0x1420] sm:$0xff]  ;;  %1272 = vmatpush.msra.mxu1 %v605_v13 }
  0xbf   :  { %v733_v15 = vld [vmem:[%s5981_s1 + $0x1620] sm:$0xff]  ;;  %1292 = vmatpush.msra.mxu2 %v669_v14 }
  0xc0   :  { %v537_v16 = vld [vmem:[%s5981_s1 + $0x1000] sm:$0xff]  ;;  %1312 = vmatpush.msra.mxu3 %v733_v15 }
  0xc1   :  { %v601_v17 = vld [vmem:[%s5981_s1 + $0x1200] sm:$0xff]  ;;  %1253 = vmatpush.msra.mxu0 %v537_v16  ;;  %v78_v16 = vld [vmem:[%s5981_s1 + $0x1a8] sm:$0xff] }
  0xc2   :  { %v665_v18 = vld [vmem:[%s5981_s1 + $0x1400] sm:$0xff]  ;;  %1273 = vmatpush.msra.mxu1 %v601_v17 }
  0xc3   :  { %v729_v19 = vld [vmem:[%s5981_s1 + $0x1600] sm:$0xff]  ;;  %1293 = vmatpush.msra.mxu2 %v665_v18  ;;  %1274 = vmatmul.f32.vlgmr.msra.gmra.mxu1 %v1053_v26 }
  0xc4   :  { %v1052_v20 = vld.sshfl [vmem:[#allocation1] sm:$0xff pattern:$0x73625140]  ;;  %1313 = vmatpush.msra.mxu3 %v729_v19  ;;  %1294 = vmatmul.f32.vlgmr.msra.gmra.mxu2 %v1054_v21 }
  0xc5   :  { %v853_v22 = vld [vmem:[%s5981_s1 + $0x19e0] sm:$0xff]  ;;  %1254 = vmatmul.f32.vlgmr.msra.gmra.mxu0 %v1052_v20  ;;  %1314 = vmatmul.f32.vlgmr.msra.gmra.mxu3 %v1055_v27  ;;  %v74_v20 = vld [vmem:[%s5981_s1 + $0x188] sm:$0xff] }
  0xc6   :  { %v917_v23 = vld [vmem:[%s5981_s1 + $0x1be0] sm:$0xff]  ;;  %1318 = vmatpush.msrb.mxu0 %v853_v22 }
  0xc7   :  { %v981_v24 = vld [vmem:[%s5981_s1 + $0x1de0] sm:$0xff]  ;;  %1338 = vmatpush.msrb.mxu1 %v917_v23 }
  0xc8   :  { %v1021_v25 = vld [vmem:[%s5981_s1 + $0x1f20] sm:$0xff]  ;;  %1358 = vmatpush.msrb.mxu2 %v981_v24  ;;  %v70_v24 = vld [vmem:[%s5981_s1 + $0x168] sm:$0xff] }
  0xc9   :  { %v849_v28 = vld [vmem:[%s5981_s1 + $0x19c0] sm:$0xff]  ;;  %1384 = vmatpush.msrb.mxu3 %v1021_v25 }
  0xca   :  { %v913_v29 = vld [vmem:[%s5981_s1 + $0x1bc0] sm:$0xff]  ;;  %1319 = vmatpush.msrb.mxu0 %v849_v28  ;;  %v66_v28 = vld [vmem:[%s5981_s1 + $0x148] sm:$0xff] }
  0xcb   :  { %v977_v30 = vld [vmem:[%s5981_s1 + $0x1dc0] sm:$0xff]  ;;  %1339 = vmatpush.msrb.mxu1 %v913_v29 }
  0xcc   :  { %v1017_v31 = vld [vmem:[%s5981_s1 + $0x1f00] sm:$0xff]  ;;  %1359 = vmatpush.msrb.mxu2 %v977_v30 }
  0xcd   :  { %v845_v32 = vld [vmem:[%s5981_s1 + $0x19a0] sm:$0xff]  ;;  %1385 = vmatpush.msrb.mxu3 %v1017_v31 }
  0xce   :  { %v909_v33 = vld [vmem:[%s5981_s1 + $0x1ba0] sm:$0xff]  ;;  %1320 = vmatpush.msrb.mxu0 %v845_v32 }
  0xcf   :  { %v973_v34 = vld [vmem:[%s5981_s1 + $0x1da0] sm:$0xff]  ;;  %1340 = vmatpush.msrb.mxu1 %v909_v33  ;;  %v1058_v33 = vld.sshfl [vmem:[#allocation1 + $0x30] sm:$0xff pattern:$0x73625140] }
  0xd0   :  { %v1013_v35 = vld [vmem:[%s5981_s1 + $0x1ee0] sm:$0xff]  ;;  %1360 = vmatpush.msrb.mxu2 %v973_v34  ;;  %v62_v34 = vld [vmem:[%s5981_s1 + $0x128] sm:$0xff] }
  0xd1   :  { %v841_v36 = vld [vmem:[%s5981_s1 + $0x1980] sm:$0xff]  ;;  %1386 = vmatpush.msrb.mxu3 %v1013_v35  ;;  %v150_v35 = vld [vmem:[%s5981_s1 + $0x3e8] sm:$0xff] }
  0xd2   :  { %v905_v37 = vld [vmem:[%s5981_s1 + $0x1b80] sm:$0xff]  ;;  %1321 = vmatpush.msrb.mxu0 %v841_v36  ;;  %v214_v36 = vld [vmem:[%s5981_s1 + $0x5e8] sm:$0xff] }
  0xd3   :  { %v969_v38 = vld [vmem:[%s5981_s1 + $0x1d80] sm:$0xff]  ;;  %1341 = vmatpush.msrb.mxu1 %v905_v37  ;;  %v278_v37 = vld [vmem:[%s5981_s1 + $0x7e8] sm:$0xff] }
  0xd4   :  { %v1009_v39 = vld [vmem:[%s5981_s1 + $0x1ec0] sm:$0xff]  ;;  %1361 = vmatpush.msrb.mxu2 %v969_v38  ;;  %v1057_v38 = vld.sshfl [vmem:[#allocation1 + $0x28] sm:$0xff pattern:$0x73625140] }
  0xd5   :  { %v837_v40 = vld [vmem:[%s5981_s1 + $0x1960] sm:$0xff]  ;;  %1387 = vmatpush.msrb.mxu3 %v1009_v39  ;;  %v1059_v39 = vld.sshfl [vmem:[#allocation1 + $0x38] sm:$0xff pattern:$0x73625140] }
  0xd6   :  { %v901_v41 = vld [vmem:[%s5981_s1 + $0x1b60] sm:$0xff]  ;;  %1322 = vmatpush.msrb.mxu0 %v837_v40  ;;  %v58_v40 = vld [vmem:[%s5981_s1 + $0x108] sm:$0xff] }
  0xd7   :  { %v965_v42 = vld [vmem:[%s5981_s1 + $0x1d60] sm:$0xff]  ;;  %1342 = vmatpush.msrb.mxu1 %v901_v41  ;;  %v146_v41 = vld [vmem:[%s5981_s1 + $0x3c8] sm:$0xff] }
  0xd8   :  { %v1005_v43 = vld [vmem:[%s5981_s1 + $0x1ea0] sm:$0xff]  ;;  %1362 = vmatpush.msrb.mxu2 %v965_v42  ;;  %v210_v42 = vld [vmem:[%s5981_s1 + $0x5c8] sm:$0xff] }
  0xd9   :  { %v833_v44 = vld [vmem:[%s5981_s1 + $0x1940] sm:$0xff]  ;;  %1388 = vmatpush.msrb.mxu3 %v1005_v43  ;;  %v274_v43 = vld [vmem:[%s5981_s1 + $0x7c8] sm:$0xff] }
  0xda   :  { %v897_v45 = vld [vmem:[%s5981_s1 + $0x1b40] sm:$0xff]  ;;  %1323 = vmatpush.msrb.mxu0 %v833_v44  ;;  %v54_v44 = vld [vmem:[%s5981_s1 + $0xe8] sm:$0xff] }
  0xdb   :  { %v961_v46 = vld [vmem:[%s5981_s1 + $0x1d40] sm:$0xff]  ;;  %1343 = vmatpush.msrb.mxu1 %v897_v45  ;;  %v142_v45 = vld [vmem:[%s5981_s1 + $0x3a8] sm:$0xff] }
  0xdc   :  { %v1001_v47 = vld [vmem:[%s5981_s1 + $0x1e80] sm:$0xff]  ;;  %1363 = vmatpush.msrb.mxu2 %v961_v46  ;;  %v206_v46 = vld [vmem:[%s5981_s1 + $0x5a8] sm:$0xff] }
  0xdd   :  { %v829_v52 = vld [vmem:[%s5981_s1 + $0x1920] sm:$0xff]  ;;  %1389 = vmatpush.msrb.mxu3 %v1001_v47  ;;  %v270_v47 = vld [vmem:[%s5981_s1 + $0x7a8] sm:$0xff] }
  0xde   :  { %v893_v53 = vld [vmem:[%s5981_s1 + $0x1b20] sm:$0xff]  ;;  %1324 = vmatpush.msrb.mxu0 %v829_v52  ;;  %v50_v52 = vld [vmem:[%s5981_s1 + $0xc8] sm:$0xff] }
  0xdf   :  { %v957_v54 = vld [vmem:[%s5981_s1 + $0x1d20] sm:$0xff]  ;;  %1344 = vmatpush.msrb.mxu1 %v893_v53  ;;  %v138_v53 = vld [vmem:[%s5981_s1 + $0x388] sm:$0xff] }
  0xe0   :  { %v997_v55 = vld [vmem:[%s5981_s1 + $0x1e60] sm:$0xff]  ;;  %1364 = vmatpush.msrb.mxu2 %v957_v54  ;;  %v202_v54 = vld [vmem:[%s5981_s1 + $0x588] sm:$0xff] }
  0xe1   :  { %v825_v56 = vld [vmem:[%s5981_s1 + $0x1900] sm:$0xff]  ;;  %1390 = vmatpush.msrb.mxu3 %v997_v55  ;;  %v266_v55 = vld [vmem:[%s5981_s1 + $0x788] sm:$0xff] }
  0xe2   :  { %v889_v57 = vld [vmem:[%s5981_s1 + $0x1b00] sm:$0xff]  ;;  %1325 = vmatpush.msrb.mxu0 %v825_v56  ;;  %v46_v56 = vld [vmem:[%s5981_s1 + $0xa8] sm:$0xff] }
  0xe3   :  { %v953_v58 = vld [vmem:[%s5981_s1 + $0x1d00] sm:$0xff]  ;;  %1345 = vmatpush.msrb.mxu1 %v889_v57  ;;  %v134_v57 = vld [vmem:[%s5981_s1 + $0x368] sm:$0xff] }
  0xe4   :  { %v993_v59 = vld [vmem:[%s5981_s1 + $0x1e40] sm:$0xff]  ;;  %1365 = vmatpush.msrb.mxu2 %v953_v58  ;;  %v198_v58 = vld [vmem:[%s5981_s1 + $0x568] sm:$0xff] }
  0xe5   :  { %v821_v60 = vld [vmem:[%s5981_s1 + $0x18e0] sm:$0xff]  ;;  %1391 = vmatpush.msrb.mxu3 %v993_v59  ;;  %v262_v59 = vld [vmem:[%s5981_s1 + $0x768] sm:$0xff] }
  0xe6   :  { %v885_v61 = vld [vmem:[%s5981_s1 + $0x1ae0] sm:$0xff]  ;;  %1326 = vmatpush.msrb.mxu0 %v821_v60  ;;  %v42_v60 = vld [vmem:[%s5981_s1 + $0x88] sm:$0xff] }
  0xe7   :  { %v949_v62 = vld [vmem:[%s5981_s1 + $0x1ce0] sm:$0xff]  ;;  %1346 = vmatpush.msrb.mxu1 %v885_v61  ;;  %v130_v61 = vld [vmem:[%s5981_s1 + $0x348] sm:$0xff] }
  0xe8   :  { %v989_v63 = vld [vmem:[%s5981_s1 + $0x1e20] sm:$0xff]  ;;  %1366 = vmatpush.msrb.mxu2 %v949_v62  ;;  %v194_v62 = vld [vmem:[%s5981_s1 + $0x548] sm:$0xff] }
  0xe9   :  { %v817_v4 = vld [vmem:[%s5981_s1 + $0x18c0] sm:$0xff]  ;;  %1392 = vmatpush.msrb.mxu3 %v989_v63  ;;  %v258_v63 = vld [vmem:[%s5981_s1 + $0x748] sm:$0xff] }
  0xea   :  { %v881_v5 = vld [vmem:[%s5981_s1 + $0x1ac0] sm:$0xff]  ;;  %1327 = vmatpush.msrb.mxu0 %v817_v4  ;;  %v38_v4 = vld [vmem:[%s5981_s1 + $0x68] sm:$0xff] }
  0xeb   :  { %v945_v6 = vld [vmem:[%s5981_s1 + $0x1cc0] sm:$0xff]  ;;  %1347 = vmatpush.msrb.mxu1 %v881_v5  ;;  %v126_v5 = vld [vmem:[%s5981_s1 + $0x328] sm:$0xff] }
  0xec   :  { %v985_v7 = vld [vmem:[%s5981_s1 + $0x1e00] sm:$0xff]  ;;  %1367 = vmatpush.msrb.mxu2 %v945_v6  ;;  %v190_v6 = vld [vmem:[%s5981_s1 + $0x528] sm:$0xff] }
  0xed   :  { %v813_v9 = vld [vmem:[%s5981_s1 + $0x18a0] sm:$0xff]  ;;  %1393 = vmatpush.msrb.mxu3 %v985_v7  ;;  %v254_v7 = vld [vmem:[%s5981_s1 + $0x728] sm:$0xff] }
  0xee   :  { %v877_v10 = vld [vmem:[%s5981_s1 + $0x1aa0] sm:$0xff]  ;;  %1328 = vmatpush.msrb.mxu0 %v813_v9  ;;  %2547 = vmatmul.msk.f32.vlgmr.msrb.gmra.mxu3 %vm1075_vm0, %v1059_v39  ;;  %v122_v9 = vld [vmem:[%s5981_s1 + $0x308] sm:$0xff] }
  0xef   :  { %v941_v11 = vld [vmem:[%s5981_s1 + $0x1ca0] sm:$0xff]  ;;  %1398 = vmatpush.msra.mxu3 %v86_v8  ;;  %1348 = vmatpush.msrb.mxu1 %v877_v10  ;;  %v34_v8 = vld [vmem:[%s5981_s1 + $0x48] sm:$0xff] }
  0xf0   :  { %v809_v13 = vld [vmem:[%s5981_s1 + $0x1880] sm:$0xff]  ;;  %1368 = vmatpush.msrb.mxu2 %v941_v11  ;;  %v186_v10 = vld [vmem:[%s5981_s1 + $0x508] sm:$0xff] }
  0xf1   :  { %v873_v14 = vld [vmem:[%s5981_s1 + $0x1a80] sm:$0xff]  ;;  %1399 = vmatpush.msra.mxu3 %v82_v12  ;;  %1329 = vmatpush.msrb.mxu0 %v809_v13  ;;  %v250_v11 = vld [vmem:[%s5981_s1 + $0x708] sm:$0xff] }
  0xf2   :  { %v937_v15 = vld [vmem:[%s5981_s1 + $0x1c80] sm:$0xff]  ;;  %1349 = vmatpush.msrb.mxu1 %v873_v14  ;;  %v30_v12 = vld [vmem:[%s5981_s1 + $0x28] sm:$0xff] }
  0xf3   :  { %v805_v17 = vld [vmem:[%s5981_s1 + $0x1860] sm:$0xff]  ;;  %1369 = vmatpush.msrb.mxu2 %v937_v15  ;;  %1400 = vmatpush.msra.mxu3 %v78_v16  ;;  %v118_v13 = vld [vmem:[%s5981_s1 + $0x2e8] sm:$0xff] }
  0xf4   :  { %v869_v18 = vld [vmem:[%s5981_s1 + $0x1a60] sm:$0xff]  ;;  %1330 = vmatpush.msrb.mxu0 %v805_v17  ;;  %v182_v14 = vld [vmem:[%s5981_s1 + $0x4e8] sm:$0xff] }
  0xf5   :  { %v933_v19 = vld [vmem:[%s5981_s1 + $0x1c60] sm:$0xff]  ;;  %1350 = vmatpush.msrb.mxu1 %v869_v18  ;;  %1401 = vmatpush.msra.mxu3 %v74_v20  ;;  %v246_v15 = vld [vmem:[%s5981_s1 + $0x6e8] sm:$0xff] }
  0xf6   :  { %v801_v21 = vld [vmem:[%s5981_s1 + $0x1840] sm:$0xff]  ;;  %1370 = vmatpush.msrb.mxu2 %v933_v19  ;;  %v26_v16 = vld [vmem:[%s5981_s1 + $0x8] sm:$0xff] }
  0xf7   :  { %v865_v22 = vld [vmem:[%s5981_s1 + $0x1a40] sm:$0xff]  ;;  %1331 = vmatpush.msrb.mxu0 %v801_v21  ;;  %1402 = vmatpush.msra.mxu3 %v70_v24  ;;  %v114_v17 = vld [vmem:[%s5981_s1 + $0x2c8] sm:$0xff] }
  0xf8   :  { %v929_v23 = vld [vmem:[%s5981_s1 + $0x1c40] sm:$0xff]  ;;  %1351 = vmatpush.msrb.mxu1 %v865_v22  ;;  %v178_v18 = vld [vmem:[%s5981_s1 + $0x4c8] sm:$0xff] }
  0xf9   :  { %v797_v25 = vld [vmem:[%s5981_s1 + $0x1820] sm:$0xff]  ;;  %1371 = vmatpush.msrb.mxu2 %v929_v23  ;;  %1403 = vmatpush.msra.mxu3 %v66_v28  ;;  %v242_v19 = vld [vmem:[%s5981_s1 + $0x6c8] sm:$0xff] }
  0xfa   :  { %v861_v26 = vld [vmem:[%s5981_s1 + $0x1a20] sm:$0xff]  ;;  %1332 = vmatpush.msrb.mxu0 %v797_v25  ;;  %v342_v20 = vld [vmem:[%s5981_s1 + $0x9e8] sm:$0xff] }
  0xfb   :  { %v925_v27 = vld [vmem:[%s5981_s1 + $0x1c20] sm:$0xff]  ;;  %1352 = vmatpush.msrb.mxu1 %v861_v26  ;;  %1404 = vmatpush.msra.mxu3 %v62_v34  ;;  %v110_v21 = vld [vmem:[%s5981_s1 + $0x2a8] sm:$0xff] }
  0xfc   :  { %v793_v29 = vld [vmem:[%s5981_s1 + $0x1800] sm:$0xff]  ;;  %1372 = vmatpush.msrb.mxu2 %v925_v27  ;;  %v174_v22 = vld [vmem:[%s5981_s1 + $0x4a8] sm:$0xff] }
  0xfd   :  { %v857_v30 = vld [vmem:[%s5981_s1 + $0x1a00] sm:$0xff]  ;;  %1333 = vmatpush.msrb.mxu0 %v793_v29  ;;  %1405 = vmatpush.msra.mxu3 %v58_v40  ;;  %v238_v23 = vld [vmem:[%s5981_s1 + $0x6a8] sm:$0xff] }
  0xfe   :  { %v921_v31 = vld [vmem:[%s5981_s1 + $0x1c00] sm:$0xff]  ;;  %1353 = vmatpush.msrb.mxu1 %v857_v30  ;;  %v338_v24 = vld [vmem:[%s5981_s1 + $0x9c8] sm:$0xff] }
  0xff   :  { %v1056_v32 = vld.sshfl [vmem:[#allocation1 + $0x20] sm:$0xff pattern:$0x73625140]  ;;  %1373 = vmatpush.msrb.mxu2 %v921_v31  ;;  %1418 = vmatpush.msra.mxu0 %v150_v35  ;;  %v106_v25 = vld [vmem:[%s5981_s1 + $0x288] sm:$0xff] }
 0x100   :  { %1334 = vmatmul.f32.vlgmr.msrb.gmra.mxu0 %v1056_v32  ;;  %1374 = vmatmul.f32.vlgmr.msrb.gmra.mxu2 %v1058_v33  ;;  %v170_v26 = vld [vmem:[%s5981_s1 + $0x488] sm:$0xff] }
 0x101   :  { %1438 = vmatpush.msra.mxu1 %v214_v36  ;;  %1458 = vmatpush.msra.mxu2 %v278_v37  ;;  %v234_v27 = vld [vmem:[%s5981_s1 + $0x688] sm:$0xff] }
 0x102   :  { %1354 = vmatmul.f32.vlgmr.msrb.gmra.mxu1 %v1057_v38  ;;  %1419 = vmatpush.msra.mxu0 %v146_v41  ;;  %v334_v28 = vld [vmem:[%s5981_s1 + $0x9a8] sm:$0xff] }
 0x103   :  { %1439 = vmatpush.msra.mxu1 %v210_v42  ;;  %1459 = vmatpush.msra.mxu2 %v274_v43  ;;  %v102_v29 = vld [vmem:[%s5981_s1 + $0x268] sm:$0xff] }
 0x104   :  { %1406 = vmatpush.msra.mxu3 %v54_v44  ;;  %1420 = vmatpush.msra.mxu0 %v142_v45  ;;  %v166_v30 = vld [vmem:[%s5981_s1 + $0x468] sm:$0xff] }
 0x105   :  { %1440 = vmatpush.msra.mxu1 %v206_v46  ;;  %1460 = vmatpush.msra.mxu2 %v270_v47  ;;  %v230_v31 = vld [vmem:[%s5981_s1 + $0x668] sm:$0xff] }
 0x106   :  { %1407 = vmatpush.msra.mxu3 %v50_v52  ;;  %1421 = vmatpush.msra.mxu0 %v138_v53  ;;  %v330_v32 = vld [vmem:[%s5981_s1 + $0x988] sm:$0xff] }
 0x107   :  { %1441 = vmatpush.msra.mxu1 %v202_v54  ;;  %1461 = vmatpush.msra.mxu2 %v266_v55  ;;  %v98_v33 = vld [vmem:[%s5981_s1 + $0x248] sm:$0xff] }
 0x108   :  { %1408 = vmatpush.msra.mxu3 %v46_v56  ;;  %1422 = vmatpush.msra.mxu0 %v134_v57  ;;  %v162_v34 = vld [vmem:[%s5981_s1 + $0x448] sm:$0xff] }
 0x109   :  { %1442 = vmatpush.msra.mxu1 %v198_v58  ;;  %1462 = vmatpush.msra.mxu2 %v262_v59  ;;  %v226_v35 = vld [vmem:[%s5981_s1 + $0x648] sm:$0xff] }
 0x10a   :  { %1409 = vmatpush.msra.mxu3 %v42_v60  ;;  %1423 = vmatpush.msra.mxu0 %v130_v61  ;;  %v326_v36 = vld [vmem:[%s5981_s1 + $0x968] sm:$0xff] }
 0x10b   :  { %1443 = vmatpush.msra.mxu1 %v194_v62  ;;  %1463 = vmatpush.msra.mxu2 %v258_v63  ;;  %v94_v37 = vld [vmem:[%s5981_s1 + $0x228] sm:$0xff] }
 0x10c   :  { %1410 = vmatpush.msra.mxu3 %v38_v4  ;;  %1424 = vmatpush.msra.mxu0 %v126_v5  ;;  %v158_v38 = vld [vmem:[%s5981_s1 + $0x428] sm:$0xff] }
 0x10d   :  { %1444 = vmatpush.msra.mxu1 %v190_v6  ;;  %1464 = vmatpush.msra.mxu2 %v254_v7  ;;  %v222_v39 = vld [vmem:[%s5981_s1 + $0x628] sm:$0xff] }
 0x10e   :  { %1411 = vmatpush.msra.mxu3 %v34_v8  ;;  %1425 = vmatpush.msra.mxu0 %v122_v9  ;;  %v322_v40 = vld [vmem:[%s5981_s1 + $0x948] sm:$0xff] }
 0x10f   :  { %1445 = vmatpush.msra.mxu1 %v186_v10  ;;  %1465 = vmatpush.msra.mxu2 %v250_v11  ;;  %v90_v41 = vld [vmem:[%s5981_s1 + $0x208] sm:$0xff] }
 0x110   :  { %1412 = vmatpush.msra.mxu3 %v30_v12  ;;  %1426 = vmatpush.msra.mxu0 %v118_v13  ;;  %v154_v42 = vld [vmem:[%s5981_s1 + $0x408] sm:$0xff] }
 0x111   :  { %1446 = vmatpush.msra.mxu1 %v182_v14  ;;  %1466 = vmatpush.msra.mxu2 %v246_v15  ;;  %v218_v43 = vld [vmem:[%s5981_s1 + $0x608] sm:$0xff] }
 0x112   :  { %1413 = vmatpush.msra.mxu3 %v26_v16  ;;  %1427 = vmatpush.msra.mxu0 %v114_v17  ;;  %v318_v44 = vld [vmem:[%s5981_s1 + $0x928] sm:$0xff] }
 0x113   :  { %1447 = vmatpush.msra.mxu1 %v178_v18  ;;  %1467 = vmatpush.msra.mxu2 %v242_v19  ;;  %v406_v45 = vld [vmem:[%s5981_s1 + $0xbe8] sm:$0xff] }
 0x114   :  { %1478 = vmatpush.msrb.mxu3 %v342_v20  ;;  %1428 = vmatpush.msra.mxu0 %v110_v21  ;;  %v470_v46 = vld [vmem:[%s5981_s1 + $0xde8] sm:$0xff] }
 0x115   :  { %1448 = vmatpush.msra.mxu1 %v174_v22  ;;  %1468 = vmatpush.msra.mxu2 %v238_v23  ;;  %v534_v47 = vld [vmem:[%s5981_s1 + $0xfe8] sm:$0xff] }
 0x116   :  { %1479 = vmatpush.msrb.mxu3 %v338_v24  ;;  %1429 = vmatpush.msra.mxu0 %v106_v25  ;;  %v314_v52 = vld [vmem:[%s5981_s1 + $0x908] sm:$0xff] }
 0x117   :  { %1449 = vmatpush.msra.mxu1 %v170_v26  ;;  %1469 = vmatpush.msra.mxu2 %v234_v27  ;;  %v402_v53 = vld [vmem:[%s5981_s1 + $0xbc8] sm:$0xff]  ;;  %v1025_v26 = vld [vmem:[%s5982_s2] sm:$0xf] }
 0x118   :  { %1480 = vmatpush.msrb.mxu3 %v334_v28  ;;  %1430 = vmatpush.msra.mxu0 %v102_v29  ;;  %v466_v54 = vld [vmem:[%s5981_s1 + $0xdc8] sm:$0xff] }
 0x119   :  { %1450 = vmatpush.msra.mxu1 %v166_v30  ;;  %1470 = vmatpush.msra.mxu2 %v230_v31  ;;  %v530_v55 = vld [vmem:[%s5981_s1 + $0xfc8] sm:$0xff] }
 0x11a   :  { %1481 = vmatpush.msrb.mxu3 %v330_v32  ;;  %1431 = vmatpush.msra.mxu0 %v98_v33  ;;  %v310_v56 = vld [vmem:[%s5981_s1 + $0x8e8] sm:$0xff]  ;;  %v1027_v32 = vperm.slane %v1025_v26, 0 }
 0x11b   :  { %1451 = vmatpush.msra.mxu1 %v162_v34  ;;  %1471 = vmatpush.msra.mxu2 %v226_v35  ;;  %v398_v57 = vld [vmem:[%s5981_s1 + $0xba8] sm:$0xff] }
 0x11c   :  { %1482 = vmatpush.msrb.mxu3 %v326_v36  ;;  %1432 = vmatpush.msra.mxu0 %v94_v37  ;;  %v462_v58 = vld [vmem:[%s5981_s1 + $0xda8] sm:$0xff] }
 0x11d   :  { %1452 = vmatpush.msra.mxu1 %v158_v38  ;;  %1472 = vmatpush.msra.mxu2 %v222_v39  ;;  %v526_v59 = vld [vmem:[%s5981_s1 + $0xfa8] sm:$0xff]  ;;  %v1095_v39 = vpop.f32.mrf.mxu0 }
 0x11e   :  { %1483 = vmatpush.msrb.mxu3 %v322_v40  ;;  %1433 = vmatpush.msra.mxu0 %v90_v41  ;;  %v306_v60 = vld [vmem:[%s5981_s1 + $0x8c8] sm:$0xff] }
 0x11f   :  { %1453 = vmatpush.msra.mxu1 %v154_v42  ;;  %1473 = vmatpush.msra.mxu2 %v218_v43  ;;  %v394_v61 = vld [vmem:[%s5981_s1 + $0xb88] sm:$0xff]  ;;  %v1096_v42 = vadd.f32 %v1095_v39, %v1027_v32  ;;  %v1115_v43 = vpop.f32.mrf.mxu1 }
 0x120   :  { %1484 = vmatpush.msrb.mxu3 %v318_v44  ;;  %1498 = vmatpush.msrb.mxu0 %v406_v45  ;;  %v458_v62 = vld [vmem:[%s5981_s1 + $0xd88] sm:$0xff] }
 0x121   :  { %1518 = vmatpush.msrb.mxu1 %v470_v46  ;;  %1538 = vmatpush.msrb.mxu2 %v534_v47  ;;  %v522_v63 = vld [vmem:[%s5981_s1 + $0xf88] sm:$0xff] }
 0x122   :  { %1485 = vmatpush.msrb.mxu3 %v314_v52  ;;  %1499 = vmatpush.msrb.mxu0 %v402_v53  ;;  %v302_v4 = vld [vmem:[%s5981_s1 + $0x8a8] sm:$0xff] }
 0x123   :  { %1519 = vmatpush.msrb.mxu1 %v466_v54  ;;  %1539 = vmatpush.msrb.mxu2 %v530_v55  ;;  %v390_v5 = vld [vmem:[%s5981_s1 + $0xb68] sm:$0xff]  ;;  %v1116_v54 = vadd.f32 %v1115_v43, %v1096_v42 }
 0x124   :  { %1486 = vmatpush.msrb.mxu3 %v310_v56  ;;  %1500 = vmatpush.msrb.mxu0 %v398_v57  ;;  %v454_v6 = vld [vmem:[%s5981_s1 + $0xd68] sm:$0xff] }
 0x125   :  { %1520 = vmatpush.msrb.mxu1 %v462_v58  ;;  %1540 = vmatpush.msrb.mxu2 %v526_v59  ;;  %v518_v7 = vld [vmem:[%s5981_s1 + $0xf68] sm:$0xff]  ;;  %v1135_v58 = vpop.f32.mrf.mxu2  ;;  %v1155_v59 = vpop.f32.mrf.mxu3 }
 0x126   :  { %1487 = vmatpush.msrb.mxu3 %v306_v60  ;;  %1501 = vmatpush.msrb.mxu0 %v394_v61  ;;  %v298_v8 = vld [vmem:[%s5981_s1 + $0x888] sm:$0xff] }
 0x127   :  { %1521 = vmatpush.msrb.mxu1 %v458_v62  ;;  %1541 = vmatpush.msrb.mxu2 %v522_v63  ;;  %v386_v9 = vld [vmem:[%s5981_s1 + $0xb48] sm:$0xff]  ;;  %v1136_v62 = vadd.f32 %v1135_v58, %v1116_v54 }
 0x128   :  { %1488 = vmatpush.msrb.mxu3 %v302_v4  ;;  %1502 = vmatpush.msrb.mxu0 %v390_v5  ;;  %v450_v10 = vld [vmem:[%s5981_s1 + $0xd48] sm:$0xff] }
 0x129   :  { %v514_v11 = vld [vmem:[%s5981_s1 + $0xf48] sm:$0xff]  ;;  %1522 = vmatpush.msrb.mxu1 %v454_v6  ;;  %1542 = vmatpush.msrb.mxu2 %v518_v7  ;;  %v1156_v6 = vadd.f32 %v1155_v59, %v1136_v62 }
 0x12a   :  { %v294_v12 = vld [vmem:[%s5981_s1 + $0x868] sm:$0xff]  ;;  %1489 = vmatpush.msrb.mxu3 %v298_v8  ;;  %1503 = vmatpush.msrb.mxu0 %v386_v9 }
 0x12b   :  { %v382_v13 = vld [vmem:[%s5981_s1 + $0xb28] sm:$0xff]  ;;  %1523 = vmatpush.msrb.mxu1 %v450_v10  ;;  %1543 = vmatpush.msrb.mxu2 %v514_v11  ;;  %v1175_v11 = vpop.f32.mrf.mxu0 }
 0x12c   :  { %v446_v14 = vld [vmem:[%s5981_s1 + $0xd28] sm:$0xff]  ;;  %1490 = vmatpush.msrb.mxu3 %v294_v12  ;;  %1504 = vmatpush.msrb.mxu0 %v382_v13 }
 0x12d   :  { %v510_v15 = vld [vmem:[%s5981_s1 + $0xf28] sm:$0xff]  ;;  %1524 = vmatpush.msrb.mxu1 %v446_v14  ;;  %1414 = vmatmul.f32.vlgmr.msra.gmra.mxu3 %v2974_v48  ;;  %v1176_v14 = vadd.f32 %v1175_v11, %v1156_v6 }
 0x12e   :  { %v290_v16 = vld [vmem:[%s5981_s1 + $0x848] sm:$0xff]  ;;  %1544 = vmatpush.msrb.mxu2 %v510_v15  ;;  %1434 = vmatmul.f32.vlgmr.msra.gmra.mxu0 %v2976_v49 }
 0x12f   :  { %v378_v17 = vld [vmem:[%s5981_s1 + $0xb08] sm:$0xff]  ;;  %1491 = vmatpush.msrb.mxu3 %v290_v16  ;;  %1474 = vmatmul.f32.vlgmr.msra.gmra.mxu2 %v2980_v51 }
 0x130   :  { %v442_v18 = vld [vmem:[%s5981_s1 + $0xd08] sm:$0xff]  ;;  %1505 = vmatpush.msrb.mxu0 %v378_v17  ;;  %1454 = vmatmul.f32.vlgmr.msra.gmra.mxu1 %v2978_v50 }
 0x131   :  { %v506_v19 = vld [vmem:[%s5981_s1 + $0xf08] sm:$0xff]  ;;  %1525 = vmatpush.msrb.mxu1 %v442_v18  ;;  %v1195_v18 = vpop.f32.mrf.mxu1 }
 0x132   :  { %v286_v20 = vld [vmem:[%s5981_s1 + $0x828] sm:$0xff]  ;;  %1545 = vmatpush.msrb.mxu2 %v506_v19 }
 0x133   :  { %v374_v21 = vld [vmem:[%s5981_s1 + $0xae8] sm:$0xff]  ;;  %1492 = vmatpush.msrb.mxu3 %v286_v20 }
 0x134   :  { %v438_v22 = vld [vmem:[%s5981_s1 + $0xce8] sm:$0xff]  ;;  %1506 = vmatpush.msrb.mxu0 %v374_v21  ;;  %v1196_v21 = vadd.f32 %v1195_v18, %v1176_v14 }
 0x135   :  { %v502_v23 = vld [vmem:[%s5981_s1 + $0xee8] sm:$0xff]  ;;  %1526 = vmatpush.msrb.mxu1 %v438_v22  ;;  %v1215_v22 = vpop.f32.mrf.mxu2 }
 0x136   :  { %v282_v24 = vld [vmem:[%s5981_s1 + $0x808] sm:$0xff]  ;;  %1546 = vmatpush.msrb.mxu2 %v502_v23  ;;  %v1216_v26 = vadd.f32 %v1215_v22, %v1196_v21 }
 0x137   :  { %v370_v25 = vld [vmem:[%s5981_s1 + $0xac8] sm:$0xff]  ;;  %1493 = vmatpush.msrb.mxu3 %v282_v24 }
 0x138   :  { %v434_v27 = vld [vmem:[%s5981_s1 + $0xcc8] sm:$0xff]  ;;  %1507 = vmatpush.msrb.mxu0 %v370_v25  ;;  %1494 = vmatmul.f32.vlgmr.msrb.gmra.mxu3 %v3020_v1 }
 0x139   :  { %v498_v28 = vld [vmem:[%s5981_s1 + $0xec8] sm:$0xff]  ;;  %1527 = vmatpush.msrb.mxu1 %v434_v27 }
 0x13a   :  { %v366_v29 = vld [vmem:[%s5981_s1 + $0xaa8] sm:$0xff]  ;;  %1547 = vmatpush.msrb.mxu2 %v498_v28  ;;  %v1235_v28 = vpop.f32.mrf.mxu3 }
 0x13b   :  { %v598_v30 = vld [vmem:[%s5981_s1 + $0x11e8] sm:$0xff]  ;;  %1508 = vmatpush.msrb.mxu0 %v366_v29 }
 0x13c   :  { %v430_v31 = vld [vmem:[%s5981_s1 + $0xca8] sm:$0xff]  ;;  %1558 = vmatpush.msra.mxu3 %v598_v30 }
 0x13d   :  { %v494_v33 = vld [vmem:[%s5981_s1 + $0xea8] sm:$0xff]  ;;  %1528 = vmatpush.msrb.mxu1 %v430_v31  ;;  %v3891_v31 = vadd.f32 %v1235_v28, %v1216_v26 }
 0x13e   :  { %v362_v34 = vld [vmem:[%s5981_s1 + $0xa88] sm:$0xff]  ;;  %1548 = vmatpush.msrb.mxu2 %v494_v33 }
 0x13f   :  { %v594_v35 = vld [vmem:[%s5981_s1 + $0x11c8] sm:$0xff]  ;;  %1509 = vmatpush.msrb.mxu0 %v362_v34 }
 0x140   :  { %v426_v36 = vld [vmem:[%s5981_s1 + $0xc88] sm:$0xff]  ;;  %1559 = vmatpush.msra.mxu3 %v594_v35 }
 0x141   :  { %v490_v37 = vld [vmem:[%s5981_s1 + $0xe88] sm:$0xff]  ;;  %1529 = vmatpush.msrb.mxu1 %v426_v36 }
 0x142   :  { %v358_v38 = vld [vmem:[%s5981_s1 + $0xa68] sm:$0xff]  ;;  %1549 = vmatpush.msrb.mxu2 %v490_v37 }
 0x143   :  { %v590_v40 = vld [vmem:[%s5981_s1 + $0x11a8] sm:$0xff]  ;;  %1510 = vmatpush.msrb.mxu0 %v358_v38 }
 0x144   :  { %v422_v41 = vld [vmem:[%s5981_s1 + $0xc68] sm:$0xff]  ;;  %1560 = vmatpush.msra.mxu3 %v590_v40 }
 0x145   :  { %v486_v44 = vld [vmem:[%s5981_s1 + $0xe68] sm:$0xff]  ;;  %1530 = vmatpush.msrb.mxu1 %v422_v41 }
 0x146   :  { %v354_v45 = vld [vmem:[%s5981_s1 + $0xa48] sm:$0xff]  ;;  %1550 = vmatpush.msrb.mxu2 %v486_v44 }
 0x147   :  { %v586_v46 = vld [vmem:[%s5981_s1 + $0x1188] sm:$0xff]  ;;  %1511 = vmatpush.msrb.mxu0 %v354_v45 }
 0x148   :  { %v418_v47 = vld [vmem:[%s5981_s1 + $0xc48] sm:$0xff]  ;;  %1561 = vmatpush.msra.mxu3 %v586_v46 }
 0x149   :  { %v482_v52 = vld [vmem:[%s5981_s1 + $0xe48] sm:$0xff]  ;;  %1531 = vmatpush.msrb.mxu1 %v418_v47 }
 0x14a   :  { %v350_v53 = vld [vmem:[%s5981_s1 + $0xa28] sm:$0xff]  ;;  %1551 = vmatpush.msrb.mxu2 %v482_v52 }
 0x14b   :  { %v582_v55 = vld [vmem:[%s5981_s1 + $0x1168] sm:$0xff]  ;;  %1512 = vmatpush.msrb.mxu0 %v350_v53 }
 0x14c   :  { %v414_v56 = vld [vmem:[%s5981_s1 + $0xc28] sm:$0xff]  ;;  %1562 = vmatpush.msra.mxu3 %v582_v55 }
 0x14d   :  { %v478_v57 = vld [vmem:[%s5981_s1 + $0xe28] sm:$0xff]  ;;  %1532 = vmatpush.msrb.mxu1 %v414_v56 }
 0x14e   :  { %v578_v60 = vld [vmem:[%s5981_s1 + $0x1148] sm:$0xff]  ;;  %1552 = vmatpush.msrb.mxu2 %v478_v57 }
 0x14f   :  { %v346_v61 = vld [vmem:[%s5981_s1 + $0xa08] sm:$0xff]  ;;  %1563 = vmatpush.msra.mxu3 %v578_v60 }
 0x150   :  { %v410_v63 = vld [vmem:[%s5981_s1 + $0xc08] sm:$0xff]  ;;  %1513 = vmatpush.msrb.mxu0 %v346_v61 }
 0x151   :  { %v474_v4 = vld [vmem:[%s5981_s1 + $0xe08] sm:$0xff]  ;;  %1533 = vmatpush.msrb.mxu1 %v410_v63  ;;  %1514 = vmatmul.f32.vlgmr.msrb.gmra.mxu0 %v3024_v3  ;;  %v2559_v63 = vld.sshfl [vmem:[#allocation1] sm:$0xff pattern:$0x73625140] }
 0x152   :  { %v574_v5 = vld [vmem:[%s5981_s1 + $0x1128] sm:$0xff]  ;;  %1553 = vmatpush.msrb.mxu2 %v474_v4  ;;  %1534 = vmatmul.f32.vlgmr.msrb.gmra.mxu1 %v3018_v0 }
 0x153   :  { %v662_v7 = vld [vmem:[%s5981_s1 + $0x13e8] sm:$0xff]  ;;  %1564 = vmatpush.msra.mxu3 %v574_v5  ;;  %1554 = vmatmul.f32.vlgmr.msrb.gmra.mxu2 %v3022_v2 }
 0x154   :  { %v726_v8 = vld [vmem:[%s5981_s1 + $0x15e8] sm:$0xff]  ;;  %1578 = vmatpush.msra.mxu0 %v662_v7 }
 0x155   :  { %v790_v9 = vld [vmem:[%s5981_s1 + $0x17e8] sm:$0xff]  ;;  %1598 = vmatpush.msra.mxu1 %v726_v8  ;;  %v1255_v8 = vpop.f32.mrf.mxu0 }
 0x156   :  { %v570_v10 = vld [vmem:[%s5981_s1 + $0x1108] sm:$0xff]  ;;  %1618 = vmatpush.msra.mxu2 %v790_v9  ;;  %v1256_v11 = vadd.f32 %v1255_v8, %v3891_v31 }
 0x157   :  { %v658_v12 = vld [vmem:[%s5981_s1 + $0x13c8] sm:$0xff]  ;;  %1565 = vmatpush.msra.mxu3 %v570_v10 }
 0x158   :  { %v722_v13 = vld [vmem:[%s5981_s1 + $0x15c8] sm:$0xff]  ;;  %1579 = vmatpush.msra.mxu0 %v658_v12 }
 0x159   :  { %v786_v15 = vld [vmem:[%s5981_s1 + $0x17c8] sm:$0xff]  ;;  %1599 = vmatpush.msra.mxu1 %v722_v13 }
 0x15a   :  { %v566_v16 = vld [vmem:[%s5981_s1 + $0x10e8] sm:$0xff]  ;;  %1619 = vmatpush.msra.mxu2 %v786_v15 }
 0x15b   :  { %v654_v17 = vld [vmem:[%s5981_s1 + $0x13a8] sm:$0xff]  ;;  %1566 = vmatpush.msra.mxu3 %v566_v16  ;;  %v1275_v16 = vpop.f32.mrf.mxu1 }
 0x15c   :  { %v718_v19 = vld [vmem:[%s5981_s1 + $0x15a8] sm:$0xff]  ;;  %1580 = vmatpush.msra.mxu0 %v654_v17  ;;  %v1276_v21 = vadd.f32 %v1275_v16, %v1256_v11 }
 0x15d   :  { %v782_v20 = vld [vmem:[%s5981_s1 + $0x17a8] sm:$0xff]  ;;  %1600 = vmatpush.msra.mxu1 %v718_v19 }
 0x15e   :  { %v562_v23 = vld [vmem:[%s5981_s1 + $0x10c8] sm:$0xff]  ;;  %1620 = vmatpush.msra.mxu2 %v782_v20 }
 0x15f   :  { %v650_v24 = vld [vmem:[%s5981_s1 + $0x1388] sm:$0xff]  ;;  %1567 = vmatpush.msra.mxu3 %v562_v23 }
 0x160   :  { %v714_v25 = vld [vmem:[%s5981_s1 + $0x1588] sm:$0xff]  ;;  %1581 = vmatpush.msra.mxu0 %v650_v24  ;;  %v1295_v24 = vpop.f32.mrf.mxu2 }
 0x161   :  { %v778_v27 = vld [vmem:[%s5981_s1 + $0x1788] sm:$0xff]  ;;  %1601 = vmatpush.msra.mxu1 %v714_v25 }
 0x162   :  { %v558_v29 = vld [vmem:[%s5981_s1 + $0x10a8] sm:$0xff]  ;;  %1621 = vmatpush.msra.mxu2 %v778_v27  ;;  %v1296_v27 = vadd.f32 %v1295_v24, %v1276_v21  ;;  %v83_v21 = vld [vmem:[%s5981_s1 + $0x1d0] sm:$0xff] }
 0x163   :  { %v646_v30 = vld [vmem:[%s5981_s1 + $0x1368] sm:$0xff]  ;;  %1568 = vmatpush.msra.mxu3 %v558_v29 }
 0x164   :  { %v710_v32 = vld [vmem:[%s5981_s1 + $0x1568] sm:$0xff]  ;;  %1582 = vmatpush.msra.mxu0 %v646_v30  ;;  %v1315_v30 = vpop.f32.mrf.mxu3 }
 0x165   :  { %v774_v33 = vld [vmem:[%s5981_s1 + $0x1768] sm:$0xff]  ;;  %1602 = vmatpush.msra.mxu1 %v710_v32 }
 0x166   :  { %v554_v34 = vld [vmem:[%s5981_s1 + $0x1088] sm:$0xff]  ;;  %1622 = vmatpush.msra.mxu2 %v774_v33  ;;  %v4042_v33 = vadd.f32 %v1315_v30, %v1296_v27  ;;  %v147_v27 = vld [vmem:[%s5981_s1 + $0x3d0] sm:$0xff] }
 0x167   :  { %v642_v35 = vld [vmem:[%s5981_s1 + $0x1348] sm:$0xff]  ;;  %1569 = vmatpush.msra.mxu3 %v554_v34 }
 0x168   :  { %v706_v36 = vld [vmem:[%s5981_s1 + $0x1548] sm:$0xff]  ;;  %1583 = vmatpush.msra.mxu0 %v642_v35 }
 0x169   :  { %v770_v37 = vld [vmem:[%s5981_s1 + $0x1748] sm:$0xff]  ;;  %1603 = vmatpush.msra.mxu1 %v706_v36  ;;  %v2561_v36 = vld.sshfl [vmem:[#allocation1 + $0x18] sm:$0xff pattern:$0x73625140] }
 0x16a   :  { %v550_v38 = vld [vmem:[%s5981_s1 + $0x1068] sm:$0xff]  ;;  %1623 = vmatpush.msra.mxu2 %v770_v37 }
 0x16b   :  { %v638_v39 = vld [vmem:[%s5981_s1 + $0x1328] sm:$0xff]  ;;  %1570 = vmatpush.msra.mxu3 %v550_v38 }
 0x16c   :  { %v702_v40 = vld [vmem:[%s5981_s1 + $0x1528] sm:$0xff]  ;;  %1584 = vmatpush.msra.mxu0 %v638_v39 }
 0x16d   :  { %v766_v41 = vld [vmem:[%s5981_s1 + $0x1728] sm:$0xff]  ;;  %1604 = vmatpush.msra.mxu1 %v702_v40 }
 0x16e   :  { %v546_v42 = vld [vmem:[%s5981_s1 + $0x1048] sm:$0xff]  ;;  %1624 = vmatpush.msra.mxu2 %v766_v41  ;;  %v2562_v41 = vld.sshfl [vmem:[#allocation1 + $0x10] sm:$0xff pattern:$0x73625140] }
 0x16f   :  { %v634_v43 = vld [vmem:[%s5981_s1 + $0x1308] sm:$0xff]  ;;  %1571 = vmatpush.msra.mxu3 %v546_v42 }
 0x170   :  { %v698_v44 = vld [vmem:[%s5981_s1 + $0x1508] sm:$0xff]  ;;  %1585 = vmatpush.msra.mxu0 %v634_v43 }
 0x171   :  { %v762_v45 = vld [vmem:[%s5981_s1 + $0x1708] sm:$0xff]  ;;  %1605 = vmatpush.msra.mxu1 %v698_v44 }
 0x172   :  { %v542_v46 = vld [vmem:[%s5981_s1 + $0x1028] sm:$0xff]  ;;  %1625 = vmatpush.msra.mxu2 %v762_v45 }
 0x173   :  { %v630_v47 = vld [vmem:[%s5981_s1 + $0x12e8] sm:$0xff]  ;;  %1572 = vmatpush.msra.mxu3 %v542_v46 }
 0x174   :  { %v694_v52 = vld [vmem:[%s5981_s1 + $0x14e8] sm:$0xff]  ;;  %1586 = vmatpush.msra.mxu0 %v630_v47 }
 0x175   :  { %v758_v53 = vld [vmem:[%s5981_s1 + $0x16e8] sm:$0xff]  ;;  %1606 = vmatpush.msra.mxu1 %v694_v52 }
 0x176   :  { %v538_v54 = vld [vmem:[%s5981_s1 + $0x1008] sm:$0xff]  ;;  %1626 = vmatpush.msra.mxu2 %v758_v53 }
 0x177   :  { %v626_v55 = vld [vmem:[%s5981_s1 + $0x12c8] sm:$0xff]  ;;  %1573 = vmatpush.msra.mxu3 %v538_v54 }
 0x178   :  { %v690_v56 = vld [vmem:[%s5981_s1 + $0x14c8] sm:$0xff]  ;;  %1587 = vmatpush.msra.mxu0 %v626_v55  ;;  %1574 = vmatmul.f32.vlgmr.msra.gmra.mxu3 %v2559_v63 }
 0x179   :  { %v754_v57 = vld [vmem:[%s5981_s1 + $0x16c8] sm:$0xff]  ;;  %1607 = vmatpush.msra.mxu1 %v690_v56 }
 0x17a   :  { %v622_v58 = vld [vmem:[%s5981_s1 + $0x12a8] sm:$0xff]  ;;  %1627 = vmatpush.msra.mxu2 %v754_v57 }
 0x17b   :  { %v854_v59 = vld [vmem:[%s5981_s1 + $0x19e8] sm:$0xff]  ;;  %1588 = vmatpush.msra.mxu0 %v622_v58 }
 0x17c   :  { %v686_v60 = vld [vmem:[%s5981_s1 + $0x14a8] sm:$0xff]  ;;  %1638 = vmatpush.msrb.mxu3 %v854_v59 }
 0x17d   :  { %v750_v61 = vld [vmem:[%s5981_s1 + $0x16a8] sm:$0xff]  ;;  %1608 = vmatpush.msra.mxu1 %v686_v60 }
 0x17e   :  { %v618_v62 = vld [vmem:[%s5981_s1 + $0x1288] sm:$0xff]  ;;  %1628 = vmatpush.msra.mxu2 %v750_v61 }
 0x17f   :  { %v850_v4 = vld [vmem:[%s5981_s1 + $0x19c8] sm:$0xff]  ;;  %1589 = vmatpush.msra.mxu0 %v618_v62 }
 0x180   :  { %v682_v5 = vld [vmem:[%s5981_s1 + $0x1488] sm:$0xff]  ;;  %1639 = vmatpush.msrb.mxu3 %v850_v4 }
 0x181   :  { %v746_v6 = vld [vmem:[%s5981_s1 + $0x1688] sm:$0xff]  ;;  %1609 = vmatpush.msra.mxu1 %v682_v5 }
 0x182   :  { %v614_v7 = vld [vmem:[%s5981_s1 + $0x1268] sm:$0xff]  ;;  %1629 = vmatpush.msra.mxu2 %v746_v6 }
 0x183   :  { %v846_v9 = vld [vmem:[%s5981_s1 + $0x19a8] sm:$0xff]  ;;  %1590 = vmatpush.msra.mxu0 %v614_v7 }
 0x184   :  { %v678_v10 = vld [vmem:[%s5981_s1 + $0x1468] sm:$0xff]  ;;  %1640 = vmatpush.msrb.mxu3 %v846_v9 }
 0x185   :  { %v742_v12 = vld [vmem:[%s5981_s1 + $0x1668] sm:$0xff]  ;;  %1610 = vmatpush.msra.mxu1 %v678_v10 }
 0x186   :  { %v610_v13 = vld [vmem:[%s5981_s1 + $0x1248] sm:$0xff]  ;;  %1630 = vmatpush.msra.mxu2 %v742_v12 }
 0x187   :  { %v842_v14 = vld [vmem:[%s5981_s1 + $0x1988] sm:$0xff]  ;;  %1591 = vmatpush.msra.mxu0 %v610_v13 }
 0x188   :  { %v674_v15 = vld [vmem:[%s5981_s1 + $0x1448] sm:$0xff]  ;;  %1641 = vmatpush.msrb.mxu3 %v842_v14 }
 0x189   :  { %v738_v17 = vld [vmem:[%s5981_s1 + $0x1648] sm:$0xff]  ;;  %1611 = vmatpush.msra.mxu1 %v674_v15 }
 0x18a   :  { %v606_v18 = vld [vmem:[%s5981_s1 + $0x1228] sm:$0xff]  ;;  %1631 = vmatpush.msra.mxu2 %v738_v17 }
 0x18b   :  { %v838_v19 = vld [vmem:[%s5981_s1 + $0x1968] sm:$0xff]  ;;  %1592 = vmatpush.msra.mxu0 %v606_v18  ;;  %v87_v18 = vld [vmem:[%s5981_s1 + $0x1f0] sm:$0xff] }
 0x18c   :  { %v670_v20 = vld [vmem:[%s5981_s1 + $0x1428] sm:$0xff]  ;;  %1642 = vmatpush.msrb.mxu3 %v838_v19 }
 0x18d   :  { %v734_v22 = vld [vmem:[%s5981_s1 + $0x1628] sm:$0xff]  ;;  %1612 = vmatpush.msra.mxu1 %v670_v20 }
 0x18e   :  { %v602_v23 = vld [vmem:[%s5981_s1 + $0x1208] sm:$0xff]  ;;  %1632 = vmatpush.msra.mxu2 %v734_v22  ;;  %v151_v22 = vld [vmem:[%s5981_s1 + $0x3f0] sm:$0xff] }
 0x18f   :  { %v834_v25 = vld [vmem:[%s5981_s1 + $0x1948] sm:$0xff]  ;;  %1593 = vmatpush.msra.mxu0 %v602_v23  ;;  %v2563_v23 = vld.sshfl [vmem:[#allocation1 + $0x20] sm:$0xff pattern:$0x73625140] }
 0x190   :  { %v666_v26 = vld [vmem:[%s5981_s1 + $0x1408] sm:$0xff]  ;;  %1643 = vmatpush.msrb.mxu3 %v834_v25 }
 0x191   :  { %v730_v28 = vld [vmem:[%s5981_s1 + $0x1608] sm:$0xff]  ;;  %1613 = vmatpush.msra.mxu1 %v666_v26  ;;  %v79_v26 = vld [vmem:[%s5981_s1 + $0x1b0] sm:$0xff] }
 0x192   :  { %v830_v29 = vld [vmem:[%s5981_s1 + $0x1928] sm:$0xff]  ;;  %1633 = vmatpush.msra.mxu2 %v730_v28  ;;  %1614 = vmatmul.f32.vlgmr.msra.gmra.mxu1 %v2562_v41  ;;  %v1335_v28 = vpop.f32.mrf.mxu0 }
 0x193   :  { %v918_v31 = vld [vmem:[%s5981_s1 + $0x1be8] sm:$0xff]  ;;  %1634 = vmatmul.f32.vlgmr.msra.gmra.mxu2 %v2561_v36  ;;  %1644 = vmatpush.msrb.mxu3 %v830_v29 }
 0x194   :  { %v982_v32 = vld [vmem:[%s5981_s1 + $0x1de8] sm:$0xff]  ;;  %1658 = vmatpush.msrb.mxu0 %v918_v31  ;;  %v1336_v31 = vadd.f32 %v1335_v28, %v4042_v33  ;;  %v187_v28 = vld [vmem:[%s5981_s1 + $0x510] sm:$0xff] }
 0x195   :  { %v4044_v34 = vld.sshfl [vmem:[#allocation1 + $0x8] sm:$0xff pattern:$0x73625140]  ;;  %1678 = vmatpush.msrb.mxu1 %v982_v32  ;;  %v75_v32 = vld [vmem:[%s5981_s1 + $0x190] sm:$0xff] }
 0x196   :  { %1594 = vmatmul.f32.vlgmr.msra.gmra.mxu0 %v4044_v34  ;;  %v1022_v35 = vld [vmem:[%s5981_s1 + $0x1f28] sm:$0xff] }
 0x197   :  { %v826_v37 = vld [vmem:[%s5981_s1 + $0x1908] sm:$0xff]  ;;  %1704 = vmatpush.msrb.mxu2 %v1022_v35  ;;  %v143_v35 = vld [vmem:[%s5981_s1 + $0x3b0] sm:$0xff] }
 0x198   :  { %v914_v38 = vld [vmem:[%s5981_s1 + $0x1bc8] sm:$0xff]  ;;  %1645 = vmatpush.msrb.mxu3 %v826_v37  ;;  %v1355_v37 = vpop.f32.mrf.mxu1 }
 0x199   :  { %v978_v39 = vld [vmem:[%s5981_s1 + $0x1dc8] sm:$0xff]  ;;  %1659 = vmatpush.msrb.mxu0 %v914_v38  ;;  %v71_v38 = vld [vmem:[%s5981_s1 + $0x170] sm:$0xff] }
 0x19a   :  { %v1018_v40 = vld [vmem:[%s5981_s1 + $0x1f08] sm:$0xff]  ;;  %1679 = vmatpush.msrb.mxu1 %v978_v39  ;;  %v139_v39 = vld [vmem:[%s5981_s1 + $0x390] sm:$0xff] }
 0x19b   :  { %v822_v42 = vld [vmem:[%s5981_s1 + $0x18e8] sm:$0xff]  ;;  %1705 = vmatpush.msrb.mxu2 %v1018_v40 }
 0x19c   :  { %v910_v43 = vld [vmem:[%s5981_s1 + $0x1ba8] sm:$0xff]  ;;  %1646 = vmatpush.msrb.mxu3 %v822_v42  ;;  %v1356_v42 = vadd.f32 %v1355_v37, %v1336_v31  ;;  %v99_v31 = vld [vmem:[%s5981_s1 + $0x250] sm:$0xff] }
 0x19d   :  { %v974_v44 = vld [vmem:[%s5981_s1 + $0x1da8] sm:$0xff]  ;;  %1660 = vmatpush.msrb.mxu0 %v910_v43  ;;  %v135_v43 = vld [vmem:[%s5981_s1 + $0x370] sm:$0xff] }
 0x19e   :  { %v1014_v45 = vld [vmem:[%s5981_s1 + $0x1ee8] sm:$0xff]  ;;  %1680 = vmatpush.msrb.mxu1 %v974_v44  ;;  %v1375_v44 = vpop.f32.mrf.mxu2  ;;  %v179_v37 = vld [vmem:[%s5981_s1 + $0x4d0] sm:$0xff] }
 0x19f   :  { %v818_v46 = vld [vmem:[%s5981_s1 + $0x18c8] sm:$0xff]  ;;  %1706 = vmatpush.msrb.mxu2 %v1014_v45  ;;  %v67_v45 = vld [vmem:[%s5981_s1 + $0x150] sm:$0xff] }
 0x1a0   :  { %v906_v47 = vld [vmem:[%s5981_s1 + $0x1b88] sm:$0xff]  ;;  %1647 = vmatpush.msrb.mxu3 %v818_v46 }
 0x1a1   :  { %v970_v52 = vld [vmem:[%s5981_s1 + $0x1d88] sm:$0xff]  ;;  %1661 = vmatpush.msrb.mxu0 %v906_v47  ;;  %v1376_v47 = vadd.f32 %v1375_v44, %v1356_v42  ;;  %v239_v42 = vld [vmem:[%s5981_s1 + $0x6b0] sm:$0xff] }
 0x1a2   :  { %v1010_v53 = vld [vmem:[%s5981_s1 + $0x1ec8] sm:$0xff]  ;;  %1681 = vmatpush.msrb.mxu1 %v970_v52  ;;  %v407_v44 = vld [vmem:[%s5981_s1 + $0xbf0] sm:$0xff] }
 0x1a3   :  { %v814_v54 = vld [vmem:[%s5981_s1 + $0x18a8] sm:$0xff]  ;;  %1707 = vmatpush.msrb.mxu2 %v1010_v53  ;;  %v2564_v53 = vld.sshfl [vmem:[#allocation1 + $0x38] sm:$0xff pattern:$0x73625140] }
 0x1a4   :  { %v902_v55 = vld [vmem:[%s5981_s1 + $0x1b68] sm:$0xff]  ;;  %1648 = vmatpush.msrb.mxu3 %v814_v54  ;;  %v63_v54 = vld [vmem:[%s5981_s1 + $0x130] sm:$0xff] }
 0x1a5   :  { %v966_v56 = vld [vmem:[%s5981_s1 + $0x1d68] sm:$0xff]  ;;  %1662 = vmatpush.msrb.mxu0 %v902_v55  ;;  %v131_v55 = vld [vmem:[%s5981_s1 + $0x350] sm:$0xff] }
 0x1a6   :  { %v1006_v57 = vld [vmem:[%s5981_s1 + $0x1ea8] sm:$0xff]  ;;  %1682 = vmatpush.msrb.mxu1 %v966_v56  ;;  %v1395_v56 = vpop.f32.mrf.mxu3 }
 0x1a7   :  { %v810_v58 = vld [vmem:[%s5981_s1 + $0x1888] sm:$0xff]  ;;  %1708 = vmatpush.msrb.mxu2 %v1006_v57  ;;  %v215_v57 = vld [vmem:[%s5981_s1 + $0x5f0] sm:$0xff] }
 0x1a8   :  { %v898_v59 = vld [vmem:[%s5981_s1 + $0x1b48] sm:$0xff]  ;;  %1649 = vmatpush.msrb.mxu3 %v810_v58  ;;  %v279_v58 = vld [vmem:[%s5981_s1 + $0x7f0] sm:$0xff] }
 0x1a9   :  { %v962_v60 = vld [vmem:[%s5981_s1 + $0x1d48] sm:$0xff]  ;;  %1663 = vmatpush.msrb.mxu0 %v898_v59  ;;  %v4241_v59 = vadd.f32 %v1395_v56, %v1376_v47  ;;  %v335_v47 = vld [vmem:[%s5981_s1 + $0x9b0] sm:$0xff] }
 0x1aa   :  { %v1002_v61 = vld [vmem:[%s5981_s1 + $0x1e88] sm:$0xff]  ;;  %1683 = vmatpush.msrb.mxu1 %v962_v60  ;;  %v399_v56 = vld [vmem:[%s5981_s1 + $0xbb0] sm:$0xff] }
 0x1ab   :  { %v806_v62 = vld [vmem:[%s5981_s1 + $0x1868] sm:$0xff]  ;;  %1709 = vmatpush.msrb.mxu2 %v1002_v61  ;;  %v59_v61 = vld [vmem:[%s5981_s1 + $0x110] sm:$0xff] }
 0x1ac   :  { %v894_v63 = vld [vmem:[%s5981_s1 + $0x1b28] sm:$0xff]  ;;  %1650 = vmatpush.msrb.mxu3 %v806_v62  ;;  %v127_v62 = vld [vmem:[%s5981_s1 + $0x330] sm:$0xff] }
 0x1ad   :  { %v958_v4 = vld [vmem:[%s5981_s1 + $0x1d28] sm:$0xff]  ;;  %1664 = vmatpush.msrb.mxu0 %v894_v63  ;;  %v211_v63 = vld [vmem:[%s5981_s1 + $0x5d0] sm:$0xff] }
 0x1ae   :  { %v998_v5 = vld [vmem:[%s5981_s1 + $0x1e68] sm:$0xff]  ;;  %1684 = vmatpush.msrb.mxu1 %v958_v4  ;;  %v275_v4 = vld [vmem:[%s5981_s1 + $0x7d0] sm:$0xff] }
 0x1af   :  { %v802_v6 = vld [vmem:[%s5981_s1 + $0x1848] sm:$0xff]  ;;  %1710 = vmatpush.msrb.mxu2 %v998_v5  ;;  %v55_v5 = vld [vmem:[%s5981_s1 + $0xf0] sm:$0xff] }
 0x1b0   :  { %v890_v7 = vld [vmem:[%s5981_s1 + $0x1b08] sm:$0xff]  ;;  %1651 = vmatpush.msrb.mxu3 %v802_v6  ;;  %v2566_v6 = vld.sshfl [vmem:[#allocation1 + $0x30] sm:$0xff pattern:$0x73625140] }
 0x1b1   :  { %v954_v8 = vld [vmem:[%s5981_s1 + $0x1d08] sm:$0xff]  ;;  %1665 = vmatpush.msrb.mxu0 %v890_v7  ;;  %v123_v7 = vld [vmem:[%s5981_s1 + $0x310] sm:$0xff] }
 0x1b2   :  { %v994_v9 = vld [vmem:[%s5981_s1 + $0x1e48] sm:$0xff]  ;;  %1685 = vmatpush.msrb.mxu1 %v954_v8  ;;  %v207_v8 = vld [vmem:[%s5981_s1 + $0x5b0] sm:$0xff] }
 0x1b3   :  { %v798_v10 = vld [vmem:[%s5981_s1 + $0x1828] sm:$0xff]  ;;  %1711 = vmatpush.msrb.mxu2 %v994_v9  ;;  %v271_v9 = vld [vmem:[%s5981_s1 + $0x7b0] sm:$0xff] }
 0x1b4   :  { %v886_v11 = vld [vmem:[%s5981_s1 + $0x1ae8] sm:$0xff]  ;;  %1652 = vmatpush.msrb.mxu3 %v798_v10  ;;  %v51_v10 = vld [vmem:[%s5981_s1 + $0xd0] sm:$0xff] }
 0x1b5   :  { %v950_v12 = vld [vmem:[%s5981_s1 + $0x1ce8] sm:$0xff]  ;;  %1666 = vmatpush.msrb.mxu0 %v886_v11  ;;  %v119_v11 = vld [vmem:[%s5981_s1 + $0x2f0] sm:$0xff] }
 0x1b6   :  { %v990_v13 = vld [vmem:[%s5981_s1 + $0x1e28] sm:$0xff]  ;;  %1686 = vmatpush.msrb.mxu1 %v950_v12  ;;  %v203_v12 = vld [vmem:[%s5981_s1 + $0x590] sm:$0xff] }
 0x1b7   :  { %v794_v14 = vld [vmem:[%s5981_s1 + $0x1808] sm:$0xff]  ;;  %1712 = vmatpush.msrb.mxu2 %v990_v13  ;;  %v267_v13 = vld [vmem:[%s5981_s1 + $0x790] sm:$0xff] }
 0x1b8   :  { %v882_v15 = vld [vmem:[%s5981_s1 + $0x1ac8] sm:$0xff]  ;;  %1653 = vmatpush.msrb.mxu3 %v794_v14  ;;  %v47_v14 = vld [vmem:[%s5981_s1 + $0xb0] sm:$0xff] }
 0x1b9   :  { %v946_v16 = vld [vmem:[%s5981_s1 + $0x1cc8] sm:$0xff]  ;;  %1667 = vmatpush.msrb.mxu0 %v882_v15  ;;  %1654 = vmatmul.f32.vlgmr.msrb.gmra.mxu3 %v2563_v23  ;;  %v115_v15 = vld [vmem:[%s5981_s1 + $0x2d0] sm:$0xff] }
 0x1ba   :  { %v986_v17 = vld [vmem:[%s5981_s1 + $0x1e08] sm:$0xff]  ;;  %1687 = vmatpush.msrb.mxu1 %v946_v16  ;;  %1738 = vmatpush.msra.mxu3 %v151_v22  ;;  %v199_v16 = vld [vmem:[%s5981_s1 + $0x570] sm:$0xff] }
 0x1bb   :  { %v878_v19 = vld [vmem:[%s5981_s1 + $0x1aa8] sm:$0xff]  ;;  %1713 = vmatpush.msrb.mxu2 %v986_v17  ;;  %v263_v17 = vld [vmem:[%s5981_s1 + $0x770] sm:$0xff] }
 0x1bc   :  { %v942_v20 = vld [vmem:[%s5981_s1 + $0x1ca8] sm:$0xff]  ;;  %1668 = vmatpush.msrb.mxu0 %v878_v19  ;;  %1739 = vmatpush.msra.mxu3 %v147_v27  ;;  %v111_v19 = vld [vmem:[%s5981_s1 + $0x2b0] sm:$0xff] }
 0x1bd   :  { %1718 = vmatpush.msra.mxu2 %v87_v18  ;;  %v874_v24 = vld [vmem:[%s5981_s1 + $0x1a88] sm:$0xff]  ;;  %1688 = vmatpush.msrb.mxu1 %v942_v20  ;;  %v43_v18 = vld [vmem:[%s5981_s1 + $0x90] sm:$0xff] }
 0x1be   :  { %v938_v25 = vld [vmem:[%s5981_s1 + $0x1c88] sm:$0xff]  ;;  %1669 = vmatpush.msrb.mxu0 %v874_v24  ;;  %1740 = vmatpush.msra.mxu3 %v143_v35  ;;  %v195_v20 = vld [vmem:[%s5981_s1 + $0x550] sm:$0xff] }
 0x1bf   :  { %1719 = vmatpush.msra.mxu2 %v83_v21  ;;  %v870_v29 = vld [vmem:[%s5981_s1 + $0x1a68] sm:$0xff]  ;;  %1689 = vmatpush.msrb.mxu1 %v938_v25  ;;  %v259_v21 = vld [vmem:[%s5981_s1 + $0x750] sm:$0xff] }
 0x1c0   :  { %v934_v30 = vld [vmem:[%s5981_s1 + $0x1c68] sm:$0xff]  ;;  %1670 = vmatpush.msrb.mxu0 %v870_v29  ;;  %1741 = vmatpush.msra.mxu3 %v139_v39  ;;  %v39_v22 = vld [vmem:[%s5981_s1 + $0x70] sm:$0xff] }
 0x1c1   :  { %1720 = vmatpush.msra.mxu2 %v79_v26  ;;  %v866_v36 = vld [vmem:[%s5981_s1 + $0x1a48] sm:$0xff]  ;;  %1690 = vmatpush.msrb.mxu1 %v934_v30  ;;  %v107_v23 = vld [vmem:[%s5981_s1 + $0x290] sm:$0xff] }
 0x1c2   :  { %v930_v33 = vld [vmem:[%s5981_s1 + $0x1c48] sm:$0xff]  ;;  %1671 = vmatpush.msrb.mxu0 %v866_v36  ;;  %2548 = vmatmul.msk.f32.vlgmr.msrb.gmra.mxu2 %vm1075_vm0, %v2564_v53  ;;  %v191_v24 = vld [vmem:[%s5981_s1 + $0x530] sm:$0xff] }
 0x1c3   :  { %1721 = vmatpush.msra.mxu2 %v75_v32  ;;  %v862_v40 = vld [vmem:[%s5981_s1 + $0x1a28] sm:$0xff]  ;;  %1691 = vmatpush.msrb.mxu1 %v930_v33  ;;  %v255_v25 = vld [vmem:[%s5981_s1 + $0x730] sm:$0xff] }
 0x1c4   :  { %v926_v41 = vld [vmem:[%s5981_s1 + $0x1c28] sm:$0xff]  ;;  %1672 = vmatpush.msrb.mxu0 %v862_v40  ;;  %1742 = vmatpush.msra.mxu3 %v135_v43  ;;  %v35_v26 = vld [vmem:[%s5981_s1 + $0x50] sm:$0xff] }
 0x1c5   :  { %1722 = vmatpush.msra.mxu2 %v71_v38  ;;  %v858_v46 = vld [vmem:[%s5981_s1 + $0x1a08] sm:$0xff]  ;;  %1692 = vmatpush.msrb.mxu1 %v926_v41  ;;  %v103_v27 = vld [vmem:[%s5981_s1 + $0x270] sm:$0xff] }
 0x1c6   :  { %v922_v52 = vld [vmem:[%s5981_s1 + $0x1c08] sm:$0xff]  ;;  %1673 = vmatpush.msrb.mxu0 %v858_v46  ;;  %1743 = vmatpush.msra.mxu3 %v131_v55  ;;  %v251_v29 = vld [vmem:[%s5981_s1 + $0x710] sm:$0xff] }
 0x1c7   :  { %1723 = vmatpush.msra.mxu2 %v67_v45  ;;  %1693 = vmatpush.msrb.mxu1 %v922_v52  ;;  %v4243_v60 = vld.sshfl [vmem:[#allocation1 + $0x28] sm:$0xff pattern:$0x73625140]  ;;  %v31_v30 = vld [vmem:[%s5981_s1 + $0x30] sm:$0xff] }
 0x1c8   :  { %1674 = vmatmul.f32.vlgmr.msrb.gmra.mxu0 %v4243_v60  ;;  %1694 = vmatmul.f32.vlgmr.msrb.gmra.mxu1 %v2566_v6  ;;  %v183_v32 = vld [vmem:[%s5981_s1 + $0x4f0] sm:$0xff] }
 0x1c9   :  { %1724 = vmatpush.msra.mxu2 %v63_v54  ;;  %1758 = vmatpush.msra.mxu0 %v215_v57  ;;  %v247_v35 = vld [vmem:[%s5981_s1 + $0x6f0] sm:$0xff] }
 0x1ca   :  { %1778 = vmatpush.msra.mxu1 %v279_v58  ;;  %1744 = vmatpush.msra.mxu3 %v127_v62  ;;  %v27_v36 = vld [vmem:[%s5981_s1 + $0x10] sm:$0xff] }
 0x1cb   :  { %1725 = vmatpush.msra.mxu2 %v59_v61  ;;  %1759 = vmatpush.msra.mxu0 %v211_v63  ;;  %v95_v33 = vld [vmem:[%s5981_s1 + $0x230] sm:$0xff] }
 0x1cc   :  { %1779 = vmatpush.msra.mxu1 %v275_v4  ;;  %1745 = vmatpush.msra.mxu3 %v123_v7  ;;  %v243_v38 = vld [vmem:[%s5981_s1 + $0x6d0] sm:$0xff] }
 0x1cd   :  { %1726 = vmatpush.msra.mxu2 %v55_v5  ;;  %1760 = vmatpush.msra.mxu0 %v207_v8  ;;  %v343_v39 = vld [vmem:[%s5981_s1 + $0x9f0] sm:$0xff] }
 0x1ce   :  { %1780 = vmatpush.msra.mxu1 %v271_v9  ;;  %1746 = vmatpush.msra.mxu3 %v119_v11  ;;  %v91_v40 = vld [vmem:[%s5981_s1 + $0x210] sm:$0xff] }
 0x1cf   :  { %1727 = vmatpush.msra.mxu2 %v51_v10  ;;  %1761 = vmatpush.msra.mxu0 %v203_v12  ;;  %v175_v41 = vld [vmem:[%s5981_s1 + $0x4b0] sm:$0xff] }
 0x1d0   :  { %1781 = vmatpush.msra.mxu1 %v267_v13  ;;  %1747 = vmatpush.msra.mxu3 %v115_v15  ;;  %v339_v43 = vld [vmem:[%s5981_s1 + $0x9d0] sm:$0xff] }
 0x1d1   :  { %1728 = vmatpush.msra.mxu2 %v47_v14  ;;  %1762 = vmatpush.msra.mxu0 %v199_v16  ;;  %v171_v45 = vld [vmem:[%s5981_s1 + $0x490] sm:$0xff] }
 0x1d2   :  { %1782 = vmatpush.msra.mxu1 %v263_v17  ;;  %1748 = vmatpush.msra.mxu3 %v111_v19  ;;  %v235_v46 = vld [vmem:[%s5981_s1 + $0x690] sm:$0xff] }
 0x1d3   :  { %1729 = vmatpush.msra.mxu2 %v43_v18  ;;  %1763 = vmatpush.msra.mxu0 %v195_v20  ;;  %v403_v52 = vld [vmem:[%s5981_s1 + $0xbd0] sm:$0xff] }
 0x1d4   :  { %1783 = vmatpush.msra.mxu1 %v259_v21  ;;  %1749 = vmatpush.msra.mxu3 %v107_v23  ;;  %v167_v53 = vld [vmem:[%s5981_s1 + $0x470] sm:$0xff] }
 0x1d5   :  { %1730 = vmatpush.msra.mxu2 %v39_v22  ;;  %1764 = vmatpush.msra.mxu0 %v191_v24  ;;  %v231_v54 = vld [vmem:[%s5981_s1 + $0x670] sm:$0xff] }
 0x1d6   :  { %1784 = vmatpush.msra.mxu1 %v255_v25  ;;  %1750 = vmatpush.msra.mxu3 %v103_v27  ;;  %v331_v55 = vld [vmem:[%s5981_s1 + $0x990] sm:$0xff] }
 0x1d7   :  { %1731 = vmatpush.msra.mxu2 %v35_v26  ;;  %1765 = vmatpush.msra.mxu0 %v187_v28  ;;  %v163_v57 = vld [vmem:[%s5981_s1 + $0x450] sm:$0xff] }
 0x1d8   :  { %1785 = vmatpush.msra.mxu1 %v251_v29  ;;  %1751 = vmatpush.msra.mxu3 %v99_v31  ;;  %v227_v58 = vld [vmem:[%s5981_s1 + $0x650] sm:$0xff] }
 0x1d9   :  { %1732 = vmatpush.msra.mxu2 %v31_v30  ;;  %1766 = vmatpush.msra.mxu0 %v183_v32  ;;  %v327_v61 = vld [vmem:[%s5981_s1 + $0x970] sm:$0xff] }
 0x1da   :  { %1786 = vmatpush.msra.mxu1 %v247_v35  ;;  %1752 = vmatpush.msra.mxu3 %v95_v33  ;;  %v395_v62 = vld [vmem:[%s5981_s1 + $0xb90] sm:$0xff] }
 0x1db   :  { %1733 = vmatpush.msra.mxu2 %v27_v36  ;;  %1767 = vmatpush.msra.mxu0 %v179_v37  ;;  %v159_v63 = vld [vmem:[%s5981_s1 + $0x430] sm:$0xff] }
 0x1dc   :  { %1787 = vmatpush.msra.mxu1 %v243_v38  ;;  %1753 = vmatpush.msra.mxu3 %v91_v40  ;;  %v223_v4 = vld [vmem:[%s5981_s1 + $0x630] sm:$0xff] }
 0x1dd   :  { %1798 = vmatpush.msrb.mxu2 %v343_v39  ;;  %1768 = vmatpush.msra.mxu0 %v175_v41  ;;  %v323_v5 = vld [vmem:[%s5981_s1 + $0x950] sm:$0xff] }
 0x1de   :  { %1788 = vmatpush.msra.mxu1 %v239_v42  ;;  %1818 = vmatpush.msrb.mxu3 %v407_v44  ;;  %v391_v6 = vld [vmem:[%s5981_s1 + $0xb70] sm:$0xff] }
 0x1df   :  { %1799 = vmatpush.msrb.mxu2 %v339_v43  ;;  %1769 = vmatpush.msra.mxu0 %v171_v45  ;;  %v155_v7 = vld [vmem:[%s5981_s1 + $0x410] sm:$0xff] }
 0x1e0   :  { %1789 = vmatpush.msra.mxu1 %v235_v46  ;;  %1819 = vmatpush.msrb.mxu3 %v403_v52  ;;  %v219_v8 = vld [vmem:[%s5981_s1 + $0x610] sm:$0xff] }
 0x1e1   :  { %1800 = vmatpush.msrb.mxu2 %v335_v47  ;;  %1770 = vmatpush.msra.mxu0 %v167_v53  ;;  %v319_v9 = vld [vmem:[%s5981_s1 + $0x930] sm:$0xff] }
 0x1e2   :  { %1790 = vmatpush.msra.mxu1 %v231_v54  ;;  %1820 = vmatpush.msrb.mxu3 %v399_v56  ;;  %v387_v10 = vld [vmem:[%s5981_s1 + $0xb50] sm:$0xff] }
 0x1e3   :  { %1801 = vmatpush.msrb.mxu2 %v331_v55  ;;  %1771 = vmatpush.msra.mxu0 %v163_v57  ;;  %v471_v11 = vld [vmem:[%s5981_s1 + $0xdf0] sm:$0xff] }
 0x1e4   :  { %1791 = vmatpush.msra.mxu1 %v227_v58  ;;  %1821 = vmatpush.msrb.mxu3 %v395_v62  ;;  %v535_v12 = vld [vmem:[%s5981_s1 + $0xff0] sm:$0xff] }
 0x1e5   :  { %1802 = vmatpush.msrb.mxu2 %v327_v61  ;;  %1772 = vmatpush.msra.mxu0 %v159_v63  ;;  %v315_v13 = vld [vmem:[%s5981_s1 + $0x910] sm:$0xff] }
 0x1e6   :  { %1792 = vmatpush.msra.mxu1 %v223_v4  ;;  %1822 = vmatpush.msrb.mxu3 %v391_v6  ;;  %v383_v14 = vld [vmem:[%s5981_s1 + $0xb30] sm:$0xff] }
 0x1e7   :  { %1803 = vmatpush.msrb.mxu2 %v323_v5  ;;  %1773 = vmatpush.msra.mxu0 %v155_v7  ;;  %v467_v15 = vld [vmem:[%s5981_s1 + $0xdd0] sm:$0xff] }
 0x1e8   :  { %1793 = vmatpush.msra.mxu1 %v219_v8  ;;  %1823 = vmatpush.msrb.mxu3 %v387_v10  ;;  %v531_v16 = vld [vmem:[%s5981_s1 + $0xfd0] sm:$0xff] }
 0x1e9   :  { %1804 = vmatpush.msrb.mxu2 %v319_v9  ;;  %1838 = vmatpush.msrb.mxu0 %v471_v11  ;;  %v311_v17 = vld [vmem:[%s5981_s1 + $0x8f0] sm:$0xff] }
 0x1ea   :  { %1858 = vmatpush.msrb.mxu1 %v535_v12  ;;  %v379_v18 = vld [vmem:[%s5981_s1 + $0xb10] sm:$0xff]  ;;  %1824 = vmatpush.msrb.mxu3 %v383_v14 }
 0x1eb   :  { %1805 = vmatpush.msrb.mxu2 %v315_v13  ;;  %v463_v19 = vld [vmem:[%s5981_s1 + $0xdb0] sm:$0xff]  ;;  %1839 = vmatpush.msrb.mxu0 %v467_v15 }
 0x1ec   :  { %v527_v20 = vld [vmem:[%s5981_s1 + $0xfb0] sm:$0xff]  ;;  %1859 = vmatpush.msrb.mxu1 %v531_v16  ;;  %1825 = vmatpush.msrb.mxu3 %v379_v18 }
 0x1ed   :  { %v307_v21 = vld [vmem:[%s5981_s1 + $0x8d0] sm:$0xff]  ;;  %1806 = vmatpush.msrb.mxu2 %v311_v17  ;;  %1840 = vmatpush.msrb.mxu0 %v463_v19 }
 0x1ee   :  { %v375_v22 = vld [vmem:[%s5981_s1 + $0xaf0] sm:$0xff]  ;;  %1860 = vmatpush.msrb.mxu1 %v527_v20  ;;  %1734 = vmatmul.f32.vlgmr.msra.gmra.mxu2 %v2974_v48 }
 0x1ef   :  { %v459_v23 = vld [vmem:[%s5981_s1 + $0xd90] sm:$0xff]  ;;  %1807 = vmatpush.msrb.mxu2 %v307_v21  ;;  %1826 = vmatpush.msrb.mxu3 %v375_v22 }
 0x1f0   :  { %v523_v24 = vld [vmem:[%s5981_s1 + $0xf90] sm:$0xff]  ;;  %1841 = vmatpush.msrb.mxu0 %v459_v23  ;;  %1754 = vmatmul.f32.vlgmr.msra.gmra.mxu3 %v2976_v49 }
 0x1f1   :  { %v303_v25 = vld [vmem:[%s5981_s1 + $0x8b0] sm:$0xff]  ;;  %1861 = vmatpush.msrb.mxu1 %v523_v24  ;;  %1774 = vmatmul.f32.vlgmr.msra.gmra.mxu0 %v2978_v50 }
 0x1f2   :  { %v371_v26 = vld [vmem:[%s5981_s1 + $0xad0] sm:$0xff]  ;;  %1808 = vmatpush.msrb.mxu2 %v303_v25  ;;  %1794 = vmatmul.f32.vlgmr.msra.gmra.mxu1 %v2980_v51 }
 0x1f3   :  { %v455_v27 = vld [vmem:[%s5981_s1 + $0xd70] sm:$0xff]  ;;  %1827 = vmatpush.msrb.mxu3 %v371_v26 }
 0x1f4   :  { %v519_v28 = vld [vmem:[%s5981_s1 + $0xf70] sm:$0xff]  ;;  %1842 = vmatpush.msrb.mxu0 %v455_v27 }
 0x1f5   :  { %v299_v29 = vld [vmem:[%s5981_s1 + $0x890] sm:$0xff]  ;;  %1862 = vmatpush.msrb.mxu1 %v519_v28 }
 0x1f6   :  { %v367_v30 = vld [vmem:[%s5981_s1 + $0xab0] sm:$0xff]  ;;  %1809 = vmatpush.msrb.mxu2 %v299_v29 }
 0x1f7   :  { %v451_v31 = vld [vmem:[%s5981_s1 + $0xd50] sm:$0xff]  ;;  %1828 = vmatpush.msrb.mxu3 %v367_v30 }
 0x1f8   :  { %v515_v32 = vld [vmem:[%s5981_s1 + $0xf50] sm:$0xff]  ;;  %1843 = vmatpush.msrb.mxu0 %v451_v31 }
 0x1f9   :  { %v295_v35 = vld [vmem:[%s5981_s1 + $0x870] sm:$0xff]  ;;  %1863 = vmatpush.msrb.mxu1 %v515_v32 }
 0x1fa   :  { %v363_v36 = vld [vmem:[%s5981_s1 + $0xa90] sm:$0xff]  ;;  %1810 = vmatpush.msrb.mxu2 %v295_v35 }
 0x1fb   :  { %v447_v33 = vld [vmem:[%s5981_s1 + $0xd30] sm:$0xff]  ;;  %1829 = vmatpush.msrb.mxu3 %v363_v36 }
 0x1fc   :  { %v511_v37 = vld [vmem:[%s5981_s1 + $0xf30] sm:$0xff]  ;;  %1844 = vmatpush.msrb.mxu0 %v447_v33 }
 0x1fd   :  { %v291_v38 = vld [vmem:[%s5981_s1 + $0x850] sm:$0xff]  ;;  %1864 = vmatpush.msrb.mxu1 %v511_v37 }
 0x1fe   :  { %v359_v39 = vld [vmem:[%s5981_s1 + $0xa70] sm:$0xff]  ;;  %1811 = vmatpush.msrb.mxu2 %v291_v38 }
 0x1ff   :  { %v443_v40 = vld [vmem:[%s5981_s1 + $0xd10] sm:$0xff]  ;;  %1830 = vmatpush.msrb.mxu3 %v359_v39 }
 0x200   :  { %v507_v41 = vld [vmem:[%s5981_s1 + $0xf10] sm:$0xff]  ;;  %1845 = vmatpush.msrb.mxu0 %v443_v40 }
 0x201   :  { %v287_v42 = vld [vmem:[%s5981_s1 + $0x830] sm:$0xff]  ;;  %1865 = vmatpush.msrb.mxu1 %v507_v41 }
 0x202   :  { %v355_v43 = vld [vmem:[%s5981_s1 + $0xa50] sm:$0xff]  ;;  %1812 = vmatpush.msrb.mxu2 %v287_v42 }
 0x203   :  { %v439_v44 = vld [vmem:[%s5981_s1 + $0xcf0] sm:$0xff]  ;;  %1831 = vmatpush.msrb.mxu3 %v355_v43 }
 0x204   :  { %v503_v45 = vld [vmem:[%s5981_s1 + $0xef0] sm:$0xff]  ;;  %1846 = vmatpush.msrb.mxu0 %v439_v44 }
 0x205   :  { %v283_v46 = vld [vmem:[%s5981_s1 + $0x810] sm:$0xff]  ;;  %1866 = vmatpush.msrb.mxu1 %v503_v45 }
 0x206   :  { %v351_v47 = vld [vmem:[%s5981_s1 + $0xa30] sm:$0xff]  ;;  %1813 = vmatpush.msrb.mxu2 %v283_v46 }
 0x207   :  { %v435_v52 = vld [vmem:[%s5981_s1 + $0xcd0] sm:$0xff]  ;;  %1832 = vmatpush.msrb.mxu3 %v351_v47  ;;  %1814 = vmatmul.f32.vlgmr.msrb.gmra.mxu2 %v3020_v1 }
 0x208   :  { %v499_v53 = vld [vmem:[%s5981_s1 + $0xed0] sm:$0xff]  ;;  %1847 = vmatpush.msrb.mxu0 %v435_v52 }
 0x209   :  { %v599_v54 = vld [vmem:[%s5981_s1 + $0x11f0] sm:$0xff]  ;;  %1867 = vmatpush.msrb.mxu1 %v499_v53 }
 0x20a   :  { %v347_v55 = vld [vmem:[%s5981_s1 + $0xa10] sm:$0xff]  ;;  %1878 = vmatpush.msra.mxu2 %v599_v54 }
 0x20b   :  { %v431_v56 = vld [vmem:[%s5981_s1 + $0xcb0] sm:$0xff]  ;;  %1833 = vmatpush.msrb.mxu3 %v347_v55 }
 0x20c   :  { %v495_v57 = vld [vmem:[%s5981_s1 + $0xeb0] sm:$0xff]  ;;  %1848 = vmatpush.msrb.mxu0 %v431_v56  ;;  %1834 = vmatmul.f32.vlgmr.msrb.gmra.mxu3 %v3024_v3 }
 0x20d   :  { %v595_v58 = vld [vmem:[%s5981_s1 + $0x11d0] sm:$0xff]  ;;  %1868 = vmatpush.msrb.mxu1 %v495_v57 }
 0x20e   :  { %v663_v61 = vld [vmem:[%s5981_s1 + $0x13f0] sm:$0xff]  ;;  %1879 = vmatpush.msra.mxu2 %v595_v58 }
 0x20f   :  { %v427_v62 = vld [vmem:[%s5981_s1 + $0xc90] sm:$0xff]  ;;  %1898 = vmatpush.msra.mxu3 %v663_v61 }
 0x210   :  { %v491_v63 = vld [vmem:[%s5981_s1 + $0xe90] sm:$0xff]  ;;  %1849 = vmatpush.msrb.mxu0 %v427_v62 }
 0x211   :  { %v591_v4 = vld [vmem:[%s5981_s1 + $0x11b0] sm:$0xff]  ;;  %1869 = vmatpush.msrb.mxu1 %v491_v63 }
 0x212   :  { %v659_v5 = vld [vmem:[%s5981_s1 + $0x13d0] sm:$0xff]  ;;  %1880 = vmatpush.msra.mxu2 %v591_v4 }
 0x213   :  { %v423_v6 = vld [vmem:[%s5981_s1 + $0xc70] sm:$0xff]  ;;  %1899 = vmatpush.msra.mxu3 %v659_v5 }
 0x214   :  { %v487_v7 = vld [vmem:[%s5981_s1 + $0xe70] sm:$0xff]  ;;  %1850 = vmatpush.msrb.mxu0 %v423_v6 }
 0x215   :  { %v587_v8 = vld [vmem:[%s5981_s1 + $0x1190] sm:$0xff]  ;;  %1870 = vmatpush.msrb.mxu1 %v487_v7 }
 0x216   :  { %v655_v9 = vld [vmem:[%s5981_s1 + $0x13b0] sm:$0xff]  ;;  %1881 = vmatpush.msra.mxu2 %v587_v8 }
 0x217   :  { %v419_v10 = vld [vmem:[%s5981_s1 + $0xc50] sm:$0xff]  ;;  %1900 = vmatpush.msra.mxu3 %v655_v9 }
 0x218   :  { %v483_v11 = vld [vmem:[%s5981_s1 + $0xe50] sm:$0xff]  ;;  %1851 = vmatpush.msrb.mxu0 %v419_v10 }
 0x219   :  { %v583_v12 = vld [vmem:[%s5981_s1 + $0x1170] sm:$0xff]  ;;  %1871 = vmatpush.msrb.mxu1 %v483_v11  ;;  %v2567_v11 = vld.sshfl [vmem:[#allocation1] sm:$0xff pattern:$0x73625140] }
 0x21a   :  { %v651_v13 = vld [vmem:[%s5981_s1 + $0x1390] sm:$0xff]  ;;  %1882 = vmatpush.msra.mxu2 %v583_v12 }
 0x21b   :  { %v415_v14 = vld [vmem:[%s5981_s1 + $0xc30] sm:$0xff]  ;;  %1901 = vmatpush.msra.mxu3 %v651_v13 }
 0x21c   :  { %v479_v15 = vld [vmem:[%s5981_s1 + $0xe30] sm:$0xff]  ;;  %1852 = vmatpush.msrb.mxu0 %v415_v14 }
 0x21d   :  { %v579_v16 = vld [vmem:[%s5981_s1 + $0x1150] sm:$0xff]  ;;  %1872 = vmatpush.msrb.mxu1 %v479_v15 }
 0x21e   :  { %v647_v17 = vld [vmem:[%s5981_s1 + $0x1370] sm:$0xff]  ;;  %1883 = vmatpush.msra.mxu2 %v579_v16 }
 0x21f   :  { %v411_v18 = vld [vmem:[%s5981_s1 + $0xc10] sm:$0xff]  ;;  %1902 = vmatpush.msra.mxu3 %v647_v17 }
 0x220   :  { %v475_v19 = vld [vmem:[%s5981_s1 + $0xe10] sm:$0xff]  ;;  %1853 = vmatpush.msrb.mxu0 %v411_v18 }
 0x221   :  { %v575_v20 = vld [vmem:[%s5981_s1 + $0x1130] sm:$0xff]  ;;  %1873 = vmatpush.msrb.mxu1 %v475_v19  ;;  %1854 = vmatmul.f32.vlgmr.msrb.gmra.mxu0 %v3018_v0 }
 0x222   :  { %v643_v21 = vld [vmem:[%s5981_s1 + $0x1350] sm:$0xff]  ;;  %1884 = vmatpush.msra.mxu2 %v575_v20  ;;  %1874 = vmatmul.f32.vlgmr.msrb.gmra.mxu1 %v3022_v2 }
 0x223   :  { %v727_v22 = vld [vmem:[%s5981_s1 + $0x15f0] sm:$0xff]  ;;  %1903 = vmatpush.msra.mxu3 %v643_v21 }
 0x224   :  { %v791_v23 = vld [vmem:[%s5981_s1 + $0x17f0] sm:$0xff]  ;;  %1918 = vmatpush.msra.mxu0 %v727_v22 }
 0x225   :  { %v571_v24 = vld [vmem:[%s5981_s1 + $0x1110] sm:$0xff]  ;;  %1938 = vmatpush.msra.mxu1 %v791_v23 }
 0x226   :  { %v639_v25 = vld [vmem:[%s5981_s1 + $0x1330] sm:$0xff]  ;;  %1885 = vmatpush.msra.mxu2 %v571_v24 }
 0x227   :  { %v723_v26 = vld [vmem:[%s5981_s1 + $0x15d0] sm:$0xff]  ;;  %1904 = vmatpush.msra.mxu3 %v639_v25 }
 0x228   :  { %v787_v27 = vld [vmem:[%s5981_s1 + $0x17d0] sm:$0xff]  ;;  %1919 = vmatpush.msra.mxu0 %v723_v26 }
 0x229   :  { %v567_v28 = vld [vmem:[%s5981_s1 + $0x10f0] sm:$0xff]  ;;  %1939 = vmatpush.msra.mxu1 %v787_v27 }
 0x22a   :  { %v635_v29 = vld [vmem:[%s5981_s1 + $0x1310] sm:$0xff]  ;;  %1886 = vmatpush.msra.mxu2 %v567_v28 }
 0x22b   :  { %v719_v30 = vld [vmem:[%s5981_s1 + $0x15b0] sm:$0xff]  ;;  %1905 = vmatpush.msra.mxu3 %v635_v29 }
 0x22c   :  { %v783_v31 = vld [vmem:[%s5981_s1 + $0x17b0] sm:$0xff]  ;;  %1920 = vmatpush.msra.mxu0 %v719_v30 }
 0x22d   :  { %v563_v32 = vld [vmem:[%s5981_s1 + $0x10d0] sm:$0xff]  ;;  %1940 = vmatpush.msra.mxu1 %v783_v31 }
 0x22e   :  { %v631_v35 = vld [vmem:[%s5981_s1 + $0x12f0] sm:$0xff]  ;;  %1887 = vmatpush.msra.mxu2 %v563_v32 }
 0x22f   :  { %v715_v36 = vld [vmem:[%s5981_s1 + $0x1590] sm:$0xff]  ;;  %1906 = vmatpush.msra.mxu3 %v631_v35 }
 0x230   :  { %v779_v33 = vld [vmem:[%s5981_s1 + $0x1790] sm:$0xff]  ;;  %1921 = vmatpush.msra.mxu0 %v715_v36 }
 0x231   :  { %v559_v37 = vld [vmem:[%s5981_s1 + $0x10b0] sm:$0xff]  ;;  %1941 = vmatpush.msra.mxu1 %v779_v33 }
 0x232   :  { %v627_v38 = vld [vmem:[%s5981_s1 + $0x12d0] sm:$0xff]  ;;  %1888 = vmatpush.msra.mxu2 %v559_v37 }
 0x233   :  { %v711_v39 = vld [vmem:[%s5981_s1 + $0x1570] sm:$0xff]  ;;  %1907 = vmatpush.msra.mxu3 %v627_v38 }
 0x234   :  { %v775_v40 = vld [vmem:[%s5981_s1 + $0x1770] sm:$0xff]  ;;  %1922 = vmatpush.msra.mxu0 %v711_v39 }
 0x235   :  { %v555_v41 = vld [vmem:[%s5981_s1 + $0x1090] sm:$0xff]  ;;  %1942 = vmatpush.msra.mxu1 %v775_v40 }
 0x236   :  { %v623_v42 = vld [vmem:[%s5981_s1 + $0x12b0] sm:$0xff]  ;;  %1889 = vmatpush.msra.mxu2 %v555_v41 }
 0x237   :  { %v707_v43 = vld [vmem:[%s5981_s1 + $0x1550] sm:$0xff]  ;;  %1908 = vmatpush.msra.mxu3 %v623_v42  ;;  %v2569_v42 = vld.sshfl [vmem:[#allocation1 + $0x18] sm:$0xff pattern:$0x73625140] }
 0x238   :  { %v771_v44 = vld [vmem:[%s5981_s1 + $0x1750] sm:$0xff]  ;;  %1923 = vmatpush.msra.mxu0 %v707_v43 }
 0x239   :  { %v551_v45 = vld [vmem:[%s5981_s1 + $0x1070] sm:$0xff]  ;;  %1943 = vmatpush.msra.mxu1 %v771_v44 }
 0x23a   :  { %v619_v46 = vld [vmem:[%s5981_s1 + $0x1290] sm:$0xff]  ;;  %1890 = vmatpush.msra.mxu2 %v551_v45 }
 0x23b   :  { %v703_v47 = vld [vmem:[%s5981_s1 + $0x1530] sm:$0xff]  ;;  %1909 = vmatpush.msra.mxu3 %v619_v46 }
 0x23c   :  { %v767_v52 = vld [vmem:[%s5981_s1 + $0x1730] sm:$0xff]  ;;  %1924 = vmatpush.msra.mxu0 %v703_v47 }
 0x23d   :  { %v547_v53 = vld [vmem:[%s5981_s1 + $0x1050] sm:$0xff]  ;;  %1944 = vmatpush.msra.mxu1 %v767_v52 }
 0x23e   :  { %v615_v54 = vld [vmem:[%s5981_s1 + $0x1270] sm:$0xff]  ;;  %1891 = vmatpush.msra.mxu2 %v547_v53 }
 0x23f   :  { %v699_v55 = vld [vmem:[%s5981_s1 + $0x1510] sm:$0xff]  ;;  %1910 = vmatpush.msra.mxu3 %v615_v54 }
 0x240   :  { %v763_v56 = vld [vmem:[%s5981_s1 + $0x1710] sm:$0xff]  ;;  %1925 = vmatpush.msra.mxu0 %v699_v55 }
 0x241   :  { %v543_v57 = vld [vmem:[%s5981_s1 + $0x1030] sm:$0xff]  ;;  %1945 = vmatpush.msra.mxu1 %v763_v56 }
 0x242   :  { %v611_v58 = vld [vmem:[%s5981_s1 + $0x1250] sm:$0xff]  ;;  %1892 = vmatpush.msra.mxu2 %v543_v57 }
 0x243   :  { %v695_v61 = vld [vmem:[%s5981_s1 + $0x14f0] sm:$0xff]  ;;  %1911 = vmatpush.msra.mxu3 %v611_v58 }
 0x244   :  { %v759_v62 = vld [vmem:[%s5981_s1 + $0x16f0] sm:$0xff]  ;;  %1926 = vmatpush.msra.mxu0 %v695_v61 }
 0x245   :  { %v539_v63 = vld [vmem:[%s5981_s1 + $0x1010] sm:$0xff]  ;;  %1946 = vmatpush.msra.mxu1 %v759_v62 }
 0x246   :  { %v607_v4 = vld [vmem:[%s5981_s1 + $0x1230] sm:$0xff]  ;;  %1893 = vmatpush.msra.mxu2 %v539_v63 }
 0x247   :  { %v691_v5 = vld [vmem:[%s5981_s1 + $0x14d0] sm:$0xff]  ;;  %1912 = vmatpush.msra.mxu3 %v607_v4  ;;  %1894 = vmatmul.f32.vlgmr.msra.gmra.mxu2 %v2567_v11 }
 0x248   :  { %v755_v6 = vld [vmem:[%s5981_s1 + $0x16d0] sm:$0xff]  ;;  %1927 = vmatpush.msra.mxu0 %v691_v5 }
 0x249   :  { %v855_v7 = vld [vmem:[%s5981_s1 + $0x19f0] sm:$0xff]  ;;  %1947 = vmatpush.msra.mxu1 %v755_v6 }
 0x24a   :  { %v603_v8 = vld [vmem:[%s5981_s1 + $0x1210] sm:$0xff]  ;;  %1958 = vmatpush.msrb.mxu2 %v855_v7 }
 0x24b   :  { %v687_v9 = vld [vmem:[%s5981_s1 + $0x14b0] sm:$0xff]  ;;  %1913 = vmatpush.msra.mxu3 %v603_v8 }
 0x24c   :  { %v751_v10 = vld [vmem:[%s5981_s1 + $0x16b0] sm:$0xff]  ;;  %1928 = vmatpush.msra.mxu0 %v687_v9  ;;  %1914 = vmatmul.f32.vlgmr.msra.gmra.mxu3 %v4044_v34 }
 0x24d   :  { %v851_v12 = vld [vmem:[%s5981_s1 + $0x19d0] sm:$0xff]  ;;  %1948 = vmatpush.msra.mxu1 %v751_v10 }
 0x24e   :  { %v919_v13 = vld [vmem:[%s5981_s1 + $0x1bf0] sm:$0xff]  ;;  %1959 = vmatpush.msrb.mxu2 %v851_v12 }
 0x24f   :  { %v683_v14 = vld [vmem:[%s5981_s1 + $0x1490] sm:$0xff]  ;;  %1978 = vmatpush.msrb.mxu3 %v919_v13 }
 0x250   :  { %v747_v15 = vld [vmem:[%s5981_s1 + $0x1690] sm:$0xff]  ;;  %1929 = vmatpush.msra.mxu0 %v683_v14 }
 0x251   :  { %v847_v16 = vld [vmem:[%s5981_s1 + $0x19b0] sm:$0xff]  ;;  %1949 = vmatpush.msra.mxu1 %v747_v15 }
 0x252   :  { %v915_v17 = vld [vmem:[%s5981_s1 + $0x1bd0] sm:$0xff]  ;;  %1960 = vmatpush.msrb.mxu2 %v847_v16 }
 0x253   :  { %v679_v18 = vld [vmem:[%s5981_s1 + $0x1470] sm:$0xff]  ;;  %1979 = vmatpush.msrb.mxu3 %v915_v17 }
 0x254   :  { %v743_v19 = vld [vmem:[%s5981_s1 + $0x1670] sm:$0xff]  ;;  %1930 = vmatpush.msra.mxu0 %v679_v18 }
 0x255   :  { %v843_v20 = vld [vmem:[%s5981_s1 + $0x1990] sm:$0xff]  ;;  %1950 = vmatpush.msra.mxu1 %v743_v19 }
 0x256   :  { %v911_v34 = vld [vmem:[%s5981_s1 + $0x1bb0] sm:$0xff]  ;;  %1961 = vmatpush.msrb.mxu2 %v843_v20  ;;  %v88_v20 = vld [vmem:[%s5981_s1 + $0x1f8] sm:$0xff] }
 0x257   :  { %v675_v21 = vld [vmem:[%s5981_s1 + $0x1450] sm:$0xff]  ;;  %1980 = vmatpush.msrb.mxu3 %v911_v34  ;;  %v152_v34 = vld [vmem:[%s5981_s1 + $0x3f8] sm:$0xff] }
 0x258   :  { %v739_v22 = vld [vmem:[%s5981_s1 + $0x1650] sm:$0xff]  ;;  %1931 = vmatpush.msra.mxu0 %v675_v21 }
 0x259   :  { %v839_v23 = vld [vmem:[%s5981_s1 + $0x1970] sm:$0xff]  ;;  %1951 = vmatpush.msra.mxu1 %v739_v22 }
 0x25a   :  { %v907_v24 = vld [vmem:[%s5981_s1 + $0x1b90] sm:$0xff]  ;;  %1962 = vmatpush.msrb.mxu2 %v839_v23  ;;  %v2570_v23 = vld.sshfl [vmem:[#allocation1 + $0x20] sm:$0xff pattern:$0x73625140] }
 0x25b   :  { %v671_v25 = vld [vmem:[%s5981_s1 + $0x1430] sm:$0xff]  ;;  %1981 = vmatpush.msrb.mxu3 %v907_v24  ;;  %v84_v24 = vld [vmem:[%s5981_s1 + $0x1d8] sm:$0xff] }
 0x25c   :  { %v735_v26 = vld [vmem:[%s5981_s1 + $0x1630] sm:$0xff]  ;;  %1932 = vmatpush.msra.mxu0 %v671_v25  ;;  %v148_v25 = vld [vmem:[%s5981_s1 + $0x3d8] sm:$0xff] }
 0x25d   :  { %v835_v27 = vld [vmem:[%s5981_s1 + $0x1950] sm:$0xff]  ;;  %1952 = vmatpush.msra.mxu1 %v735_v26  ;;  %v216_v26 = vld [vmem:[%s5981_s1 + $0x5f8] sm:$0xff] }
 0x25e   :  { %v903_v28 = vld [vmem:[%s5981_s1 + $0x1b70] sm:$0xff]  ;;  %1963 = vmatpush.msrb.mxu2 %v835_v27 }
 0x25f   :  { %v667_v29 = vld [vmem:[%s5981_s1 + $0x1410] sm:$0xff]  ;;  %1982 = vmatpush.msrb.mxu3 %v903_v28  ;;  %v80_v28 = vld [vmem:[%s5981_s1 + $0x1b8] sm:$0xff] }
 0x260   :  { %v731_v30 = vld [vmem:[%s5981_s1 + $0x1610] sm:$0xff]  ;;  %1933 = vmatpush.msra.mxu0 %v667_v29  ;;  %v144_v29 = vld [vmem:[%s5981_s1 + $0x3b8] sm:$0xff] }
 0x261   :  { %v831_v31 = vld [vmem:[%s5981_s1 + $0x1930] sm:$0xff]  ;;  %1953 = vmatpush.msra.mxu1 %v731_v30  ;;  %v212_v30 = vld [vmem:[%s5981_s1 + $0x5d8] sm:$0xff] }
 0x262   :  { %v899_v32 = vld [vmem:[%s5981_s1 + $0x1b50] sm:$0xff]  ;;  %1964 = vmatpush.msrb.mxu2 %v831_v31  ;;  %1954 = vmatmul.f32.vlgmr.msra.gmra.mxu1 %v2569_v42  ;;  %v132_v42 = vld [vmem:[%s5981_s1 + $0x358] sm:$0xff] }
 0x263   :  { %v983_v35 = vld [vmem:[%s5981_s1 + $0x1df0] sm:$0xff]  ;;  %1983 = vmatpush.msrb.mxu3 %v899_v32  ;;  %v76_v32 = vld [vmem:[%s5981_s1 + $0x198] sm:$0xff] }
 0x264   :  { %v1023_v36 = vld [vmem:[%s5981_s1 + $0x1f30] sm:$0xff]  ;;  %1998 = vmatpush.msrb.mxu0 %v983_v35  ;;  %v208_v35 = vld [vmem:[%s5981_s1 + $0x5b8] sm:$0xff] }
 0x265   :  { %v4831_v33 = vld.sshfl [vmem:[#allocation1 + $0x10] sm:$0xff pattern:$0x73625140]  ;;  %2024 = vmatpush.msrb.mxu1 %v1023_v36 }
 0x266   :  { %1934 = vmatmul.f32.vlgmr.msra.gmra.mxu0 %v4831_v33  ;;  %v827_v37 = vld [vmem:[%s5981_s1 + $0x1910] sm:$0xff] }
 0x267   :  { %v895_v38 = vld [vmem:[%s5981_s1 + $0x1b30] sm:$0xff]  ;;  %1965 = vmatpush.msrb.mxu2 %v827_v37  ;;  %v72_v37 = vld [vmem:[%s5981_s1 + $0x178] sm:$0xff] }
 0x268   :  { %v979_v39 = vld [vmem:[%s5981_s1 + $0x1dd0] sm:$0xff]  ;;  %1984 = vmatpush.msrb.mxu3 %v895_v38  ;;  %v136_v38 = vld [vmem:[%s5981_s1 + $0x378] sm:$0xff] }
 0x269   :  { %v1019_v40 = vld [vmem:[%s5981_s1 + $0x1f10] sm:$0xff]  ;;  %1999 = vmatpush.msrb.mxu0 %v979_v39  ;;  %v204_v39 = vld [vmem:[%s5981_s1 + $0x598] sm:$0xff] }
 0x26a   :  { %v823_v41 = vld [vmem:[%s5981_s1 + $0x18f0] sm:$0xff]  ;;  %2025 = vmatpush.msrb.mxu1 %v1019_v40 }
 0x26b   :  { %v891_v43 = vld [vmem:[%s5981_s1 + $0x1b10] sm:$0xff]  ;;  %1966 = vmatpush.msrb.mxu2 %v823_v41  ;;  %v68_v41 = vld [vmem:[%s5981_s1 + $0x158] sm:$0xff] }
 0x26c   :  { %v975_v44 = vld [vmem:[%s5981_s1 + $0x1db0] sm:$0xff]  ;;  %1985 = vmatpush.msrb.mxu3 %v891_v43  ;;  %v200_v43 = vld [vmem:[%s5981_s1 + $0x578] sm:$0xff] }
 0x26d   :  { %v1015_v45 = vld [vmem:[%s5981_s1 + $0x1ef0] sm:$0xff]  ;;  %2000 = vmatpush.msrb.mxu0 %v975_v44 }
 0x26e   :  { %v819_v46 = vld [vmem:[%s5981_s1 + $0x18d0] sm:$0xff]  ;;  %2026 = vmatpush.msrb.mxu1 %v1015_v45  ;;  %v64_v45 = vld [vmem:[%s5981_s1 + $0x138] sm:$0xff] }
 0x26f   :  { %v887_v47 = vld [vmem:[%s5981_s1 + $0x1af0] sm:$0xff]  ;;  %1967 = vmatpush.msrb.mxu2 %v819_v46  ;;  %v128_v46 = vld [vmem:[%s5981_s1 + $0x338] sm:$0xff] }
 0x270   :  { %v971_v52 = vld [vmem:[%s5981_s1 + $0x1d90] sm:$0xff]  ;;  %1986 = vmatpush.msrb.mxu3 %v887_v47  ;;  %v196_v47 = vld [vmem:[%s5981_s1 + $0x558] sm:$0xff] }
 0x271   :  { %v1011_v53 = vld [vmem:[%s5981_s1 + $0x1ed0] sm:$0xff]  ;;  %2001 = vmatpush.msrb.mxu0 %v971_v52  ;;  %v280_v52 = vld [vmem:[%s5981_s1 + $0x7f8] sm:$0xff] }
 0x272   :  { %v815_v54 = vld [vmem:[%s5981_s1 + $0x18b0] sm:$0xff]  ;;  %2027 = vmatpush.msrb.mxu1 %v1011_v53  ;;  %v124_v53 = vld [vmem:[%s5981_s1 + $0x318] sm:$0xff] }
 0x273   :  { %v883_v55 = vld [vmem:[%s5981_s1 + $0x1ad0] sm:$0xff]  ;;  %1968 = vmatpush.msrb.mxu2 %v815_v54 }
 0x274   :  { %v967_v56 = vld [vmem:[%s5981_s1 + $0x1d70] sm:$0xff]  ;;  %1987 = vmatpush.msrb.mxu3 %v883_v55  ;;  %v60_v55 = vld [vmem:[%s5981_s1 + $0x118] sm:$0xff] }
 0x275   :  { %v1007_v57 = vld [vmem:[%s5981_s1 + $0x1eb0] sm:$0xff]  ;;  %2002 = vmatpush.msrb.mxu0 %v967_v56  ;;  %v192_v56 = vld [vmem:[%s5981_s1 + $0x538] sm:$0xff] }
 0x276   :  { %v811_v58 = vld [vmem:[%s5981_s1 + $0x1890] sm:$0xff]  ;;  %2028 = vmatpush.msrb.mxu1 %v1007_v57  ;;  %v276_v57 = vld [vmem:[%s5981_s1 + $0x7d8] sm:$0xff] }
 0x277   :  { %v879_v61 = vld [vmem:[%s5981_s1 + $0x1ab0] sm:$0xff]  ;;  %1969 = vmatpush.msrb.mxu2 %v811_v58  ;;  %v120_v58 = vld [vmem:[%s5981_s1 + $0x2f8] sm:$0xff] }
 0x278   :  { %v963_v62 = vld [vmem:[%s5981_s1 + $0x1d50] sm:$0xff]  ;;  %1988 = vmatpush.msrb.mxu3 %v879_v61  ;;  %v2572_v61 = vld.sshfl [vmem:[#allocation1 + $0x38] sm:$0xff pattern:$0x73625140] }
 0x279   :  { %v1003_v63 = vld [vmem:[%s5981_s1 + $0x1e90] sm:$0xff]  ;;  %2003 = vmatpush.msrb.mxu0 %v963_v62  ;;  %v56_v62 = vld [vmem:[%s5981_s1 + $0xf8] sm:$0xff] }
 0x27a   :  { %v807_v4 = vld [vmem:[%s5981_s1 + $0x1870] sm:$0xff]  ;;  %2029 = vmatpush.msrb.mxu1 %v1003_v63  ;;  %v188_v63 = vld [vmem:[%s5981_s1 + $0x518] sm:$0xff] }
 0x27b   :  { %v875_v5 = vld [vmem:[%s5981_s1 + $0x1a90] sm:$0xff]  ;;  %1970 = vmatpush.msrb.mxu2 %v807_v4  ;;  %v272_v4 = vld [vmem:[%s5981_s1 + $0x7b8] sm:$0xff] }
 0x27c   :  { %v959_v6 = vld [vmem:[%s5981_s1 + $0x1d30] sm:$0xff]  ;;  %1989 = vmatpush.msrb.mxu3 %v875_v5  ;;  %v116_v5 = vld [vmem:[%s5981_s1 + $0x2d8] sm:$0xff] }
 0x27d   :  { %v999_v7 = vld [vmem:[%s5981_s1 + $0x1e70] sm:$0xff]  ;;  %2004 = vmatpush.msrb.mxu0 %v959_v6  ;;  %v52_v6 = vld [vmem:[%s5981_s1 + $0xd8] sm:$0xff] }
 0x27e   :  { %v803_v8 = vld [vmem:[%s5981_s1 + $0x1850] sm:$0xff]  ;;  %2030 = vmatpush.msrb.mxu1 %v999_v7  ;;  %v184_v7 = vld [vmem:[%s5981_s1 + $0x4f8] sm:$0xff] }
 0x27f   :  { %v871_v9 = vld [vmem:[%s5981_s1 + $0x1a70] sm:$0xff]  ;;  %1971 = vmatpush.msrb.mxu2 %v803_v8  ;;  %v268_v8 = vld [vmem:[%s5981_s1 + $0x798] sm:$0xff] }
 0x280   :  { %v955_v10 = vld [vmem:[%s5981_s1 + $0x1d10] sm:$0xff]  ;;  %1990 = vmatpush.msrb.mxu3 %v871_v9  ;;  %v112_v9 = vld [vmem:[%s5981_s1 + $0x2b8] sm:$0xff] }
 0x281   :  { %v995_v11 = vld [vmem:[%s5981_s1 + $0x1e50] sm:$0xff]  ;;  %2005 = vmatpush.msrb.mxu0 %v955_v10  ;;  %v48_v10 = vld [vmem:[%s5981_s1 + $0xb8] sm:$0xff] }
 0x282   :  { %v799_v12 = vld [vmem:[%s5981_s1 + $0x1830] sm:$0xff]  ;;  %2031 = vmatpush.msrb.mxu1 %v995_v11  ;;  %v180_v11 = vld [vmem:[%s5981_s1 + $0x4d8] sm:$0xff] }
 0x283   :  { %v867_v13 = vld [vmem:[%s5981_s1 + $0x1a50] sm:$0xff]  ;;  %1972 = vmatpush.msrb.mxu2 %v799_v12  ;;  %v264_v12 = vld [vmem:[%s5981_s1 + $0x778] sm:$0xff] }
 0x284   :  { %v951_v14 = vld [vmem:[%s5981_s1 + $0x1cf0] sm:$0xff]  ;;  %1991 = vmatpush.msrb.mxu3 %v867_v13  ;;  %v108_v13 = vld [vmem:[%s5981_s1 + $0x298] sm:$0xff] }
 0x285   :  { %v991_v15 = vld [vmem:[%s5981_s1 + $0x1e30] sm:$0xff]  ;;  %2006 = vmatpush.msrb.mxu0 %v951_v14  ;;  %v44_v14 = vld [vmem:[%s5981_s1 + $0x98] sm:$0xff] }
 0x286   :  { %v795_v16 = vld [vmem:[%s5981_s1 + $0x1810] sm:$0xff]  ;;  %2032 = vmatpush.msrb.mxu1 %v991_v15  ;;  %v176_v15 = vld [vmem:[%s5981_s1 + $0x4b8] sm:$0xff] }
 0x287   :  { %v863_v17 = vld [vmem:[%s5981_s1 + $0x1a30] sm:$0xff]  ;;  %1973 = vmatpush.msrb.mxu2 %v795_v16  ;;  %v260_v16 = vld [vmem:[%s5981_s1 + $0x758] sm:$0xff] }
 0x288   :  { %v947_v18 = vld [vmem:[%s5981_s1 + $0x1cd0] sm:$0xff]  ;;  %1992 = vmatpush.msrb.mxu3 %v863_v17  ;;  %1974 = vmatmul.f32.vlgmr.msrb.gmra.mxu2 %v2570_v23  ;;  %v104_v17 = vld [vmem:[%s5981_s1 + $0x278] sm:$0xff] }
 0x289   :  { %v987_v19 = vld [vmem:[%s5981_s1 + $0x1e10] sm:$0xff]  ;;  %2007 = vmatpush.msrb.mxu0 %v947_v18  ;;  %2058 = vmatpush.msra.mxu2 %v152_v34  ;;  %v40_v18 = vld [vmem:[%s5981_s1 + $0x78] sm:$0xff] }
 0x28a   :  { %v859_v21 = vld [vmem:[%s5981_s1 + $0x1a10] sm:$0xff]  ;;  %2033 = vmatpush.msrb.mxu1 %v987_v19  ;;  %v172_v19 = vld [vmem:[%s5981_s1 + $0x498] sm:$0xff] }
 0x28b   :  { %v943_v22 = vld [vmem:[%s5981_s1 + $0x1cb0] sm:$0xff]  ;;  %1993 = vmatpush.msrb.mxu3 %v859_v21  ;;  %2059 = vmatpush.msra.mxu2 %v148_v25  ;;  %v100_v34 = vld [vmem:[%s5981_s1 + $0x258] sm:$0xff] }
 0x28c   :  { %2038 = vmatpush.msra.mxu1 %v88_v20  ;;  %2008 = vmatpush.msrb.mxu0 %v943_v22  ;;  %v939_v27 = vld [vmem:[%s5981_s1 + $0x1c90] sm:$0xff]  ;;  %v256_v20 = vld [vmem:[%s5981_s1 + $0x738] sm:$0xff] }
 0x28d   :  { %1994 = vmatmul.f32.vlgmr.msrb.gmra.mxu3 %v4243_v60  ;;  %v935_v31 = vld [vmem:[%s5981_s1 + $0x1c70] sm:$0xff]  ;;  %v140_v60 = vld [vmem:[%s5981_s1 + $0x398] sm:$0xff]  ;;  %2060 = vmatpush.msra.mxu2 %v144_v29 }
 0x28e   :  { %2039 = vmatpush.msra.mxu1 %v84_v24  ;;  %2078 = vmatpush.msra.mxu3 %v216_v26  ;;  %v931_v36 = vld [vmem:[%s5981_s1 + $0x1c50] sm:$0xff]  ;;  %v36_v21 = vld [vmem:[%s5981_s1 + $0x58] sm:$0xff] }
 0x28f   :  { %2009 = vmatpush.msrb.mxu0 %v939_v27  ;;  %2061 = vmatpush.msra.mxu2 %v140_v60  ;;  %v927_v40 = vld [vmem:[%s5981_s1 + $0x1c30] sm:$0xff]  ;;  %v168_v22 = vld [vmem:[%s5981_s1 + $0x478] sm:$0xff] }
 0x290   :  { %2040 = vmatpush.msra.mxu1 %v80_v28  ;;  %2079 = vmatpush.msra.mxu3 %v212_v30  ;;  %v923_v44 = vld [vmem:[%s5981_s1 + $0x1c10] sm:$0xff]  ;;  %v252_v23 = vld [vmem:[%s5981_s1 + $0x718] sm:$0xff] }
 0x291   :  { %2010 = vmatpush.msrb.mxu0 %v935_v31  ;;  %2062 = vmatpush.msra.mxu2 %v136_v38  ;;  %v2571_v54 = vld.sshfl [vmem:[#allocation1 + $0x30] sm:$0xff pattern:$0x73625140]  ;;  %v96_v24 = vld [vmem:[%s5981_s1 + $0x238] sm:$0xff] }
 0x292   :  { %2041 = vmatpush.msra.mxu1 %v76_v32  ;;  %2080 = vmatpush.msra.mxu3 %v208_v35  ;;  %v32_v25 = vld [vmem:[%s5981_s1 + $0x38] sm:$0xff] }
 0x293   :  { %2011 = vmatpush.msrb.mxu0 %v931_v36  ;;  %2063 = vmatpush.msra.mxu2 %v132_v42  ;;  %v164_v26 = vld [vmem:[%s5981_s1 + $0x458] sm:$0xff] }
 0x294   :  { %2042 = vmatpush.msra.mxu1 %v72_v37  ;;  %2081 = vmatpush.msra.mxu3 %v204_v39  ;;  %v248_v27 = vld [vmem:[%s5981_s1 + $0x6f8] sm:$0xff] }
 0x295   :  { %2012 = vmatpush.msrb.mxu0 %v927_v40  ;;  %2064 = vmatpush.msra.mxu2 %v128_v46  ;;  %v92_v28 = vld [vmem:[%s5981_s1 + $0x218] sm:$0xff] }
 0x296   :  { %2043 = vmatpush.msra.mxu1 %v68_v41  ;;  %2082 = vmatpush.msra.mxu3 %v200_v43  ;;  %v28_v29 = vld [vmem:[%s5981_s1 + $0x18] sm:$0xff] }
 0x297   :  { %2013 = vmatpush.msrb.mxu0 %v923_v44  ;;  %2549 = vmatmul.msk.f32.vlgmr.msrb.gmra.mxu1 %vm1075_vm0, %v2572_v61  ;;  %v160_v30 = vld [vmem:[%s5981_s1 + $0x438] sm:$0xff] }
 0x298   :  { %2044 = vmatpush.msra.mxu1 %v64_v45  ;;  %2014 = vmatmul.f32.vlgmr.msrb.gmra.mxu0 %v2571_v54  ;;  %v244_v31 = vld [vmem:[%s5981_s1 + $0x6d8] sm:$0xff] }
 0x299   :  { %2083 = vmatpush.msra.mxu3 %v196_v47  ;;  %2098 = vmatpush.msra.mxu0 %v280_v52  ;;  %v344_v32 = vld [vmem:[%s5981_s1 + $0x9f8] sm:$0xff] }
 0x29a   :  { %2065 = vmatpush.msra.mxu2 %v124_v53  ;;  %2045 = vmatpush.msra.mxu1 %v60_v55  ;;  %v408_v60 = vld [vmem:[%s5981_s1 + $0xbf8] sm:$0xff] }
 0x29b   :  { %2084 = vmatpush.msra.mxu3 %v192_v56  ;;  %2099 = vmatpush.msra.mxu0 %v276_v57  ;;  %v156_v35 = vld [vmem:[%s5981_s1 + $0x418] sm:$0xff] }
 0x29c   :  { %2066 = vmatpush.msra.mxu2 %v120_v58  ;;  %2046 = vmatpush.msra.mxu1 %v56_v62  ;;  %v240_v36 = vld [vmem:[%s5981_s1 + $0x6b8] sm:$0xff] }
 0x29d   :  { %2085 = vmatpush.msra.mxu3 %v188_v63  ;;  %2100 = vmatpush.msra.mxu0 %v272_v4  ;;  %v340_v37 = vld [vmem:[%s5981_s1 + $0x9d8] sm:$0xff] }
 0x29e   :  { %2067 = vmatpush.msra.mxu2 %v116_v5  ;;  %2047 = vmatpush.msra.mxu1 %v52_v6  ;;  %v404_v38 = vld [vmem:[%s5981_s1 + $0xbd8] sm:$0xff] }
 0x29f   :  { %2086 = vmatpush.msra.mxu3 %v184_v7  ;;  %2101 = vmatpush.msra.mxu0 %v268_v8  ;;  %v472_v39 = vld [vmem:[%s5981_s1 + $0xdf8] sm:$0xff] }
 0x2a0   :  { %2068 = vmatpush.msra.mxu2 %v112_v9  ;;  %2048 = vmatpush.msra.mxu1 %v48_v10  ;;  %v236_v40 = vld [vmem:[%s5981_s1 + $0x698] sm:$0xff] }
 0x2a1   :  { %2087 = vmatpush.msra.mxu3 %v180_v11  ;;  %2102 = vmatpush.msra.mxu0 %v264_v12  ;;  %v336_v41 = vld [vmem:[%s5981_s1 + $0x9b8] sm:$0xff] }
 0x2a2   :  { %2069 = vmatpush.msra.mxu2 %v108_v13  ;;  %2049 = vmatpush.msra.mxu1 %v44_v14  ;;  %v400_v42 = vld [vmem:[%s5981_s1 + $0xbb8] sm:$0xff] }
 0x2a3   :  { %2088 = vmatpush.msra.mxu3 %v176_v15  ;;  %2103 = vmatpush.msra.mxu0 %v260_v16  ;;  %v468_v43 = vld [vmem:[%s5981_s1 + $0xdd8] sm:$0xff] }
 0x2a4   :  { %2070 = vmatpush.msra.mxu2 %v104_v17  ;;  %2050 = vmatpush.msra.mxu1 %v40_v18  ;;  %v232_v44 = vld [vmem:[%s5981_s1 + $0x678] sm:$0xff] }
 0x2a5   :  { %2089 = vmatpush.msra.mxu3 %v172_v19  ;;  %2104 = vmatpush.msra.mxu0 %v256_v20  ;;  %v332_v45 = vld [vmem:[%s5981_s1 + $0x998] sm:$0xff] }
 0x2a6   :  { %2071 = vmatpush.msra.mxu2 %v100_v34  ;;  %2051 = vmatpush.msra.mxu1 %v36_v21  ;;  %v396_v46 = vld [vmem:[%s5981_s1 + $0xb98] sm:$0xff] }
 0x2a7   :  { %2090 = vmatpush.msra.mxu3 %v168_v22  ;;  %2105 = vmatpush.msra.mxu0 %v252_v23  ;;  %v464_v47 = vld [vmem:[%s5981_s1 + $0xdb8] sm:$0xff] }
 0x2a8   :  { %2072 = vmatpush.msra.mxu2 %v96_v24  ;;  %2052 = vmatpush.msra.mxu1 %v32_v25  ;;  %v228_v52 = vld [vmem:[%s5981_s1 + $0x658] sm:$0xff] }
 0x2a9   :  { %2091 = vmatpush.msra.mxu3 %v164_v26  ;;  %2106 = vmatpush.msra.mxu0 %v248_v27  ;;  %v328_v53 = vld [vmem:[%s5981_s1 + $0x978] sm:$0xff] }
 0x2aa   :  { %2073 = vmatpush.msra.mxu2 %v92_v28  ;;  %2053 = vmatpush.msra.mxu1 %v28_v29  ;;  %v392_v54 = vld [vmem:[%s5981_s1 + $0xb78] sm:$0xff] }
 0x2ab   :  { %2092 = vmatpush.msra.mxu3 %v160_v30  ;;  %2107 = vmatpush.msra.mxu0 %v244_v31  ;;  %v460_v55 = vld [vmem:[%s5981_s1 + $0xd98] sm:$0xff] }
 0x2ac   :  { %2118 = vmatpush.msrb.mxu1 %v344_v32  ;;  %2138 = vmatpush.msrb.mxu2 %v408_v60  ;;  %v224_v56 = vld [vmem:[%s5981_s1 + $0x638] sm:$0xff] }
 0x2ad   :  { %2093 = vmatpush.msra.mxu3 %v156_v35  ;;  %2108 = vmatpush.msra.mxu0 %v240_v36  ;;  %v324_v57 = vld [vmem:[%s5981_s1 + $0x958] sm:$0xff] }
 0x2ae   :  { %2119 = vmatpush.msrb.mxu1 %v340_v37  ;;  %2139 = vmatpush.msrb.mxu2 %v404_v38  ;;  %v388_v58 = vld [vmem:[%s5981_s1 + $0xb58] sm:$0xff] }
 0x2af   :  { %2158 = vmatpush.msrb.mxu3 %v472_v39  ;;  %2109 = vmatpush.msra.mxu0 %v236_v40  ;;  %v456_v61 = vld [vmem:[%s5981_s1 + $0xd78] sm:$0xff] }
 0x2b0   :  { %2120 = vmatpush.msrb.mxu1 %v336_v41  ;;  %2140 = vmatpush.msrb.mxu2 %v400_v42  ;;  %v220_v62 = vld [vmem:[%s5981_s1 + $0x618] sm:$0xff] }
 0x2b1   :  { %2159 = vmatpush.msrb.mxu3 %v468_v43  ;;  %2110 = vmatpush.msra.mxu0 %v232_v44  ;;  %v320_v63 = vld [vmem:[%s5981_s1 + $0x938] sm:$0xff] }
 0x2b2   :  { %2121 = vmatpush.msrb.mxu1 %v332_v45  ;;  %2141 = vmatpush.msrb.mxu2 %v396_v46  ;;  %v384_v4 = vld [vmem:[%s5981_s1 + $0xb38] sm:$0xff] }
 0x2b3   :  { %2160 = vmatpush.msrb.mxu3 %v464_v47  ;;  %2111 = vmatpush.msra.mxu0 %v228_v52  ;;  %v452_v5 = vld [vmem:[%s5981_s1 + $0xd58] sm:$0xff] }
 0x2b4   :  { %2122 = vmatpush.msrb.mxu1 %v328_v53  ;;  %2142 = vmatpush.msrb.mxu2 %v392_v54  ;;  %v536_v6 = vld [vmem:[%s5981_s1 + $0xff8] sm:$0xff] }
 0x2b5   :  { %2161 = vmatpush.msrb.mxu3 %v460_v55  ;;  %2112 = vmatpush.msra.mxu0 %v224_v56  ;;  %v316_v7 = vld [vmem:[%s5981_s1 + $0x918] sm:$0xff] }
 0x2b6   :  { %2123 = vmatpush.msrb.mxu1 %v324_v57  ;;  %2143 = vmatpush.msrb.mxu2 %v388_v58  ;;  %v380_v8 = vld [vmem:[%s5981_s1 + $0xb18] sm:$0xff] }
 0x2b7   :  { %2162 = vmatpush.msrb.mxu3 %v456_v61  ;;  %2113 = vmatpush.msra.mxu0 %v220_v62  ;;  %v448_v9 = vld [vmem:[%s5981_s1 + $0xd38] sm:$0xff] }
 0x2b8   :  { %2124 = vmatpush.msrb.mxu1 %v320_v63  ;;  %2144 = vmatpush.msrb.mxu2 %v384_v4  ;;  %v532_v10 = vld [vmem:[%s5981_s1 + $0xfd8] sm:$0xff] }
 0x2b9   :  { %2163 = vmatpush.msrb.mxu3 %v452_v5  ;;  %v312_v11 = vld [vmem:[%s5981_s1 + $0x8f8] sm:$0xff]  ;;  %2178 = vmatpush.msrb.mxu0 %v536_v6  ;;  %v5388_v5 = vpop.f32.mrf.mxu2 }
 0x2ba   :  { %2125 = vmatpush.msrb.mxu1 %v316_v7  ;;  %v376_v12 = vld [vmem:[%s5981_s1 + $0xaf8] sm:$0xff]  ;;  %2145 = vmatpush.msrb.mxu2 %v380_v8 }
 0x2bb   :  { %v444_v13 = vld [vmem:[%s5981_s1 + $0xd18] sm:$0xff]  ;;  %2164 = vmatpush.msrb.mxu3 %v448_v9  ;;  %2179 = vmatpush.msrb.mxu0 %v532_v10  ;;  %v5407_v10 = vpop.f32.mrf.mxu3 }
 0x2bc   :  { %v528_v14 = vld [vmem:[%s5981_s1 + $0xfb8] sm:$0xff]  ;;  %2126 = vmatpush.msrb.mxu1 %v312_v11  ;;  %2146 = vmatpush.msrb.mxu2 %v376_v12 }
 0x2bd   :  { %v308_v15 = vld [vmem:[%s5981_s1 + $0x8d8] sm:$0xff]  ;;  %2165 = vmatpush.msrb.mxu3 %v444_v13  ;;  %2180 = vmatpush.msrb.mxu0 %v528_v14 }
 0x2be   :  { %v372_v16 = vld [vmem:[%s5981_s1 + $0xad8] sm:$0xff]  ;;  %2127 = vmatpush.msrb.mxu1 %v308_v15  ;;  %2074 = vmatmul.f32.vlgmr.msra.gmra.mxu2 %v2976_v49 }
 0x2bf   :  { %v440_v17 = vld [vmem:[%s5981_s1 + $0xcf8] sm:$0xff]  ;;  %2147 = vmatpush.msrb.mxu2 %v372_v16  ;;  %2054 = vmatmul.f32.vlgmr.msra.gmra.mxu1 %v2974_v48 }
 0x2c0   :  { %v524_v18 = vld [vmem:[%s5981_s1 + $0xf98] sm:$0xff]  ;;  %2166 = vmatpush.msrb.mxu3 %v440_v17  ;;  %2114 = vmatmul.f32.vlgmr.msra.gmra.mxu0 %v2980_v51  ;;  %v5435_v17 = vpop.f32.mrf.mxu0 }
 0x2c1   :  { %v304_v19 = vld [vmem:[%s5981_s1 + $0x8b8] sm:$0xff]  ;;  %2181 = vmatpush.msrb.mxu0 %v524_v18  ;;  %2094 = vmatmul.f32.vlgmr.msra.gmra.mxu3 %v2978_v50 }
 0x2c2   :  { %v368_v20 = vld [vmem:[%s5981_s1 + $0xab8] sm:$0xff]  ;;  %2128 = vmatpush.msrb.mxu1 %v304_v19 }
 0x2c3   :  { %v436_v34 = vld [vmem:[%s5981_s1 + $0xcd8] sm:$0xff]  ;;  %2148 = vmatpush.msrb.mxu2 %v368_v20 }
 0x2c4   :  { %v520_v21 = vld [vmem:[%s5981_s1 + $0xf78] sm:$0xff]  ;;  %2167 = vmatpush.msrb.mxu3 %v436_v34  ;;  %v5449_v34 = vpop.f32.mrf.mxu2 }
 0x2c5   :  { %v300_v22 = vld [vmem:[%s5981_s1 + $0x898] sm:$0xff]  ;;  %2182 = vmatpush.msrb.mxu0 %v520_v21 }
 0x2c6   :  { %v364_v23 = vld [vmem:[%s5981_s1 + $0xa98] sm:$0xff]  ;;  %2129 = vmatpush.msrb.mxu1 %v300_v22 }
 0x2c7   :  { %v432_v24 = vld [vmem:[%s5981_s1 + $0xcb8] sm:$0xff]  ;;  %2149 = vmatpush.msrb.mxu2 %v364_v23 }
 0x2c8   :  { %v516_v25 = vld [vmem:[%s5981_s1 + $0xf58] sm:$0xff]  ;;  %2168 = vmatpush.msrb.mxu3 %v432_v24  ;;  %v5460_v24 = vpop.f32.mrf.mxu1 }
 0x2c9   :  { %v296_v26 = vld [vmem:[%s5981_s1 + $0x878] sm:$0xff]  ;;  %2183 = vmatpush.msrb.mxu0 %v516_v25 }
 0x2ca   :  { %v360_v27 = vld [vmem:[%s5981_s1 + $0xa78] sm:$0xff]  ;;  %2130 = vmatpush.msrb.mxu1 %v296_v26 }
 0x2cb   :  { %v428_v28 = vld [vmem:[%s5981_s1 + $0xc98] sm:$0xff]  ;;  %2150 = vmatpush.msrb.mxu2 %v360_v27 }
 0x2cc   :  { %v512_v29 = vld [vmem:[%s5981_s1 + $0xf38] sm:$0xff]  ;;  %2169 = vmatpush.msrb.mxu3 %v428_v28 }
 0x2cd   :  { %v292_v30 = vld [vmem:[%s5981_s1 + $0x858] sm:$0xff]  ;;  %2184 = vmatpush.msrb.mxu0 %v512_v29  ;;  %v5475_v29 = vpop.f32.mrf.mxu3 }
 0x2ce   :  { %v356_v31 = vld [vmem:[%s5981_s1 + $0xa58] sm:$0xff]  ;;  %2131 = vmatpush.msrb.mxu1 %v292_v30 }
 0x2cf   :  { %v424_v32 = vld [vmem:[%s5981_s1 + $0xc78] sm:$0xff]  ;;  %2151 = vmatpush.msrb.mxu2 %v356_v31 }
 0x2d0   :  { %v508_v60 = vld [vmem:[%s5981_s1 + $0xf18] sm:$0xff]  ;;  %2170 = vmatpush.msrb.mxu3 %v424_v32 }
 0x2d1   :  { %v288_v35 = vld [vmem:[%s5981_s1 + $0x838] sm:$0xff]  ;;  %2185 = vmatpush.msrb.mxu0 %v508_v60 }
 0x2d2   :  { %v352_v36 = vld [vmem:[%s5981_s1 + $0xa38] sm:$0xff]  ;;  %2132 = vmatpush.msrb.mxu1 %v288_v35 }
 0x2d3   :  { %v420_v37 = vld [vmem:[%s5981_s1 + $0xc58] sm:$0xff]  ;;  %2152 = vmatpush.msrb.mxu2 %v352_v36 }
 0x2d4   :  { %v504_v38 = vld [vmem:[%s5981_s1 + $0xef8] sm:$0xff]  ;;  %2171 = vmatpush.msrb.mxu3 %v420_v37 }
 0x2d5   :  { %v284_v39 = vld [vmem:[%s5981_s1 + $0x818] sm:$0xff]  ;;  %2186 = vmatpush.msrb.mxu0 %v504_v38  ;;  %v5501_v38 = vpop.f32.mrf.mxu0 }
 0x2d6   :  { %v348_v40 = vld [vmem:[%s5981_s1 + $0xa18] sm:$0xff]  ;;  %2133 = vmatpush.msrb.mxu1 %v284_v39  ;;  %v5503_v39 = vpop.f32.mrf.mxu2 }
 0x2d7   :  { %v416_v41 = vld [vmem:[%s5981_s1 + $0xc38] sm:$0xff]  ;;  %2153 = vmatpush.msrb.mxu2 %v348_v40  ;;  %2134 = vmatmul.f32.vlgmr.msrb.gmra.mxu1 %v3020_v1 }
 0x2d8   :  { %v500_v42 = vld [vmem:[%s5981_s1 + $0xed8] sm:$0xff]  ;;  %2172 = vmatpush.msrb.mxu3 %v416_v41  ;;  %2154 = vmatmul.f32.vlgmr.msrb.gmra.mxu2 %v3024_v3 }
 0x2d9   :  { %v600_v43 = vld [vmem:[%s5981_s1 + $0x11f8] sm:$0xff]  ;;  %2187 = vmatpush.msrb.mxu0 %v500_v42 }
 0x2da   :  { %v664_v44 = vld [vmem:[%s5981_s1 + $0x13f8] sm:$0xff]  ;;  %2198 = vmatpush.msra.mxu1 %v600_v43 }
 0x2db   :  { %v412_v45 = vld [vmem:[%s5981_s1 + $0xc18] sm:$0xff]  ;;  %2218 = vmatpush.msra.mxu2 %v664_v44 }
 0x2dc   :  { %v496_v46 = vld [vmem:[%s5981_s1 + $0xeb8] sm:$0xff]  ;;  %2173 = vmatpush.msrb.mxu3 %v412_v45 }
 0x2dd   :  { %v596_v47 = vld [vmem:[%s5981_s1 + $0x11d8] sm:$0xff]  ;;  %2188 = vmatpush.msrb.mxu0 %v496_v46  ;;  %2174 = vmatmul.f32.vlgmr.msrb.gmra.mxu3 %v3018_v0 }
 0x2de   :  { %v660_v52 = vld [vmem:[%s5981_s1 + $0x13d8] sm:$0xff]  ;;  %2199 = vmatpush.msra.mxu1 %v596_v47 }
 0x2df   :  { %v728_v48 = vld [vmem:[%s5981_s1 + $0x15f8] sm:$0xff]  ;;  %2219 = vmatpush.msra.mxu2 %v660_v52  ;;  %v5529_v52 = vpop.f32.mrf.mxu1 }
 0x2e0   :  { %v492_v53 = vld [vmem:[%s5981_s1 + $0xe98] sm:$0xff]  ;;  %2238 = vmatpush.msra.mxu3 %v728_v48  ;;  %v5531_v48 = vpop.f32.mrf.mxu3 }
 0x2e1   :  { %v592_v49 = vld [vmem:[%s5981_s1 + $0x11b8] sm:$0xff]  ;;  %2189 = vmatpush.msrb.mxu0 %v492_v53 }
 0x2e2   :  { %v656_v54 = vld [vmem:[%s5981_s1 + $0x13b8] sm:$0xff]  ;;  %2200 = vmatpush.msra.mxu1 %v592_v49 }
 0x2e3   :  { %v724_v55 = vld [vmem:[%s5981_s1 + $0x15d8] sm:$0xff]  ;;  %2220 = vmatpush.msra.mxu2 %v656_v54 }
 0x2e4   :  { %v488_v56 = vld [vmem:[%s5981_s1 + $0xe78] sm:$0xff]  ;;  %2239 = vmatpush.msra.mxu3 %v724_v55 }
 0x2e5   :  { %v588_v50 = vld [vmem:[%s5981_s1 + $0x1198] sm:$0xff]  ;;  %2190 = vmatpush.msrb.mxu0 %v488_v56 }
 0x2e6   :  { %v652_v57 = vld [vmem:[%s5981_s1 + $0x1398] sm:$0xff]  ;;  %2201 = vmatpush.msra.mxu1 %v588_v50 }
 0x2e7   :  { %v720_v58 = vld [vmem:[%s5981_s1 + $0x15b8] sm:$0xff]  ;;  %2221 = vmatpush.msra.mxu2 %v652_v57  ;;  %v5551_v57 = vpop.f32.mrf.mxu0 }
 0x2e8   :  { %v484_v61 = vld [vmem:[%s5981_s1 + $0xe58] sm:$0xff]  ;;  %2240 = vmatpush.msra.mxu3 %v720_v58  ;;  %v5553_v58 = vpop.f32.mrf.mxu2 }
 0x2e9   :  { %v584_v62 = vld [vmem:[%s5981_s1 + $0x1178] sm:$0xff]  ;;  %2191 = vmatpush.msrb.mxu0 %v484_v61 }
 0x2ea   :  { %v648_v63 = vld [vmem:[%s5981_s1 + $0x1378] sm:$0xff]  ;;  %2202 = vmatpush.msra.mxu1 %v584_v62 }
 0x2eb   :  { %v716_v4 = vld [vmem:[%s5981_s1 + $0x1598] sm:$0xff]  ;;  %2222 = vmatpush.msra.mxu2 %v648_v63  ;;  %v2573_v63 = vld.sshfl [vmem:[#allocation1] sm:$0xff pattern:$0x73625140] }
 0x2ec   :  { %v480_v6 = vld [vmem:[%s5981_s1 + $0xe38] sm:$0xff]  ;;  %2241 = vmatpush.msra.mxu3 %v716_v4 }
 0x2ed   :  { %v580_v7 = vld [vmem:[%s5981_s1 + $0x1158] sm:$0xff]  ;;  %2192 = vmatpush.msrb.mxu0 %v480_v6  ;;  %v2574_v6 = vld.sshfl [vmem:[#allocation1 + $0x8] sm:$0xff pattern:$0x73625140] }
 0x2ee   :  { %v644_v8 = vld [vmem:[%s5981_s1 + $0x1358] sm:$0xff]  ;;  %2203 = vmatpush.msra.mxu1 %v580_v7 }
 0x2ef   :  { %v712_v9 = vld [vmem:[%s5981_s1 + $0x1578] sm:$0xff]  ;;  %2223 = vmatpush.msra.mxu2 %v644_v8 }
 0x2f0   :  { %v476_v3 = vld [vmem:[%s5981_s1 + $0xe18] sm:$0xff]  ;;  %2242 = vmatpush.msra.mxu3 %v712_v9 }
 0x2f1   :  { %v576_v11 = vld [vmem:[%s5981_s1 + $0x1138] sm:$0xff]  ;;  %2193 = vmatpush.msrb.mxu0 %v476_v3 }
 0x2f2   :  { %v640_v12 = vld [vmem:[%s5981_s1 + $0x1338] sm:$0xff]  ;;  %2204 = vmatpush.msra.mxu1 %v576_v11  ;;  %2194 = vmatmul.f32.vlgmr.msrb.gmra.mxu0 %v3022_v2  ;;  %v5576_v11 = vpop.f32.mrf.mxu1 }
 0x2f3   :  { %v708_v0 = vld [vmem:[%s5981_s1 + $0x1558] sm:$0xff]  ;;  %2224 = vmatpush.msra.mxu2 %v640_v12  ;;  %v5578_v12 = vpop.f32.mrf.mxu3 }
 0x2f4   :  { %v792_v13 = vld [vmem:[%s5981_s1 + $0x17f8] sm:$0xff]  ;;  %2243 = vmatpush.msra.mxu3 %v708_v0 }
 0x2f5   :  { %v572_v51 = vld [vmem:[%s5981_s1 + $0x1118] sm:$0xff]  ;;  %2258 = vmatpush.msra.mxu0 %v792_v13 }
 0x2f6   :  { %v636_v14 = vld [vmem:[%s5981_s1 + $0x1318] sm:$0xff]  ;;  %2205 = vmatpush.msra.mxu1 %v572_v51 }
 0x2f7   :  { %v704_v15 = vld [vmem:[%s5981_s1 + $0x1538] sm:$0xff]  ;;  %2225 = vmatpush.msra.mxu2 %v636_v14 }
 0x2f8   :  { %v788_v16 = vld [vmem:[%s5981_s1 + $0x17d8] sm:$0xff]  ;;  %2244 = vmatpush.msra.mxu3 %v704_v15 }
 0x2f9   :  { %v568_v1 = vld [vmem:[%s5981_s1 + $0x10f8] sm:$0xff]  ;;  %2259 = vmatpush.msra.mxu0 %v788_v16  ;;  %v5602_v16 = vld [vmem:[%s5982_s2] sm:$0xf] }
 0x2fa   :  { %v632_v18 = vld [vmem:[%s5981_s1 + $0x12f8] sm:$0xff]  ;;  %2206 = vmatpush.msra.mxu1 %v568_v1  ;;  %v1029_v1 = vperm.slane %v5602_v16, 2 }
 0x2fb   :  { %v700_v19 = vld [vmem:[%s5981_s1 + $0x1518] sm:$0xff]  ;;  %2226 = vmatpush.msra.mxu2 %v632_v18 }
 0x2fc   :  { %v784_v20 = vld [vmem:[%s5981_s1 + $0x17b8] sm:$0xff]  ;;  %2245 = vmatpush.msra.mxu3 %v700_v19 }
 0x2fd   :  { %v564_v21 = vld [vmem:[%s5981_s1 + $0x10d8] sm:$0xff]  ;;  %2260 = vmatpush.msra.mxu0 %v784_v20  ;;  %v1028_v20 = vperm.slane %v5602_v16, 1 }
 0x2fe   :  { %v628_v22 = vld [vmem:[%s5981_s1 + $0x12d8] sm:$0xff]  ;;  %2207 = vmatpush.msra.mxu1 %v564_v21  ;;  %v5612_v21 = vpop.f32.mrf.mxu0 }
 0x2ff   :  { %v696_v23 = vld [vmem:[%s5981_s1 + $0x14f8] sm:$0xff]  ;;  %2227 = vmatpush.msra.mxu2 %v628_v22  ;;  %v1735_v22 = vpop.f32.mrf.mxu2 }
 0x300   :  { %v780_v25 = vld [vmem:[%s5981_s1 + $0x1798] sm:$0xff]  ;;  %2246 = vmatpush.msra.mxu3 %v696_v23 }
 0x301   :  { %v560_v26 = vld [vmem:[%s5981_s1 + $0x10b8] sm:$0xff]  ;;  %2261 = vmatpush.msra.mxu0 %v780_v25 }
 0x302   :  { %v624_v27 = vld [vmem:[%s5981_s1 + $0x12b8] sm:$0xff]  ;;  %2208 = vmatpush.msra.mxu1 %v560_v26 }
 0x303   :  { %v692_v28 = vld [vmem:[%s5981_s1 + $0x14d8] sm:$0xff]  ;;  %2228 = vmatpush.msra.mxu2 %v624_v27 }
 0x304   :  { %v776_v30 = vld [vmem:[%s5981_s1 + $0x1778] sm:$0xff]  ;;  %2247 = vmatpush.msra.mxu3 %v692_v28 }
 0x305   :  { %v556_v2 = vld [vmem:[%s5981_s1 + $0x1098] sm:$0xff]  ;;  %2262 = vmatpush.msra.mxu0 %v776_v30 }
 0x306   :  { %v620_v31 = vld [vmem:[%s5981_s1 + $0x1298] sm:$0xff]  ;;  %2209 = vmatpush.msra.mxu1 %v556_v2  ;;  %v1736_v2 = vadd.f32 %v1735_v22, %v1029_v1 }
 0x307   :  { %v688_v32 = vld [vmem:[%s5981_s1 + $0x14b8] sm:$0xff]  ;;  %2229 = vmatpush.msra.mxu2 %v620_v31 }
 0x308   :  { %v772_v60 = vld [vmem:[%s5981_s1 + $0x1758] sm:$0xff]  ;;  %2248 = vmatpush.msra.mxu3 %v688_v32 }
 0x309   :  { %v552_v35 = vld [vmem:[%s5981_s1 + $0x1078] sm:$0xff]  ;;  %2263 = vmatpush.msra.mxu0 %v772_v60  ;;  %v1416_v60 = vadd.f32 %v5407_v10, %v1028_v20 }
 0x30a   :  { %v616_v36 = vld [vmem:[%s5981_s1 + $0x1278] sm:$0xff]  ;;  %2210 = vmatpush.msra.mxu1 %v552_v35  ;;  %v5639_v35 = vpop.f32.mrf.mxu1 }
 0x30b   :  { %v684_v37 = vld [vmem:[%s5981_s1 + $0x1498] sm:$0xff]  ;;  %2230 = vmatpush.msra.mxu2 %v616_v36  ;;  %v1755_v36 = vpop.f32.mrf.mxu3 }
 0x30c   :  { %v768_v40 = vld [vmem:[%s5981_s1 + $0x1738] sm:$0xff]  ;;  %2249 = vmatpush.msra.mxu3 %v684_v37 }
 0x30d   :  { %v548_v41 = vld [vmem:[%s5981_s1 + $0x1058] sm:$0xff]  ;;  %2264 = vmatpush.msra.mxu0 %v768_v40 }
 0x30e   :  { %v612_v42 = vld [vmem:[%s5981_s1 + $0x1258] sm:$0xff]  ;;  %2211 = vmatpush.msra.mxu1 %v548_v41 }
 0x30f   :  { %v680_v43 = vld [vmem:[%s5981_s1 + $0x1478] sm:$0xff]  ;;  %2231 = vmatpush.msra.mxu2 %v612_v42 }
 0x310   :  { %v764_v44 = vld [vmem:[%s5981_s1 + $0x1718] sm:$0xff]  ;;  %2250 = vmatpush.msra.mxu3 %v680_v43  ;;  %v1756_v43 = vadd.f32 %v1755_v36, %v1736_v2 }
 0x311   :  { %v544_v45 = vld [vmem:[%s5981_s1 + $0x1038] sm:$0xff]  ;;  %2265 = vmatpush.msra.mxu0 %v764_v44 }
 0x312   :  { %v608_v46 = vld [vmem:[%s5981_s1 + $0x1238] sm:$0xff]  ;;  %2212 = vmatpush.msra.mxu1 %v544_v45 }
 0x313   :  { %v676_v47 = vld [vmem:[%s5981_s1 + $0x1458] sm:$0xff]  ;;  %2232 = vmatpush.msra.mxu2 %v608_v46 }
 0x314   :  { %v760_v53 = vld [vmem:[%s5981_s1 + $0x16f8] sm:$0xff]  ;;  %2251 = vmatpush.msra.mxu3 %v676_v47  ;;  %v1436_v47 = vadd.f32 %v5435_v17, %v1416_v60 }
 0x315   :  { %v540_v49 = vld [vmem:[%s5981_s1 + $0x1018] sm:$0xff]  ;;  %2266 = vmatpush.msra.mxu0 %v760_v53  ;;  %v1775_v53 = vpop.f32.mrf.mxu0 }
 0x316   :  { %v604_v54 = vld [vmem:[%s5981_s1 + $0x1218] sm:$0xff]  ;;  %2213 = vmatpush.msra.mxu1 %v540_v49 }
 0x317   :  { %v672_v55 = vld [vmem:[%s5981_s1 + $0x1438] sm:$0xff]  ;;  %2233 = vmatpush.msra.mxu2 %v604_v54  ;;  %2214 = vmatmul.f32.vlgmr.msra.gmra.mxu1 %v2573_v63 }
 0x318   :  { %v756_v56 = vld [vmem:[%s5981_s1 + $0x16d8] sm:$0xff]  ;;  %2252 = vmatpush.msra.mxu3 %v672_v55  ;;  %2234 = vmatmul.f32.vlgmr.msra.gmra.mxu2 %v2574_v6  ;;  %v1795_v6 = vpop.f32.mrf.mxu1 }
 0x319   :  { %v856_v50 = vld [vmem:[%s5981_s1 + $0x19f8] sm:$0xff]  ;;  %2267 = vmatpush.msra.mxu0 %v756_v56 }
 0x31a   :  { %v920_v61 = vld [vmem:[%s5981_s1 + $0x1bf8] sm:$0xff]  ;;  %2278 = vmatpush.msrb.mxu1 %v856_v50 }
 0x31b   :  { %v668_v62 = vld [vmem:[%s5981_s1 + $0x1418] sm:$0xff]  ;;  %2298 = vmatpush.msrb.mxu2 %v920_v61  ;;  %v1776_v61 = vadd.f32 %v1775_v53, %v1756_v43  ;;  %v2376_v53 = vld [vmem:[%s5983_s3 + $0x70] sm:$0xff] }
 0x31c   :  { %v752_v4 = vld [vmem:[%s5981_s1 + $0x16b8] sm:$0xff]  ;;  %2253 = vmatpush.msra.mxu3 %v668_v62 }
 0x31d   :  { %v852_v7 = vld [vmem:[%s5981_s1 + $0x19d8] sm:$0xff]  ;;  %2268 = vmatpush.msra.mxu0 %v752_v4  ;;  %2254 = vmatmul.f32.vlgmr.msra.gmra.mxu3 %v4831_v33  ;;  %v1456_v4 = vadd.f32 %v5460_v24, %v1436_v47 }
 0x31e   :  { %v916_v8 = vld [vmem:[%s5981_s1 + $0x1bd8] sm:$0xff]  ;;  %2279 = vmatpush.msrb.mxu1 %v852_v7 }
 0x31f   :  { %v984_v9 = vld [vmem:[%s5981_s1 + $0x1df8] sm:$0xff]  ;;  %2299 = vmatpush.msrb.mxu2 %v916_v8 }
 0x320   :  { %v748_v3 = vld [vmem:[%s5981_s1 + $0x1698] sm:$0xff]  ;;  %2318 = vmatpush.msrb.mxu3 %v984_v9 }
 0x321   :  { %v848_v0 = vld [vmem:[%s5981_s1 + $0x19b8] sm:$0xff]  ;;  %2269 = vmatpush.msra.mxu0 %v748_v3 }
 0x322   :  { %v912_v13 = vld [vmem:[%s5981_s1 + $0x1bb8] sm:$0xff]  ;;  %2280 = vmatpush.msrb.mxu1 %v848_v0 }
 0x323   :  { %v980_v51 = vld [vmem:[%s5981_s1 + $0x1dd8] sm:$0xff]  ;;  %2300 = vmatpush.msrb.mxu2 %v912_v13  ;;  %v1796_v13 = vadd.f32 %v1795_v6, %v1776_v61  ;;  %v2374_v6 = vld [vmem:[%s5983_s3 + $0x60] sm:$0xff] }
 0x324   :  { %v744_v14 = vld [vmem:[%s5981_s1 + $0x1678] sm:$0xff]  ;;  %2319 = vmatpush.msrb.mxu3 %v980_v51 }
 0x325   :  { %v844_v33 = vld [vmem:[%s5981_s1 + $0x1998] sm:$0xff]  ;;  %2270 = vmatpush.msra.mxu0 %v744_v14 }
 0x326   :  { %v908_v15 = vld [vmem:[%s5981_s1 + $0x1b98] sm:$0xff]  ;;  %2281 = vmatpush.msrb.mxu1 %v844_v33  ;;  %v1476_v33 = vadd.f32 %v5388_v5, %v1456_v4  ;;  %v2407_v4 = vld [vmem:[%s5983_s3 + $0x168] sm:$0xff] }
 0x327   :  { %v976_v18 = vld [vmem:[%s5981_s1 + $0x1db8] sm:$0xff]  ;;  %2301 = vmatpush.msrb.mxu2 %v908_v15  ;;  %v1815_v15 = vpop.f32.mrf.mxu2 }
 0x328   :  { %v740_v19 = vld [vmem:[%s5981_s1 + $0x1658] sm:$0xff]  ;;  %2320 = vmatpush.msrb.mxu3 %v976_v18 }
 0x329   :  { %v840_v23 = vld [vmem:[%s5981_s1 + $0x1978] sm:$0xff]  ;;  %2271 = vmatpush.msra.mxu0 %v740_v19 }
 0x32a   :  { %v904_v25 = vld [vmem:[%s5981_s1 + $0x1b78] sm:$0xff]  ;;  %2282 = vmatpush.msrb.mxu1 %v840_v23  ;;  %v1816_v23 = vadd.f32 %v1815_v15, %v1796_v13 }
 0x32b   :  { %v972_v26 = vld [vmem:[%s5981_s1 + $0x1d98] sm:$0xff]  ;;  %2302 = vmatpush.msrb.mxu2 %v904_v25 }
 0x32c   :  { %v736_v27 = vld [vmem:[%s5981_s1 + $0x1638] sm:$0xff]  ;;  %2321 = vmatpush.msrb.mxu3 %v972_v26 }
 0x32d   :  { %v836_v28 = vld [vmem:[%s5981_s1 + $0x1958] sm:$0xff]  ;;  %2272 = vmatpush.msra.mxu0 %v736_v27  ;;  %v1496_v27 = vadd.f32 %v5475_v29, %v1476_v33  ;;  %v2372_v33 = vld [vmem:[%s5983_s3 + $0x50] sm:$0xff] }
 0x32e   :  { %v900_v30 = vld [vmem:[%s5981_s1 + $0x1b58] sm:$0xff]  ;;  %2283 = vmatpush.msrb.mxu1 %v836_v28  ;;  %v1835_v28 = vpop.f32.mrf.mxu3 }
 0x32f   :  { %v968_v31 = vld [vmem:[%s5981_s1 + $0x1d78] sm:$0xff]  ;;  %2303 = vmatpush.msrb.mxu2 %v900_v30  ;;  %v1836_v36 = vadd.f32 %v1835_v28, %v1816_v23  ;;  %v1895_v61 = vpop.f32.mrf.mxu2  ;;  %v2370_v23 = vld [vmem:[%s5983_s3 + $0x40] sm:$0xff] }
 0x330   :  { %v732_v32 = vld [vmem:[%s5981_s1 + $0x1618] sm:$0xff]  ;;  %2322 = vmatpush.msrb.mxu3 %v968_v31  ;;  %v2402_v28 = vld [vmem:[%s5983_s3 + $0x140] sm:$0xff] }
 0x331   :  { %v832_v37 = vld [vmem:[%s5981_s1 + $0x1938] sm:$0xff]  ;;  %2273 = vmatpush.msra.mxu0 %v732_v32 }
 0x332   :  { %v896_v40 = vld [vmem:[%s5981_s1 + $0x1b38] sm:$0xff]  ;;  %2284 = vmatpush.msrb.mxu1 %v832_v37 }
 0x333   :  { %v964_v41 = vld [vmem:[%s5981_s1 + $0x1d58] sm:$0xff]  ;;  %2304 = vmatpush.msrb.mxu2 %v896_v40 }
 0x334   :  { %v1024_v10 = vld [vmem:[%s5981_s1 + $0x1f38] sm:$0xff]  ;;  %2323 = vmatpush.msrb.mxu3 %v964_v41  ;;  %v1516_v41 = vadd.f32 %v5501_v38, %v1496_v27  ;;  %v2386_v27 = vld [vmem:[%s5983_s3 + $0xc0] sm:$0xff] }
 0x335   :  { %v828_v42 = vld [vmem:[%s5981_s1 + $0x1918] sm:$0xff]  ;;  %2344 = vmatpush.msrb.mxu0 %v1024_v10  ;;  %v1855_v10 = vpop.f32.mrf.mxu0 }
 0x336   :  { %v2576_v44 = vld.sshfl [vmem:[#allocation1 + $0x18] sm:$0xff pattern:$0x73625140]  ;;  %2285 = vmatpush.msrb.mxu1 %v828_v42  ;;  %v1915_v13 = vpop.f32.mrf.mxu3 }
 0x337   :  { %2274 = vmatmul.f32.vlgmr.msra.gmra.mxu0 %v2576_v44  ;;  %v892_v45 = vld [vmem:[%s5981_s1 + $0x1b18] sm:$0xff] }
 0x338   :  { %v960_v46 = vld [vmem:[%s5981_s1 + $0x1d38] sm:$0xff]  ;;  %2305 = vmatpush.msrb.mxu2 %v892_v45  ;;  %v1856_v45 = vadd.f32 %v1855_v10, %v1836_v36 }
 0x339   :  { %v1020_v49 = vld [vmem:[%s5981_s1 + $0x1f18] sm:$0xff]  ;;  %2324 = vmatpush.msrb.mxu3 %v960_v46  ;;  %v2577_v46 = vld.sshfl [vmem:[#allocation1 + $0x20] sm:$0xff pattern:$0x73625140] }
 0x33a   :  { %v824_v54 = vld [vmem:[%s5981_s1 + $0x18f8] sm:$0xff]  ;;  %2345 = vmatpush.msrb.mxu0 %v1020_v49  ;;  %v1536_v49 = vadd.f32 %v5529_v52, %v1516_v41  ;;  %v2391_v52 = vld [vmem:[%s5983_s3 + $0xe8] sm:$0xff] }
 0x33b   :  { %v888_v55 = vld [vmem:[%s5981_s1 + $0x1af8] sm:$0xff]  ;;  %2286 = vmatpush.msrb.mxu1 %v824_v54  ;;  %v1875_v54 = vpop.f32.mrf.mxu1  ;;  %v2367_v41 = vld [vmem:[%s5983_s3 + $0x28] sm:$0xff] }
 0x33c   :  { %v956_v17 = vld [vmem:[%s5981_s1 + $0x1d18] sm:$0xff]  ;;  %2306 = vmatpush.msrb.mxu2 %v888_v55  ;;  %v2578_v55 = vld.sshfl [vmem:[#allocation1 + $0x28] sm:$0xff pattern:$0x73625140] }
 0x33d   :  { %v1016_v56 = vld [vmem:[%s5981_s1 + $0x1ef8] sm:$0xff]  ;;  %2325 = vmatpush.msrb.mxu3 %v956_v17  ;;  %v2392_v17 = vld [vmem:[%s5983_s3 + $0xf0] sm:$0xff] }
 0x33e   :  { %v820_v50 = vld [vmem:[%s5981_s1 + $0x18d8] sm:$0xff]  ;;  %2346 = vmatpush.msrb.mxu0 %v1016_v56  ;;  %v2408_v56 = vld [vmem:[%s5983_s3 + $0x170] sm:$0xff] }
 0x33f   :  { %v884_v62 = vld [vmem:[%s5981_s1 + $0x1ad8] sm:$0xff]  ;;  %2287 = vmatpush.msrb.mxu1 %v820_v50  ;;  %v2375_v50 = vld [vmem:[%s5983_s3 + $0x68] sm:$0xff] }
 0x340   :  { %v952_v63 = vld [vmem:[%s5981_s1 + $0x1cf8] sm:$0xff]  ;;  %2307 = vmatpush.msrb.mxu2 %v884_v62  ;;  %v1876_v62 = vadd.f32 %v1875_v54, %v1856_v45 }
 0x341   :  { %v1012_v7 = vld [vmem:[%s5981_s1 + $0x1ed8] sm:$0xff]  ;;  %2326 = vmatpush.msrb.mxu3 %v952_v63  ;;  %v2579_v63 = vld.sshfl [vmem:[#allocation1 + $0x30] sm:$0xff pattern:$0x73625140] }
 0x342   :  { %v816_v8 = vld [vmem:[%s5981_s1 + $0x18b8] sm:$0xff]  ;;  %2347 = vmatpush.msrb.mxu0 %v1012_v7  ;;  %v1556_v7 = vadd.f32 %v5449_v34, %v1536_v49 }
 0x343   :  { %v880_v9 = vld [vmem:[%s5981_s1 + $0x1ab8] sm:$0xff]  ;;  %2288 = vmatpush.msrb.mxu1 %v816_v8  ;;  %v2390_v8 = vld [vmem:[%s5983_s3 + $0xe0] sm:$0xff] }
 0x344   :  { %v948_v24 = vld [vmem:[%s5981_s1 + $0x1cd8] sm:$0xff]  ;;  %2308 = vmatpush.msrb.mxu2 %v880_v9  ;;  %v1896_v9 = vadd.f32 %v1895_v61, %v1876_v62  ;;  %v1576_v34 = vadd.f32 %v5531_v48, %v1556_v7  ;;  %v2388_v48 = vld [vmem:[%s5983_s3 + $0xd0] sm:$0xff]  ;;  %v2363_v61 = vld [vmem:[%s5983_s3 + $0x8] sm:$0xff]  ;;  %v2358_v7 = vmax.f32 %v4241_v59, 0.0 }
 0x345   :  { %v1008_v3 = vld [vmem:[%s5981_s1 + $0x1eb8] sm:$0xff]  ;;  %2327 = vmatpush.msrb.mxu3 %v948_v24  ;;  %v2406_v24 = vld [vmem:[%s5983_s3 + $0x160] sm:$0xff]  ;;  %v2379_v62 = vld [vmem:[%s5983_s3 + $0x88] sm:$0xff] }
 0x346   :  { %v812_v0 = vld [vmem:[%s5981_s1 + $0x1898] sm:$0xff]  ;;  %2348 = vmatpush.msrb.mxu0 %v1008_v3  ;;  %v1596_v15 = vadd.f32 %v5551_v57, %v1576_v34  ;;  %v2387_v57 = vld [vmem:[%s5983_s3 + $0xc8] sm:$0xff] }
 0x347   :  { %v876_v51 = vld [vmem:[%s5981_s1 + $0x1a98] sm:$0xff]  ;;  %2289 = vmatpush.msrb.mxu1 %v812_v0  ;;  %v2423_v59 = vld [vmem:[%s5983_s3 + $0x1e8] sm:$0xff] }
 0x348   :  { %v944_v14 = vld [vmem:[%s5981_s1 + $0x1cb8] sm:$0xff]  ;;  %2309 = vmatpush.msrb.mxu2 %v876_v51 }
 0x349   :  { %v1004_v1 = vld [vmem:[%s5981_s1 + $0x1e98] sm:$0xff]  ;;  %2328 = vmatpush.msrb.mxu3 %v944_v14 }
 0x34a   :  { %v808_v18 = vld [vmem:[%s5981_s1 + $0x1878] sm:$0xff]  ;;  %2349 = vmatpush.msrb.mxu0 %v1004_v1  ;;  %v1935_v1 = vpop.f32.mrf.mxu0 }
 0x34b   :  { %v872_v19 = vld [vmem:[%s5981_s1 + $0x1a78] sm:$0xff]  ;;  %2290 = vmatpush.msrb.mxu1 %v808_v18  ;;  %v1916_v18 = vadd.f32 %v1915_v13, %v1896_v9  ;;  %v2420_v13 = vld [vmem:[%s5983_s3 + $0x1d0] sm:$0xff] }
 0x34c   :  { %v940_v5 = vld [vmem:[%s5981_s1 + $0x1c98] sm:$0xff]  ;;  %2310 = vmatpush.msrb.mxu2 %v872_v19  ;;  %v2404_v19 = vld [vmem:[%s5983_s3 + $0x150] sm:$0xff] }
 0x34d   :  { %v1000_v20 = vld [vmem:[%s5981_s1 + $0x1e78] sm:$0xff]  ;;  %2329 = vmatpush.msrb.mxu3 %v940_v5  ;;  %v2371_v5 = vld [vmem:[%s5983_s3 + $0x48] sm:$0xff] }
 0x34e   :  { %v804_v22 = vld [vmem:[%s5981_s1 + $0x1858] sm:$0xff]  ;;  %2350 = vmatpush.msrb.mxu0 %v1000_v20  ;;  %v1936_v20 = vadd.f32 %v1935_v1, %v1916_v18 }
 0x34f   :  { %v868_v25 = vld [vmem:[%s5981_s1 + $0x1a58] sm:$0xff]  ;;  %2291 = vmatpush.msrb.mxu1 %v804_v22  ;;  %v2403_v22 = vld [vmem:[%s5983_s3 + $0x148] sm:$0xff] }
 0x350   :  { %v936_v26 = vld [vmem:[%s5981_s1 + $0x1c78] sm:$0xff]  ;;  %2311 = vmatpush.msrb.mxu2 %v868_v25  ;;  %v1616_v25 = vadd.f32 %v5576_v11, %v1596_v15 }
 0x351   :  { %v996_v30 = vld [vmem:[%s5981_s1 + $0x1e58] sm:$0xff]  ;;  %2330 = vmatpush.msrb.mxu3 %v936_v26  ;;  %v1955_v26 = vpop.f32.mrf.mxu1 }
 0x352   :  { %v800_v2 = vld [vmem:[%s5981_s1 + $0x1838] sm:$0xff]  ;;  %2351 = vmatpush.msrb.mxu0 %v996_v30 }
 0x353   :  { %v864_v31 = vld [vmem:[%s5981_s1 + $0x1a38] sm:$0xff]  ;;  %2292 = vmatpush.msrb.mxu1 %v800_v2  ;;  %v1636_v2 = vadd.f32 %v5503_v39, %v1616_v25  ;;  %v2384_v39 = vld [vmem:[%s5983_s3 + $0xb0] sm:$0xff] }
 0x354   :  { %v932_v29 = vld [vmem:[%s5981_s1 + $0x1c58] sm:$0xff]  ;;  %2312 = vmatpush.msrb.mxu2 %v864_v31  ;;  %v1975_v31 = vpop.f32.mrf.mxu2 }
 0x355   :  { %v992_v32 = vld [vmem:[%s5981_s1 + $0x1e38] sm:$0xff]  ;;  %2331 = vmatpush.msrb.mxu3 %v932_v29  ;;  %v1956_v29 = vadd.f32 %v1955_v26, %v1936_v20  ;;  %v1656_v36 = vadd.f32 %v5578_v12, %v1636_v2  ;;  %v2383_v12 = vld [vmem:[%s5983_s3 + $0xa8] sm:$0xff] }
 0x356   :  { %v796_v60 = vld [vmem:[%s5981_s1 + $0x1818] sm:$0xff]  ;;  %2352 = vmatpush.msrb.mxu0 %v992_v32  ;;  %v2415_v20 = vld [vmem:[%s5983_s3 + $0x1a8] sm:$0xff] }
 0x357   :  { %v860_v37 = vld [vmem:[%s5981_s1 + $0x1a18] sm:$0xff]  ;;  %2293 = vmatpush.msrb.mxu1 %v796_v60  ;;  %v2368_v60 = vld [vmem:[%s5983_s3 + $0x30] sm:$0xff]  ;;  %v1676_v10 = vadd.f32 %v5612_v21, %v1656_v36  ;;  %v2382_v21 = vld [vmem:[%s5983_s3 + $0xa0] sm:$0xff] }
 0x358   :  { %v928_v40 = vld [vmem:[%s5981_s1 + $0x1c38] sm:$0xff]  ;;  %2313 = vmatpush.msrb.mxu2 %v860_v37  ;;  %2294 = vmatmul.f32.vlgmr.msrb.gmra.mxu1 %v2577_v46  ;;  %v1976_v37 = vadd.f32 %v1975_v31, %v1956_v29  ;;  %v2398_v46 = vld [vmem:[%s5983_s3 + $0x120] sm:$0xff]  ;;  %v2411_v2 = vld [vmem:[%s5983_s3 + $0x188] sm:$0xff] }
 0x359   :  { %v988_v42 = vld [vmem:[%s5981_s1 + $0x1e18] sm:$0xff]  ;;  %2332 = vmatpush.msrb.mxu3 %v928_v40  ;;  %2314 = vmatmul.f32.vlgmr.msrb.gmra.mxu2 %v2578_v55  ;;  %v2400_v40 = vld [vmem:[%s5983_s3 + $0x130] sm:$0xff] }
 0x35a   :  { %v2377_v43 = vld [vmem:[%s5983_s3 + $0x78] sm:$0xff]  ;;  %2353 = vmatpush.msrb.mxu0 %v988_v42  ;;  %v1995_v42 = vpop.f32.mrf.mxu3 }
 0x35b   :  { %v2393_v44 = vld [vmem:[%s5983_s3 + $0xf8] sm:$0xff]  ;;  %v1996_v45 = vadd.f32 %v1995_v42, %v1976_v37 }
 0x35c   :  { %v2409_v38 = vld [vmem:[%s5983_s3 + $0x178] sm:$0xff]  ;;  %2437 = vmatpush.msra.mxu0 %v2377_v43  ;;  %2457 = vmatpush.msra.mxu1 %v2393_v44  ;;  %v2399_v43 = vld [vmem:[%s5983_s3 + $0x128] sm:$0xff]  ;;  %v2366_v44 = vld [vmem:[%s5983_s3 + $0x20] sm:$0xff] }
 0x35d   :  { %v924_v47 = vld [vmem:[%s5981_s1 + $0x1c18] sm:$0xff]  ;;  %2477 = vmatpush.msra.mxu2 %v2409_v38  ;;  %v2015_v38 = vpop.f32.mrf.mxu0 }
 0x35e   :  { %2333 = vmatpush.msrb.mxu3 %v924_v47  ;;  %2438 = vmatpush.msra.mxu0 %v2376_v53  ;;  %v2373_v3 = vld [vmem:[%s5983_s3 + $0x58] sm:$0xff]  ;;  %v1696_v53 = vadd.f32 %v5639_v35, %v1676_v10  ;;  %v2016_v54 = vadd.f32 %v2015_v38, %v1996_v45  ;;  %v2380_v35 = vld [vmem:[%s5983_s3 + $0x90] sm:$0xff] }
 0x35f   :  { %2334 = vmatmul.f32.vlgmr.msrb.gmra.mxu3 %v2579_v63  ;;  %2458 = vmatpush.msra.mxu1 %v2392_v17  ;;  %v2580_v0 = vld.sshfl [vmem:[#allocation1 + $0x38] sm:$0xff pattern:$0x73625140]  ;;  %v2364_v17 = vld [vmem:[%s5983_s3 + $0x10] sm:$0xff] }
 0x360   :  { %2478 = vmatpush.msra.mxu2 %v2408_v56  ;;  %2439 = vmatpush.msra.mxu0 %v2375_v50  ;;  %v2389_v51 = vld [vmem:[%s5983_s3 + $0xd8] sm:$0xff]  ;;  %v2035_v56 = vpop.f32.mrf.mxu1  ;;  %v2396_v50 = vld [vmem:[%s5983_s3 + $0x110] sm:$0xff] }
 0x361   :  { %2459 = vmatpush.msra.mxu1 %v2391_v52  ;;  %2550 = vmatmul.msk.f32.vlgmr.msrb.gmra.mxu0 %vm1075_vm0, %v2580_v0  ;;  %v2405_v14 = vld [vmem:[%s5983_s3 + $0x158] sm:$0xff]  ;;  %v1716_v52 = vadd.f32 %v5553_v58, %v1696_v53  ;;  %v2036_v63 = vadd.f32 %v2035_v56, %v2016_v54  ;;  %v2378_v58 = vld [vmem:[%s5983_s3 + $0x80] sm:$0xff] }
 0x362   :  { %2479 = vmatpush.msra.mxu2 %v2407_v4  ;;  %2440 = vmatpush.msra.mxu0 %v2374_v6  ;;  %v2369_v30 = vld [vmem:[%s5983_s3 + $0x38] sm:$0xff]  ;;  %v2395_v4 = vld [vmem:[%s5983_s3 + $0x108] sm:$0xff]  ;;  %v2362_v6 = vld [vmem:[%s5983_s3] sm:$0xff] }
 0x363   :  { %2460 = vmatpush.msra.mxu1 %v2390_v8  ;;  %v2385_v11 = vld [vmem:[%s5983_s3 + $0xb8] sm:$0xff]  ;;  %v2394_v8 = vld [vmem:[%s5983_s3 + $0x100] sm:$0xff]  ;;  %v2359_v9 = vmax.f32 %v1716_v52, 0.0 }
 0x364   :  { %2480 = vmatpush.msra.mxu2 %v2406_v24  ;;  %2441 = vmatpush.msra.mxu0 %v2373_v3  ;;  %v2401_v32 = vld [vmem:[%s5983_s3 + $0x138] sm:$0xff]  ;;  %v2360_v24 = vmax.f32 %v2036_v63, 0.0  ;;  %v2424_v3 = vld [vmem:[%s5983_s3 + $0x1f0] sm:$0xf]  ;;  %v2422_v0 = vld [vmem:[%s5983_s3 + $0x1e0] sm:$0xff] }
 0x365   :  { %2461 = vmatpush.msra.mxu1 %v2389_v51  ;;  %v2365_v47 = vld [vmem:[%s5983_s3 + $0x18] sm:$0xff]  ;;  %2551 = vmatpush.msk.msra.mxu3 %vm2433_vm1, %v2424_v3  ;;  %v2419_v51 = vld [vmem:[%s5983_s3 + $0x1c8] sm:$0xff] }
 0x366   :  { %2481 = vmatpush.msra.mxu2 %v2405_v14  ;;  %2442 = vmatpush.msra.mxu0 %v2372_v33  ;;  %v2381_v49 = vld [vmem:[%s5983_s3 + $0x98] sm:$0xff]  ;;  %v2418_v14 = vld [vmem:[%s5983_s3 + $0x1c0] sm:$0xff]  ;;  %v1030_v33 = vperm.slane %v5602_v16, 3 }
 0x367   :  { %2462 = vmatpush.msra.mxu1 %v2388_v48  ;;  %v2397_v55 = vld [vmem:[%s5983_s3 + $0x118] sm:$0xff]  ;;  %2499 = vmatpush.msra.mxu3 %v2423_v59  ;;  %v2075_v48 = vpop.f32.mrf.mxu2 }
 0x368   :  { %2482 = vmatpush.msra.mxu2 %v2404_v19  ;;  %2443 = vmatpush.msra.mxu0 %v2371_v5  ;;  %v2421_v34 = vld [vmem:[%s5983_s3 + $0x1d8] sm:$0xff]  ;;  %v2055_v15 = vpop.f32.mrf.mxu1  ;;  %v2416_v19 = vld [vmem:[%s5983_s3 + $0x1b0] sm:$0xff] }
 0x369   :  { %2463 = vmatpush.msra.mxu1 %v2387_v57  ;;  %2500 = vmatpush.msra.mxu3 %v2422_v0  ;;  %v2056_v1 = vadd.f32 %v2055_v15, %v1030_v33  ;;  %v2417_v18 = vld [vmem:[%s5983_s3 + $0x1b8] sm:$0xff]  ;;  %v2095_v57 = vpop.f32.mrf.mxu3 }
 0x36a   :  { %2483 = vmatpush.msra.mxu2 %v2403_v22  ;;  %2444 = vmatpush.msra.mxu0 %v2370_v23  ;;  %v2115_v22 = vpop.f32.mrf.mxu0  ;;  %v2414_v23 = vld [vmem:[%s5983_s3 + $0x1a0] sm:$0xff]  ;;  %v2413_v26 = vld [vmem:[%s5983_s3 + $0x198] sm:$0xff] }
 0x36b   :  { %2464 = vmatpush.msra.mxu1 %v2386_v27  ;;  %2501 = vmatpush.msra.mxu3 %v2421_v34  ;;  %v2076_v5 = vadd.f32 %v2075_v48, %v2056_v1 }
 0x36c   :  { %2484 = vmatpush.msra.mxu2 %v2402_v28  ;;  %2445 = vmatpush.msra.mxu0 %v2369_v30  ;;  %v2412_v28 = vld [vmem:[%s5983_s3 + $0x190] sm:$0xff] }
 0x36d   :  { %2465 = vmatpush.msra.mxu1 %v2385_v11  ;;  %2502 = vmatpush.msra.mxu3 %v2420_v13  ;;  %v2096_v16 = vadd.f32 %v2095_v57, %v2076_v5  ;;  %v2410_v11 = vld [vmem:[%s5983_s3 + $0x180] sm:$0xff] }
 0x36e   :  { %2485 = vmatpush.msra.mxu2 %v2401_v32  ;;  %2446 = vmatpush.msra.mxu0 %v2368_v60 }
 0x36f   :  { %2466 = vmatpush.msra.mxu1 %v2384_v39  ;;  %2503 = vmatpush.msra.mxu3 %v2419_v51  ;;  %v2116_v25 = vadd.f32 %v2115_v22, %v2096_v16  ;;  %v2155_v31 = vpop.f32.mrf.mxu2 }
 0x370   :  { %2486 = vmatpush.msra.mxu2 %v2400_v40  ;;  %2447 = vmatpush.msra.mxu0 %v2367_v41  ;;  %v2135_v27 = vpop.f32.mrf.mxu1 }
 0x371   :  { %2467 = vmatpush.msra.mxu1 %v2383_v12  ;;  %2504 = vmatpush.msra.mxu3 %v2418_v14  ;;  %v2136_v30 = vadd.f32 %v2135_v27, %v2116_v25  ;;  %v2175_v32 = vpop.f32.mrf.mxu3 }
 0x372   :  { %2487 = vmatpush.msra.mxu2 %v2399_v43  ;;  %2448 = vmatpush.msra.mxu0 %v2366_v44  ;;  %v2195_v36 = vpop.f32.mrf.mxu0 }
 0x373   :  { %2468 = vmatpush.msra.mxu1 %v2382_v21  ;;  %2505 = vmatpush.msra.mxu3 %v2417_v18  ;;  %v2156_v29 = vadd.f32 %v2155_v31, %v2136_v30 }
 0x374   :  { %2488 = vmatpush.msra.mxu2 %v2398_v46  ;;  %2449 = vmatpush.msra.mxu0 %v2365_v47 }
 0x375   :  { %2469 = vmatpush.msra.mxu1 %v2381_v49  ;;  %2506 = vmatpush.msra.mxu3 %v2416_v19  ;;  %v2176_v60 = vadd.f32 %v2175_v32, %v2156_v29 }
 0x376   :  { %2489 = vmatpush.msra.mxu2 %v2397_v55  ;;  %2450 = vmatpush.msra.mxu0 %v2364_v17  ;;  %v2554_v17 = vld [vmem:[%s5984_s4] ss:$0 sm:$0xff]  ;;  %s2607_s4 = smov [#allocation2]  }
 0x377   :  { %2470 = vmatpush.msra.mxu1 %v2380_v35  ;;  %2507 = vmatpush.msra.mxu3 %v2415_v20  ;;  %v2196_v37 = vadd.f32 %v2195_v36, %v2176_v60  ;;  %s2536_s20 = sshll.u32 %s2607_s4, 4  ;;  %s2537_s20 = int_to_ptr.vmem [resolvable:$true] %s2536_s20 }
 0x378   :  { %2490 = vmatpush.msra.mxu2 %v2396_v50  ;;  %2451 = vmatpush.msra.mxu0 %v2363_v61 }
 0x379   :  { %2471 = vmatpush.msra.mxu1 %v2379_v62  ;;  %2508 = vmatpush.msra.mxu3 %v2414_v23 }
 0x37a   :  { %2491 = vmatpush.msra.mxu2 %v2395_v4  ;;  %2452 = vmatpush.msra.mxu0 %v2362_v6 }
 0x37b   :  { %2472 = vmatpush.msra.mxu1 %v2378_v58  ;;  %2453 = vmatmul.f32.vlgmr.msra.gmra.mxu0 %v2358_v7 }
 0x37c   :  { %2492 = vmatpush.msra.mxu2 %v2394_v8  ;;  %2473 = vmatmul.f32.vlgmr.msra.gmra.mxu1 %v2359_v9 }
 0x37d   :  { %2493 = vmatmul.f32.vlgmr.msra.gmra.mxu2 %v2360_v24  ;;  %2509 = vmatpush.msra.mxu3 %v2413_v26 }
 0x37f   :  { %2510 = vmatpush.msra.mxu3 %v2412_v28 }
 0x381   :  { %2511 = vmatpush.msra.mxu3 %v2411_v2 }
 0x383   :  { %2512 = vmatpush.msra.mxu3 %v2410_v11 }
 0x394   :  { %v2215_v39 = vpop.f32.mrf.mxu1 }
 0x395   :  { %v2216_v41 = vadd.f32 %v2215_v39, %v2196_v37 }
 0x39b   :  { %v2235_v40 = vpop.f32.mrf.mxu2 }
 0x39c   :  { %v2236_v10 = vadd.f32 %v2235_v40, %v2216_v41 }
 0x3a0   :  { %v2255_v42 = vpop.f32.mrf.mxu3 }
 0x3a1   :  { %v2256_v43 = vadd.f32 %v2255_v42, %v2236_v10 }
 0x3b4   :  { %v2275_v12 = vpop.f32.mrf.mxu0 }
 0x3b5   :  { %v2276_v38 = vadd.f32 %v2275_v12, %v2256_v43 }
 0x3d5   :  { %v2295_v44 = vpop.f32.mrf.mxu1 }
 0x3d6   :  { %v2296_v21 = vadd.f32 %v2295_v44, %v2276_v38 }
 0x3dc   :  { %v2315_v45 = vpop.f32.mrf.mxu2 }
 0x3dd   :  { %v2316_v46 = vadd.f32 %v2315_v45, %v2296_v21 }
 0x3de   :  { %v2355_v53 = vpop.f32.mrf.mxu0 }
 0x3e2   :  { %v2335_v47 = vpop.f32.mrf.mxu3 }
 0x3e3   :  { %v2336_v49 = vadd.f32 %v2335_v47, %v2316_v46 }
 0x3e5   :  { %v2356_v54 = vadd.f32 %v2355_v53, %v2336_v49 }
 0x3e7   :  { %v2361_v55 = vmax.f32 %v2356_v54, 0.0 }
 0x3e9   :  { %2552 = vmatmul.msk.f32.vlgmr.msra.gmra.mxu3 %vm2429_vm2, %v2361_v55 }
 0x3f8   :  { %v2454_v56 = vpop.f32.mrf.mxu0 }
 0x3f9   :  { %v2455_v35 = vadd.f32 %v2554_v17, %v2454_v56  ;;  %v2474_v50 = vpop.f32.mrf.mxu1 }
 0x3fb   :  { %v2475_v52 = vadd.f32 %v2474_v50, %v2455_v35 }
 0x400   :  { %v2494_v61 = vpop.f32.mrf.mxu2 }
 0x401   :  { %v2495_v62 = vadd.f32 %v2494_v61, %v2475_v52 }
 0x46c   :  { %v2514_v63 = vpop.f32.mrf.mxu3 }
 0x46d   :  { %v2515_v4 = vadd.f32 %v2514_v63, %v2495_v62 }
 0x46f   :  { %v2518_v6 = vsel %vm2517_vm3, %v2515_v4, -inf }
 0x470   :  { %2519 = vmax.xlane.f32.xlu0 %v2518_v6 }
 0x4e3   :  { %v2520_v58 = vpop.xlane.xlu0 %2519 }
 0x4e4   :  { %v2521_v7 = vsub.f32 %v2515_v4, %v2520_v58 }
 0x4e6   :  { %v2522_v8 = vmul.f32 1.442695, %v2521_v7 }
 0x4e8   :  { %2555 = vpow2.f32 %v2522_v8 }
 0x4ee   :  { %v2556_v9 = vpop.eup %2555 }
 0x4ef   :  { %v2524_v24 = vsel %vm2517_vm3, %v2556_v9, 0.0 }
 0x4f0   :  { %2525 = vadd.xlane.f32.xlu0 %v2524_v24 }
 0x563   :  { %v2526_v3 = vpop.xlane.xlu0 %2525 }
 0x564   :  { %2557 = vlog2.f32 %v2526_v3 }
 0x56a   :  { %v2558_v59 = vpop.eup %2557 }
 0x56b   :  { %v2528_v0 = vmul.f32 0.6931472, %v2558_v59 }
 0x56d   :  { %v2529_v34 = vsub.f32 %v2521_v7, %v2528_v0 }
 0x56f   :  { %2530 = vst.msk [vmem:[#allocation2] sm:$0x3] %vm2517_vm3, %v2529_v34 }
 0x570   :  { %2541 = dma.vmem_to_hbm [thread:$0]  %s2537_s20, 32, %s2539_s23, [#allocation3]  }
 0x571   :  { %2605 = dma.done.wait [#allocation3], 32  }
 0x572   :  { %2606 = vsyncadd [#allocation3], 4294967264 }
 0x573   :  { %2546 = vsyncpa [#allocation3], 1 }

</bundles_post_ra>
